<compile_context>
chip_gen: v6e
topology: v6e:2x2x1
jax: 0.10.0
libtpu: 0.0.40
codegen_flags: <defaults>
</compile_context>

<pallas_src>
import functools

import jax
import jax.numpy as jnp
from jax.experimental import pallas as pl
from jax.experimental.pallas import tpu as pltpu

NEG_SLOPE = 0.1                               # LeakyReLU(0.1)
PE_DIM, GO_DIM, PROT_DIM = 128, 128, 480
FEAT_DIM = PE_DIM + GO_DIM + PROT_DIM         # 736
HIDDEN = [32, 32]                             # hidden_channels
NUM_CONV = len(HIDDEN)
LATENT = HIDDEN[0] * NUM_CONV                 # 64 (jk_mode == 'cat')
VMEM_LIMIT = 32 * 1024 * 1024                 # explicit scoped-VMEM limit


def _leaky(v):
    return jnp.where(v >= 0.0, v, NEG_SLOPE * v)


_dot = functools.partial(jnp.dot, preferred_element_type=jnp.float32)


# --------------------------------------------------------------------------
# Kernel 1 — per-row-block node encoders (no A_hat involved).
#   pg      = LeakyReLU( feat[:, :256] @ W_pg_blockdiag + [b_pe|b_go] )
#   xc      = pg @ W_fls^T                     (pe+go contribution to W_fls)
#   x_prot  = LeakyReLU( feat[:, 256:736] @ W_prot^T + b_prot )
#   z0      = (x_prot @ Wg0^T)  -> bf16        (input to propagation 1)
# --------------------------------------------------------------------------
def _encode_kernel(feat_ref, wpg_ref, bpg_ref, wprot_ref, bprot_ref,
                   wflspg_ref, wg0_ref, xc_ref, z0_ref):
    pg = _leaky(_dot(feat_ref[:, 0:PE_DIM + GO_DIM], wpg_ref[...])
                + bpg_ref[...])
    xc_ref[...] = _dot(pg, wflspg_ref[...])
    x_prot = _leaky(_dot(feat_ref[:, PE_DIM + GO_DIM:FEAT_DIM], wprot_ref[...])
                    + bprot_ref[...])
    z0_ref[...] = _dot(x_prot, wg0_ref[...]).astype(z0_ref.dtype)


# --------------------------------------------------------------------------
# Kernel 2 — GCNConv layer 1, A_hat tiled over (row blocks, k blocks).
#   acc += A[i,k] @ Z0[k]   (bf16 operands, f32 accumulation)
#   at last k: h1 = LeakyReLU(acc + b0)
#              xc2 = xc + h1 @ W_fls_h1 ; z1 = (h1 @ Wg1^T) -> bf16
# --------------------------------------------------------------------------
def _prop1_kernel(a_ref, z0_ref, xc_ref, b0_ref, wflsh1_ref, wg1_ref,
                  xc2_ref, z1_ref, acc_ref):
    k = pl.program_id(1)

    @pl.when(k == 0)
    def _():
        acc_ref[...] = jnp.zeros_like(acc_ref)

    acc_ref[...] += _dot(a_ref[...], z0_ref[...])

    @pl.when(k == pl.num_programs(1) - 1)
    def _():
        h1 = _leaky(acc_ref[...] + b0_ref[...])
        xc2_ref[...] = xc_ref[...] + _dot(h1, wflsh1_ref[...])
        z1_ref[...] = _dot(h1, wg1_ref[...]).astype(z1_ref.dtype)


# --------------------------------------------------------------------------
# Kernel 3 — GCNConv layer 2 (tiled like kernel 2) + fused tail:
#   h2 = LeakyReLU(A @ Z1 + b1)
#   x  = LeakyReLU(xc2 + h2 @ W_fls_h2 + b_fls)
#   hid = LeakyReLU(x @ W_head + b_head)   (cols 0:32 dt, 32:64 dg)
#   out = hid @ W_out_blockdiag + b_out    ([N,4]: cols 0:2 dt, 2:4 dg)
# --------------------------------------------------------------------------
def _prop2_kernel(a_ref, z1_ref, xc2_ref, b1_ref, wflsh2_ref, bfls_ref,
                  whead_ref, bhead_ref, wout_ref, bout_ref, out_ref, acc_ref):
    k = pl.program_id(1)

    @pl.when(k == 0)
    def _():
        acc_ref[...] = jnp.zeros_like(acc_ref)

    acc_ref[...] += _dot(a_ref[...], z1_ref[...])

    @pl.when(k == pl.num_programs(1) - 1)
    def _():
        h2 = _leaky(acc_ref[...] + b1_ref[...])
        x = _leaky(xc2_ref[...] + _dot(h2, wflsh2_ref[...]) + bfls_ref[...])
        hid = _leaky(_dot(x, whead_ref[...]) + bhead_ref[...])
        out_ref[...] = (_dot(hid, wout_ref[...]) + bout_ref[...]).astype(
            out_ref.dtype)


# --------------------------------------------------------------------------
# One-time (OUTSIDE the inference path) parameter repack: transposes, splits,
# block-diagonal fusions, so the kernels do zero runtime transposes/concats.
# --------------------------------------------------------------------------
def prepare_params(params):
    f32 = lambda a: jnp.asarray(a, jnp.float32)
    row = lambda a: f32(a).reshape(1, -1)

    wfls_t = f32(params["W_fls"]).T                     # [128, 64]

    # Block-diagonal pe/go encoder: feat cols 0:128 -> pg cols 0:64 (pe),
    # feat cols 128:256 -> pg cols 64:128 (go).
    w_pg = jnp.zeros((PE_DIM + GO_DIM, 2 * LATENT), jnp.float32)
    w_pg = w_pg.at[:PE_DIM, :LATENT].set(f32(params["W_pe"]).T)
    w_pg = w_pg.at[PE_DIM:, LATENT:].set(f32(params["W_go"]).T)

    # Block-diagonal fused head output: rows 0:32 (dt hidden) -> cols 0:2,
    # rows 32:64 (dg hidden) -> cols 2:4.
    w_out = jnp.zeros((2 * HIDDEN[-1], 4), jnp.float32)
    w_out = w_out.at[:HIDDEN[-1], 0:2].set(f32(params["W_odt"]).T)
    w_out = w_out.at[HIDDEN[-1]:, 2:4].set(f32(params["W_odg"]).T)

    return {
        "w_pg": w_pg,
        "b_pg": jnp.concatenate([row(params["b_pe"]), row(params["b_go"])], 1),
        "w_prot": f32(params["W_prot"]).T, "b_prot": row(params["b_prot"]),
        "w_fls_pg": wfls_t,                              # [128, 64] (pe|go rows)
        "w_g0": f32(params["Wg0"]).T, "b_g0": row(params["bg0"]),
        "w_fls_h1": wfls_t[:HIDDEN[0]],                  # [32, 64]
        "w_g1": f32(params["Wg1"]).T, "b_g1": row(params["bg1"]),
        "w_fls_h2": wfls_t[HIDDEN[0]:LATENT],            # [32, 64]
        "b_fls": row(params["b_fls"]),
        "w_head": jnp.concatenate(
            [f32(params["W_dt"]).T, f32(params["W_dg"]).T], axis=1),  # [64,64]
        "b_head": jnp.concatenate(
            [row(params["b_dt"]), row(params["b_dg"])], axis=1),      # [1,64]
        "w_out": w_out,                                               # [64,4]
        "b_out": jnp.concatenate(
            [row(params["b_odt"]), row(params["b_odg"])], axis=1),    # [1,4]
    }


# --------------------------------------------------------------------------
# GCNConv(improved=True) normalization: dense A_hat = D^-1/2 (A + 2I) D^-1/2
# (standard XLA ops; run ONCE at graph-prep time, not per inference)
# --------------------------------------------------------------------------
def gcn_dense_adj(edge_index, edge_weight, num_nodes, improved=True):
    src, dst = edge_index[0], edge_index[1]
    fill = 2.0 if improved else 1.0
    deg = jnp.zeros((num_nodes,), jnp.float32).at[dst].add(edge_weight) + fill
    dinv = jnp.where(deg > 0.0, jax.lax.rsqrt(deg), 0.0)
    norm = dinv[src] * edge_weight * dinv[dst]
    adj = jnp.zeros((num_nodes, num_nodes), jnp.float32).at[dst, src].add(norm)
    adj = adj + jnp.diag(fill * dinv * dinv)              # normalized self loops
    return adj


def _round_up(x, m):
    return (x + m - 1) // m * m


def _choose_block(n):
    if n >= 512:
        return 512
    if n >= 256:
        return 256
    return 128


def prepare_graph(features, edge_index, edge_weight):
    """One-time graph prep: build + normalize A_hat, cast to bf16, pad node
    dimension to a multiple of the tile size.  Hoisted out of the per-call
    path since edge_index / edge_weight / features are fixed in eval mode."""
    n = int(features.shape[0])
    blk = _choose_block(n)
    n_pad = _round_up(n, blk)
    a_hat = gcn_dense_adj(edge_index, edge_weight, n, improved=True)
    a_hat = jnp.pad(a_hat, ((0, n_pad - n), (0, n_pad - n))).astype(jnp.bfloat16)
    feat = jnp.pad(features.astype(jnp.float32), ((0, n_pad - n), (0, 0)))
    return feat, a_hat, blk


# --------------------------------------------------------------------------
# Forward pass (inference mode) — three pipelined pallas_calls
# --------------------------------------------------------------------------
@functools.partial(jax.jit, static_argnames=("num_nodes", "blk"))
def mpnn_forward(kparams, feat_p, a_hat_p, *, num_nodes, blk):
    n_pad = feat_p.shape[0]
    nb = n_pad // blk

    cp_rows = pltpu.CompilerParams(
        dimension_semantics=("parallel",), vmem_limit_bytes=VMEM_LIMIT)
    cp_prop = pltpu.CompilerParams(
        dimension_semantics=("parallel", "arbitrary"),
        vmem_limit_bytes=VMEM_LIMIT)

    # ---- Kernel 1: node encoders --------------------------------------
    xc, z0 = pl.pallas_call(
        _encode_kernel,
        grid=(nb,),
        in_specs=[
            pl.BlockSpec((blk, FEAT_DIM), lambda i: (i, 0)),
            pl.BlockSpec((PE_DIM + GO_DIM, 2 * LATENT), lambda i: (0, 0)),
            pl.BlockSpec((1, 2 * LATENT), lambda i: (0, 0)),
            pl.BlockSpec((PROT_DIM, LATENT), lambda i: (0, 0)),
            pl.BlockSpec((1, LATENT), lambda i: (0, 0)),
            pl.BlockSpec((2 * LATENT, LATENT), lambda i: (0, 0)),
            pl.BlockSpec((LATENT, HIDDEN[0]), lambda i: (0, 0)),
        ],
        out_specs=[
            pl.BlockSpec((blk, LATENT), lambda i: (i, 0)),
            pl.BlockSpec((blk, HIDDEN[0]), lambda i: (i, 0)),
        ],
        out_shape=[
            jax.ShapeDtypeStruct((n_pad, LATENT), jnp.float32),
            jax.ShapeDtypeStruct((n_pad, HIDDEN[0]), jnp.bfloat16),
        ],
        compiler_params=cp_rows,
    )(feat_p, kparams["w_pg"], kparams["b_pg"], kparams["w_prot"],
      kparams["b_prot"], kparams["w_fls_pg"], kparams["w_g0"])

    # ---- Kernel 2: GCNConv layer 1 (A_hat streamed in bf16 tiles) ------
    xc2, z1 = pl.pallas_call(
        _prop1_kernel,
        grid=(nb, nb),
        in_specs=[
            pl.BlockSpec((blk, blk), lambda i, k: (i, k)),          # A_hat
            pl.BlockSpec((blk, HIDDEN[0]), lambda i, k: (k, 0)),    # Z0
            pl.BlockSpec((blk, LATENT), lambda i, k: (i, 0)),       # xc
            pl.BlockSpec((1, HIDDEN[0]), lambda i, k: (0, 0)),      # b_g0
            pl.BlockSpec((HIDDEN[0], LATENT), lambda i, k: (0, 0)),  # w_fls_h1
            pl.BlockSpec((HIDDEN[0], HIDDEN[1]), lambda i, k: (0, 0)),  # w_g1
        ],
        out_specs=[
            pl.BlockSpec((blk, LATENT), lambda i, k: (i, 0)),
            pl.BlockSpec((blk, HIDDEN[1]), lambda i, k: (i, 0)),
        ],
        out_shape=[
            jax.ShapeDtypeStruct((n_pad, LATENT), jnp.float32),
            jax.ShapeDtypeStruct((n_pad, HIDDEN[1]), jnp.bfloat16),
        ],
        scratch_shapes=[pltpu.VMEM((blk, HIDDEN[0]), jnp.float32)],
        compiler_params=cp_prop,
    )(a_hat_p, z0, xc, kparams["b_g0"], kparams["w_fls_h1"], kparams["w_g1"])

    # ---- Kernel 3: GCNConv layer 2 + W_fls + fused dt/dg heads ---------
    out4 = pl.pallas_call(
        _prop2_kernel,
        grid=(nb, nb),
        in_specs=[
            pl.BlockSpec((blk, blk), lambda i, k: (i, k)),          # A_hat
            pl.BlockSpec((blk, HIDDEN[1]), lambda i, k: (k, 0)),    # Z1
            pl.BlockSpec((blk, LATENT), lambda i, k: (i, 0)),       # xc2
            pl.BlockSpec((1, HIDDEN[1]), lambda i, k: (0, 0)),      # b_g1
            pl.BlockSpec((HIDDEN[1], LATENT), lambda i, k: (0, 0)),  # w_fls_h2
            pl.BlockSpec((1, LATENT), lambda i, k: (0, 0)),         # b_fls
            pl.BlockSpec((LATENT, 2 * HIDDEN[-1]), lambda i, k: (0, 0)),  # w_head
            pl.BlockSpec((1, 2 * HIDDEN[-1]), lambda i, k: (0, 0)),       # b_head
            pl.BlockSpec((2 * HIDDEN[-1], 4), lambda i, k: (0, 0)),       # w_out
            pl.BlockSpec((1, 4), lambda i, k: (0, 0)),                    # b_out
        ],
        out_specs=pl.BlockSpec((blk, 4), lambda i, k: (i, 0)),
        out_shape=jax.ShapeDtypeStruct((n_pad, 4), jnp.float32),
        scratch_shapes=[pltpu.VMEM((blk, HIDDEN[1]), jnp.float32)],
        compiler_params=cp_prop,
    )(a_hat_p, z1, xc2, kparams["b_g1"], kparams["w_fls_h2"], kparams["b_fls"],
      kparams["w_head"], kparams["b_head"], kparams["w_out"], kparams["b_out"])

    # TODO(synk): for very sparse graphs (|E| << N^2) replace the dense A_hat
    # propagation kernels with a CSR gather/segment-sum kernel using
    # PrefetchScalarGridSpec row offsets in SMEM.
    x_dt = out4[:num_nodes, 0:2]
    x_dg = out4[:num_nodes, 2:4]
    return x_dg, x_dt


# --------------------------------------------------------------------------
# Pure-JAX f32 reference (mirrors the PyTorch forward, untransformed params)
# --------------------------------------------------------------------------
@jax.jit
def reference_forward(params, features, edge_index, edge_weight):
    act = _leaky
    lin = lambda x, w, b: x @ w.T + b
    x_pe = act(lin(features[:, :PE_DIM], params["W_pe"], params["b_pe"]))
    x_go = act(lin(features[:, PE_DIM:PE_DIM + GO_DIM],
                   params["W_go"], params["b_go"]))
    x_prot = act(lin(features[:, PE_DIM + GO_DIM:FEAT_DIM],
                     params["W_prot"], params["b_prot"]))
    a_hat = gcn_dense_adj(edge_index, edge_weight, features.shape[0], True)
    xs, h = [], x_prot
    for i in range(NUM_CONV):
        h = act(a_hat @ (h @ params[f"Wg{i}"].T) + params[f"bg{i}"])
        xs.append(h)
    x = jnp.concatenate([x_pe + jnp.concatenate(xs, axis=1), x_go], axis=1)
    x = act(lin(x, params["W_fls"], params["b_fls"]))
    x_dt = lin(act(lin(x, params["W_dt"], params["b_dt"])),
               params["W_odt"], params["b_odt"])
    x_dg = lin(act(lin(x, params["W_dg"], params["b_dg"])),
               params["W_odg"], params["b_odg"])
    return x_dg, x_dt


# --------------------------------------------------------------------------
# Deterministic parameter / input construction + smoke test
# --------------------------------------------------------------------------
def lin_init(key, out_f, in_f):
    bound = 1.0 / (in_f ** 0.5)
    k1, k2 = jax.random.split(key)
    w = jax.random.uniform(k1, (out_f, in_f), jnp.float32, -bound, bound)
    b = jax.random.uniform(k2, (out_f,), jnp.float32, -bound, bound)
    return w, b


if __name__ == "__main__":
    key = jax.random.PRNGKey(0)
    keys = jax.random.split(key, 20)

    N_NODES, N_EDGES = 128, 512

    features = jax.random.normal(keys[0], (N_NODES, FEAT_DIM), jnp.float32)
    src = jax.random.randint(keys[1], (N_EDGES,), 0, N_NODES)
    off = jax.random.randint(keys[2], (N_EDGES,), 1, N_NODES)
    dst = (src + off) % N_NODES                       # no self loops
    edge_index = jnp.stack([src, dst]).astype(jnp.int32)
    edge_weight = jax.random.uniform(keys[3], (N_EDGES,), jnp.float32)

    params = {}
    params["W_pe"], params["b_pe"] = lin_init(keys[4], LATENT, PE_DIM)
    params["W_go"], params["b_go"] = lin_init(keys[5], LATENT, GO_DIM)
    params["W_prot"], params["b_prot"] = lin_init(keys[6], LATENT, PROT_DIM)
    # GCNConv: glorot-ish weight, zero bias (PyG default init)
    params["Wg0"], _ = lin_init(keys[7], HIDDEN[0], LATENT)
    params["bg0"] = jnp.zeros((HIDDEN[0],), jnp.float32)
    params["Wg1"], _ = lin_init(keys[8], HIDDEN[1], HIDDEN[0])
    params["bg1"] = jnp.zeros((HIDDEN[1],), jnp.float32)
    params["W_fls"], params["b_fls"] = lin_init(keys[9], LATENT, 2 * LATENT)
    params["W_dt"], params["b_dt"] = lin_init(keys[10], HIDDEN[-1],
                                              HIDDEN[-1] * NUM_CONV)
    params["W_dg"], params["b_dg"] = lin_init(keys[11], HIDDEN[-1],
                                              HIDDEN[-1] * NUM_CONV)
    params["W_odt"], params["b_odt"] = lin_init(keys[12], 2, HIDDEN[-1])
    params["W_odg"], params["b_odg"] = lin_init(keys[13], 2, HIDDEN[-1])

    # One-time prep (outside the inference path): repacked weights + bf16
    # padded A_hat + padded features.
    kparams = prepare_params(params)
    feat_p, a_hat_p, blk = prepare_graph(features, edge_index, edge_weight)

    x_dg, x_dt = mpnn_forward(kparams, feat_p, a_hat_p,
                              num_nodes=N_NODES, blk=blk)
    jax.block_until_ready((x_dg, x_dt))

    # Correctness vs pure-JAX f32 reference of the original (unfused) math.
    r_dg, r_dt = reference_forward(params, features, edge_index, edge_weight)
    err = max(float(jnp.max(jnp.abs(x_dg - r_dg))),
              float(jnp.max(jnp.abs(x_dt - r_dt))))
    assert err < 2e-2, f"mismatch vs reference: max abs err = {err}"

    assert x_dg.shape == (N_NODES, 2) and x_dt.shape == (N_NODES, 2)
    assert x_dg.dtype == jnp.float32 and x_dt.dtype == jnp.float32
    assert bool(jnp.all(jnp.isfinite(x_dg))) and bool(jnp.all(jnp.isfinite(x_dt)))
    print("KERNEL_OK")
</pallas_src>

<mosaic_0001>
module attributes {stable_mosaic.version = 11 : i64} {
  func.func @_encode_kernel(%arg0: i32, %arg1: memref<128x736xf32, #tpu.memory_space<vmem>>, %arg2: memref<256x128xf32, #tpu.memory_space<vmem>>, %arg3: memref<1x128xf32, #tpu.memory_space<vmem>>, %arg4: memref<480x64xf32, #tpu.memory_space<vmem>>, %arg5: memref<1x64xf32, #tpu.memory_space<vmem>>, %arg6: memref<128x64xf32, #tpu.memory_space<vmem>>, %arg7: memref<64x32xf32, #tpu.memory_space<vmem>>, %arg8: memref<128x64xf32, #tpu.memory_space<vmem>>, %arg9: memref<128x32xbf16, #tpu.memory_space<vmem>>) attributes {dimension_semantics = [#tpu.dimension_semantics<parallel>], iteration_bounds = array<i64: 1>, scalar_prefetch = 0 : i64, scratch_operands = 0 : i64, tpu.core_type = #tpu.core_type<tc>, window_params = [{transform_indices = @transform_0, window_bounds = array<i64: 128, 736>}, {pipeline_mode = #tpu.pipeline_mode<synchronous>, transform_indices = @transform_1, window_bounds = array<i64: 256, 128>}, {pipeline_mode = #tpu.pipeline_mode<synchronous>, transform_indices = @transform_2, window_bounds = array<i64: 1, 128>}, {pipeline_mode = #tpu.pipeline_mode<synchronous>, transform_indices = @transform_3, window_bounds = array<i64: 480, 64>}, {pipeline_mode = #tpu.pipeline_mode<synchronous>, transform_indices = @transform_4, window_bounds = array<i64: 1, 64>}, {pipeline_mode = #tpu.pipeline_mode<synchronous>, transform_indices = @transform_5, window_bounds = array<i64: 128, 64>}, {pipeline_mode = #tpu.pipeline_mode<synchronous>, transform_indices = @transform_6, window_bounds = array<i64: 64, 32>}, {transform_indices = @transform_7, window_bounds = array<i64: 128, 64>}, {transform_indices = @transform_8, window_bounds = array<i64: 128, 32>}]} {
    %c0 = arith.constant 0 : index
    %c0_0 = arith.constant 0 : index
    %0 = vector.load %arg1[%c0, %c0_0] : memref<128x736xf32, #tpu.memory_space<vmem>>, vector<128x256xf32>
    %c0_1 = arith.constant 0 : index
    %c0_2 = arith.constant 0 : index
    %1 = vector.load %arg2[%c0_1, %c0_2] : memref<256x128xf32, #tpu.memory_space<vmem>>, vector<256x128xf32>
    %cst = arith.constant dense<0.000000e+00> : vector<128x128xf32>
    %2 = tpu.matmul %0, %1, %cst {dimension_numbers = #tpu.dot_dimension_numbers<[1], [0], [0], [1], [0, 0, 1, 1], [], []>} : vector<128x256xf32>, vector<256x128xf32>, vector<128x128xf32> -> vector<128x128xf32>
    %c0_3 = arith.constant 0 : index
    %c0_4 = arith.constant 0 : index
    %3 = vector.load %arg3[%c0_3, %c0_4] : memref<1x128xf32, #tpu.memory_space<vmem>>, vector<1x128xf32>
    %4 = vector.broadcast %3 : vector<1x128xf32> to vector<128x128xf32>
    %5 = arith.addf %2, %4 : vector<128x128xf32>
    %cst_5 = arith.constant 0.000000e+00 : f32
    %6 = vector.broadcast %cst_5 : f32 to vector<128x128xf32>
    %7 = arith.cmpf oge, %5, %6 : vector<128x128xf32>
    %cst_6 = arith.constant 1.000000e-01 : f32
    %8 = vector.broadcast %cst_6 : f32 to vector<128x128xf32>
    %9 = arith.mulf %8, %5 : vector<128x128xf32>
    %10 = arith.select %7, %5, %9 : vector<128x128xi1>, vector<128x128xf32>
    %c0_7 = arith.constant 0 : index
    %c0_8 = arith.constant 0 : index
    %11 = vector.load %arg6[%c0_7, %c0_8] : memref<128x64xf32, #tpu.memory_space<vmem>>, vector<128x64xf32>
    %cst_9 = arith.constant dense<0.000000e+00> : vector<128x64xf32>
    %12 = tpu.matmul %10, %11, %cst_9 {dimension_numbers = #tpu.dot_dimension_numbers<[1], [0], [0], [1], [0, 0, 1, 1], [], []>} : vector<128x128xf32>, vector<128x64xf32>, vector<128x64xf32> -> vector<128x64xf32>
    %c0_10 = arith.constant 0 : index
    %c0_11 = arith.constant 0 : index
    %13 = vector.load %arg8[%c0_10, %c0_11] : memref<128x64xf32, #tpu.memory_space<vmem>>, vector<128x64xf32>
    tpu.vector_store %arg8[%c0_10, %c0_11], %12 {strides = array<i32>} : memref<128x64xf32, #tpu.memory_space<vmem>>, vector<128x64xf32>,
    %c0_12 = arith.constant 0 : index
    %c256 = arith.constant 256 : index
    %14 = vector.load %arg1[%c0_12, %c256] : memref<128x736xf32, #tpu.memory_space<vmem>>, vector<128x480xf32>
    %c0_13 = arith.constant 0 : index
    %c0_14 = arith.constant 0 : index
    %15 = vector.load %arg4[%c0_13, %c0_14] : memref<480x64xf32, #tpu.memory_space<vmem>>, vector<480x64xf32>
    %cst_15 = arith.constant dense<0.000000e+00> : vector<128x64xf32>
    %16 = tpu.matmul %14, %15, %cst_15 {dimension_numbers = #tpu.dot_dimension_numbers<[1], [0], [0], [1], [0, 0, 1, 1], [], []>} : vector<128x480xf32>, vector<480x64xf32>, vector<128x64xf32> -> vector<128x64xf32>
    %c0_16 = arith.constant 0 : index
    %c0_17 = arith.constant 0 : index
    %17 = vector.load %arg5[%c0_16, %c0_17] : memref<1x64xf32, #tpu.memory_space<vmem>>, vector<1x64xf32>
    %18 = vector.broadcast %17 : vector<1x64xf32> to vector<128x64xf32>
    %19 = arith.addf %16, %18 : vector<128x64xf32>
    %cst_18 = arith.constant 0.000000e+00 : f32
    %20 = vector.broadcast %cst_18 : f32 to vector<128x64xf32>
    %21 = arith.cmpf oge, %19, %20 : vector<128x64xf32>
    %cst_19 = arith.constant 1.000000e-01 : f32
    %22 = vector.broadcast %cst_19 : f32 to vector<128x64xf32>
    %23 = arith.mulf %22, %19 : vector<128x64xf32>
    %24 = arith.select %21, %19, %23 : vector<128x64xi1>, vector<128x64xf32>
    %c0_20 = arith.constant 0 : index
    %c0_21 = arith.constant 0 : index
    %25 = vector.load %arg7[%c0_20, %c0_21] : memref<64x32xf32, #tpu.memory_space<vmem>>, vector<64x32xf32>
    %cst_22 = arith.constant dense<0.000000e+00> : vector<128x32xf32>
    %26 = tpu.matmul %24, %25, %cst_22 {dimension_numbers = #tpu.dot_dimension_numbers<[1], [0], [0], [1], [0, 0, 1, 1], [], []>} : vector<128x64xf32>, vector<64x32xf32>, vector<128x32xf32> -> vector<128x32xf32>
    %27 = arith.truncf %26 : vector<128x32xf32> to vector<128x32xbf16>
    %c0_23 = arith.constant 0 : index
    %c0_24 = arith.constant 0 : index
    %28 = vector.load %arg9[%c0_23, %c0_24] : memref<128x32xbf16, #tpu.memory_space<vmem>>, vector<128x32xbf16>
    tpu.vector_store %arg9[%c0_23, %c0_24], %27 {strides = array<i32>} : memref<128x32xbf16, #tpu.memory_space<vmem>>, vector<128x32xbf16>,
    return
  }
  func.func @transform_0(%arg0: i32) -> (i32, i32) {
    %c0_i32 = arith.constant 0 : i32
    %c0_i32_0 = arith.constant 0 : i32
    return %arg0, %c0_i32 : i32, i32
  }
  func.func @transform_1(%arg0: i32) -> (i32, i32) {
    %c0_i32 = arith.constant 0 : i32
    %c0_i32_0 = arith.constant 0 : i32
    %c0_i32_1 = arith.constant 0 : i32
    return %c0_i32, %c0_i32_0 : i32, i32
  }
  func.func @transform_2(%arg0: i32) -> (i32, i32) {
    %c0_i32 = arith.constant 0 : i32
    %c0_i32_0 = arith.constant 0 : i32
    %c0_i32_1 = arith.constant 0 : i32
    return %c0_i32, %c0_i32_0 : i32, i32
  }
  func.func @transform_3(%arg0: i32) -> (i32, i32) {
    %c0_i32 = arith.constant 0 : i32
    %c0_i32_0 = arith.constant 0 : i32
    %c0_i32_1 = arith.constant 0 : i32
    return %c0_i32, %c0_i32_0 : i32, i32
  }
  func.func @transform_4(%arg0: i32) -> (i32, i32) {
    %c0_i32 = arith.constant 0 : i32
    %c0_i32_0 = arith.constant 0 : i32
    %c0_i32_1 = arith.constant 0 : i32
    return %c0_i32, %c0_i32_0 : i32, i32
  }
  func.func @transform_5(%arg0: i32) -> (i32, i32) {
    %c0_i32 = arith.constant 0 : i32
    %c0_i32_0 = arith.constant 0 : i32
    %c0_i32_1 = arith.constant 0 : i32
    return %c0_i32, %c0_i32_0 : i32, i32
  }
  func.func @transform_6(%arg0: i32) -> (i32, i32) {
    %c0_i32 = arith.constant 0 : i32
    %c0_i32_0 = arith.constant 0 : i32
    %c0_i32_1 = arith.constant 0 : i32
    return %c0_i32, %c0_i32_0 : i32, i32
  }
  func.func @transform_7(%arg0: i32) -> (i32, i32) {
    %c0_i32 = arith.constant 0 : i32
    %c0_i32_0 = arith.constant 0 : i32
    return %arg0, %c0_i32 : i32, i32
  }
  func.func @transform_8(%arg0: i32) -> (i32, i32) {
    %c0_i32 = arith.constant 0 : i32
    %c0_i32_0 = arith.constant 0 : i32
    return %arg0, %c0_i32 : i32, i32
  }
}

module attributes {stable_mosaic.version = 11 : i64} {
  func.func @_prop1_kernel(%arg0: i32, %arg1: i32, %arg2: memref<128x128xbf16, #tpu.memory_space<vmem>>, %arg3: memref<128x32xbf16, #tpu.memory_space<vmem>>, %arg4: memref<128x64xf32, #tpu.memory_space<vmem>>, %arg5: memref<1x32xf32, #tpu.memory_space<vmem>>, %arg6: memref<32x64xf32, #tpu.memory_space<vmem>>, %arg7: memref<32x32xf32, #tpu.memory_space<vmem>>, %arg8: memref<128x64xf32, #tpu.memory_space<vmem>>, %arg9: memref<128x32xbf16, #tpu.memory_space<vmem>>, %arg10: memref<128x32xf32, #tpu.memory_space<vmem>>) attributes {dimension_semantics = [#tpu.dimension_semantics<parallel>, #tpu.dimension_semantics<arbitrary>], iteration_bounds = array<i64: 1, 1>, scalar_prefetch = 0 : i64, scratch_operands = 1 : i64, tpu.core_type = #tpu.core_type<tc>, window_params = [{transform_indices = @transform_0, window_bounds = array<i64: 128, 128>}, {transform_indices = @transform_1, window_bounds = array<i64: 128, 32>}, {transform_indices = @transform_2, window_bounds = array<i64: 128, 64>}, {pipeline_mode = #tpu.pipeline_mode<synchronous>, transform_indices = @transform_3, window_bounds = array<i64: 1, 32>}, {pipeline_mode = #tpu.pipeline_mode<synchronous>, transform_indices = @transform_4, window_bounds = array<i64: 32, 64>}, {pipeline_mode = #tpu.pipeline_mode<synchronous>, transform_indices = @transform_5, window_bounds = array<i64: 32, 32>}, {transform_indices = @transform_6, window_bounds = array<i64: 128, 64>}, {transform_indices = @transform_7, window_bounds = array<i64: 128, 32>}]} {
    %c0_i32 = arith.constant 0 : i32
    %0 = arith.cmpi eq, %arg1, %c0_i32 : i32
    %1 = arith.extui %0 : i1 to i32
    %c0_i32_0 = arith.constant 0 : i32
    %2 = arith.cmpi ne, %1, %c0_i32_0 : i32
    scf.if %2 {
      %cst_10 = arith.constant 0.000000e+00 : f32
      %12 = vector.broadcast %cst_10 : f32 to vector<128x32xf32>
      %c0_11 = arith.constant 0 : index
      %c0_12 = arith.constant 0 : index
      %13 = vector.load %arg10[%c0_11, %c0_12] : memref<128x32xf32, #tpu.memory_space<vmem>>, vector<128x32xf32>
      tpu.vector_store %arg10[%c0_11, %c0_12], %12 {strides = array<i32>} : memref<128x32xf32, #tpu.memory_space<vmem>>, vector<128x32xf32>,
    } else {
    }
    %c0 = arith.constant 0 : index
    %c0_1 = arith.constant 0 : index
    %3 = vector.load %arg10[%c0, %c0_1] : memref<128x32xf32, #tpu.memory_space<vmem>>, vector<128x32xf32>
    %c0_2 = arith.constant 0 : index
    %c0_3 = arith.constant 0 : index
    %4 = vector.load %arg2[%c0_2, %c0_3] : memref<128x128xbf16, #tpu.memory_space<vmem>>, vector<128x128xbf16>
    %c0_4 = arith.constant 0 : index
    %c0_5 = arith.constant 0 : index
    %5 = vector.load %arg3[%c0_4, %c0_5] : memref<128x32xbf16, #tpu.memory_space<vmem>>, vector<128x32xbf16>
    %cst = arith.constant dense<0.000000e+00> : vector<128x32xf32>
    %6 = tpu.matmul %4, %5, %cst {dimension_numbers = #tpu.dot_dimension_numbers<[1], [0], [0], [1], [0, 0, 1, 1], [], []>} : vector<128x128xbf16>, vector<128x32xbf16>, vector<128x32xf32> -> vector<128x32xf32>
    %7 = arith.addf %3, %6 : vector<128x32xf32>
    %c0_6 = arith.constant 0 : index
    %c0_7 = arith.constant 0 : index
    %8 = vector.load %arg10[%c0_6, %c0_7] : memref<128x32xf32, #tpu.memory_space<vmem>>, vector<128x32xf32>
    tpu.vector_store %arg10[%c0_6, %c0_7], %7 {strides = array<i32>} : memref<128x32xf32, #tpu.memory_space<vmem>>, vector<128x32xf32>,
    %c0_i32_8 = arith.constant 0 : i32
    %9 = arith.cmpi eq, %arg1, %c0_i32_8 : i32
    %10 = arith.extui %9 : i1 to i32
    %c0_i32_9 = arith.constant 0 : i32
    %11 = arith.cmpi ne, %10, %c0_i32_9 : i32
    scf.if %11 {
      %c0_10 = arith.constant 0 : index
      %c0_11 = arith.constant 0 : index
      %12 = vector.load %arg10[%c0_10, %c0_11] : memref<128x32xf32, #tpu.memory_space<vmem>>, vector<128x32xf32>
      %c0_12 = arith.constant 0 : index
      %c0_13 = arith.constant 0 : index
      %13 = vector.load %arg5[%c0_12, %c0_13] : memref<1x32xf32, #tpu.memory_space<vmem>>, vector<1x32xf32>
      %14 = vector.broadcast %13 : vector<1x32xf32> to vector<128x32xf32>
      %15 = arith.addf %12, %14 : vector<128x32xf32>
      %cst_14 = arith.constant 0.000000e+00 : f32
      %16 = vector.broadcast %cst_14 : f32 to vector<128x32xf32>
      %17 = arith.cmpf oge, %15, %16 : vector<128x32xf32>
      %cst_15 = arith.constant 1.000000e-01 : f32
      %18 = vector.broadcast %cst_15 : f32 to vector<128x32xf32>
      %19 = arith.mulf %18, %15 : vector<128x32xf32>
      %20 = arith.select %17, %15, %19 : vector<128x32xi1>, vector<128x32xf32>
      %c0_16 = arith.constant 0 : index
      %c0_17 = arith.constant 0 : index
      %21 = vector.load %arg4[%c0_16, %c0_17] : memref<128x64xf32, #tpu.memory_space<vmem>>, vector<128x64xf32>
      %c0_18 = arith.constant 0 : index
      %c0_19 = arith.constant 0 : index
      %22 = vector.load %arg6[%c0_18, %c0_19] : memref<32x64xf32, #tpu.memory_space<vmem>>, vector<32x64xf32>
      %cst_20 = arith.constant dense<0.000000e+00> : vector<128x64xf32>
      %23 = tpu.matmul %20, %22, %cst_20 {dimension_numbers = #tpu.dot_dimension_numbers<[1], [0], [0], [1], [0, 0, 1, 1], [], []>} : vector<128x32xf32>, vector<32x64xf32>, vector<128x64xf32> -> vector<128x64xf32>
      %24 = arith.addf %21, %23 : vector<128x64xf32>
      %c0_21 = arith.constant 0 : index
      %c0_22 = arith.constant 0 : index
      %25 = vector.load %arg8[%c0_21, %c0_22] : memref<128x64xf32, #tpu.memory_space<vmem>>, vector<128x64xf32>
      tpu.vector_store %arg8[%c0_21, %c0_22], %24 {strides = array<i32>} : memref<128x64xf32, #tpu.memory_space<vmem>>, vector<128x64xf32>,
      %c0_23 = arith.constant 0 : index
      %c0_24 = arith.constant 0 : index
      %26 = vector.load %arg7[%c0_23, %c0_24] : memref<32x32xf32, #tpu.memory_space<vmem>>, vector<32x32xf32>
      %cst_25 = arith.constant dense<0.000000e+00> : vector<128x32xf32>
      %27 = tpu.matmul %20, %26, %cst_25 {dimension_numbers = #tpu.dot_dimension_numbers<[1], [0], [0], [1], [0, 0, 1, 1], [], []>} : vector<128x32xf32>, vector<32x32xf32>, vector<128x32xf32> -> vector<128x32xf32>
      %28 = arith.truncf %27 : vector<128x32xf32> to vector<128x32xbf16>
      %c0_26 = arith.constant 0 : index
      %c0_27 = arith.constant 0 : index
      %29 = vector.load %arg9[%c0_26, %c0_27] : memref<128x32xbf16, #tpu.memory_space<vmem>>, vector<128x32xbf16>
      tpu.vector_store %arg9[%c0_26, %c0_27], %28 {strides = array<i32>} : memref<128x32xbf16, #tpu.memory_space<vmem>>, vector<128x32xbf16>,
    } else {
    }
    return
  }
  func.func @transform_0(%arg0: i32, %arg1: i32) -> (i32, i32) {
    %c0_i32 = arith.constant 0 : i32
    return %arg0, %arg1 : i32, i32
  }
  func.func @transform_1(%arg0: i32, %arg1: i32) -> (i32, i32) {
    %c0_i32 = arith.constant 0 : i32
    %c0_i32_0 = arith.constant 0 : i32
    return %arg1, %c0_i32 : i32, i32
  }
  func.func @transform_2(%arg0: i32, %arg1: i32) -> (i32, i32) {
    %c0_i32 = arith.constant 0 : i32
    %c0_i32_0 = arith.constant 0 : i32
    return %arg0, %c0_i32 : i32, i32
  }
  func.func @transform_3(%arg0: i32, %arg1: i32) -> (i32, i32) {
    %c0_i32 = arith.constant 0 : i32
    %c0_i32_0 = arith.constant 0 : i32
    %c0_i32_1 = arith.constant 0 : i32
    return %c0_i32, %c0_i32_0 : i32, i32
  }
  func.func @transform_4(%arg0: i32, %arg1: i32) -> (i32, i32) {
    %c0_i32 = arith.constant 0 : i32
    %c0_i32_0 = arith.constant 0 : i32
    %c0_i32_1 = arith.constant 0 : i32
    return %c0_i32, %c0_i32_0 : i32, i32
  }
  func.func @transform_5(%arg0: i32, %arg1: i32) -> (i32, i32) {
    %c0_i32 = arith.constant 0 : i32
    %c0_i32_0 = arith.constant 0 : i32
    %c0_i32_1 = arith.constant 0 : i32
    return %c0_i32, %c0_i32_0 : i32, i32
  }
  func.func @transform_6(%arg0: i32, %arg1: i32) -> (i32, i32) {
    %c0_i32 = arith.constant 0 : i32
    %c0_i32_0 = arith.constant 0 : i32
    return %arg0, %c0_i32 : i32, i32
  }
  func.func @transform_7(%arg0: i32, %arg1: i32) -> (i32, i32) {
    %c0_i32 = arith.constant 0 : i32
    %c0_i32_0 = arith.constant 0 : i32
    return %arg0, %c0_i32 : i32, i32
  }
}

module attributes {stable_mosaic.version = 11 : i64} {
  func.func @_prop2_kernel(%arg0: i32, %arg1: i32, %arg2: memref<128x128xbf16, #tpu.memory_space<vmem>>, %arg3: memref<128x32xbf16, #tpu.memory_space<vmem>>, %arg4: memref<128x64xf32, #tpu.memory_space<vmem>>, %arg5: memref<1x32xf32, #tpu.memory_space<vmem>>, %arg6: memref<32x64xf32, #tpu.memory_space<vmem>>, %arg7: memref<1x64xf32, #tpu.memory_space<vmem>>, %arg8: memref<64x64xf32, #tpu.memory_space<vmem>>, %arg9: memref<1x64xf32, #tpu.memory_space<vmem>>, %arg10: memref<64x4xf32, #tpu.memory_space<vmem>>, %arg11: memref<1x4xf32, #tpu.memory_space<vmem>>, %arg12: memref<128x4xf32, #tpu.memory_space<vmem>>, %arg13: memref<128x32xf32, #tpu.memory_space<vmem>>) attributes {dimension_semantics = [#tpu.dimension_semantics<parallel>, #tpu.dimension_semantics<arbitrary>], iteration_bounds = array<i64: 1, 1>, scalar_prefetch = 0 : i64, scratch_operands = 1 : i64, tpu.core_type = #tpu.core_type<tc>, window_params = [{transform_indices = @transform_0, window_bounds = array<i64: 128, 128>}, {transform_indices = @transform_1, window_bounds = array<i64: 128, 32>}, {transform_indices = @transform_2, window_bounds = array<i64: 128, 64>}, {pipeline_mode = #tpu.pipeline_mode<synchronous>, transform_indices = @transform_3, window_bounds = array<i64: 1, 32>}, {pipeline_mode = #tpu.pipeline_mode<synchronous>, transform_indices = @transform_4, window_bounds = array<i64: 32, 64>}, {pipeline_mode = #tpu.pipeline_mode<synchronous>, transform_indices = @transform_5, window_bounds = array<i64: 1, 64>}, {pipeline_mode = #tpu.pipeline_mode<synchronous>, transform_indices = @transform_6, window_bounds = array<i64: 64, 64>}, {pipeline_mode = #tpu.pipeline_mode<synchronous>, transform_indices = @transform_7, window_bounds = array<i64: 1, 64>}, {pipeline_mode = #tpu.pipeline_mode<synchronous>, transform_indices = @transform_8, window_bounds = array<i64: 64, 4>}, {pipeline_mode = #tpu.pipeline_mode<synchronous>, transform_indices = @transform_9, window_bounds = array<i64: 1, 4>}, {transform_indices = @transform_10, window_bounds = array<i64: 128, 4>}]} {
    %c0_i32 = arith.constant 0 : i32
    %0 = arith.cmpi eq, %arg1, %c0_i32 : i32
    %1 = arith.extui %0 : i1 to i32
    %c0_i32_0 = arith.constant 0 : i32
    %2 = arith.cmpi ne, %1, %c0_i32_0 : i32
    scf.if %2 {
      %cst_10 = arith.constant 0.000000e+00 : f32
      %12 = vector.broadcast %cst_10 : f32 to vector<128x32xf32>
      %c0_11 = arith.constant 0 : index
      %c0_12 = arith.constant 0 : index
      %13 = vector.load %arg13[%c0_11, %c0_12] : memref<128x32xf32, #tpu.memory_space<vmem>>, vector<128x32xf32>
      tpu.vector_store %arg13[%c0_11, %c0_12], %12 {strides = array<i32>} : memref<128x32xf32, #tpu.memory_space<vmem>>, vector<128x32xf32>,
    } else {
    }
    %c0 = arith.constant 0 : index
    %c0_1 = arith.constant 0 : index
    %3 = vector.load %arg13[%c0, %c0_1] : memref<128x32xf32, #tpu.memory_space<vmem>>, vector<128x32xf32>
    %c0_2 = arith.constant 0 : index
    %c0_3 = arith.constant 0 : index
    %4 = vector.load %arg2[%c0_2, %c0_3] : memref<128x128xbf16, #tpu.memory_space<vmem>>, vector<128x128xbf16>
    %c0_4 = arith.constant 0 : index
    %c0_5 = arith.constant 0 : index
    %5 = vector.load %arg3[%c0_4, %c0_5] : memref<128x32xbf16, #tpu.memory_space<vmem>>, vector<128x32xbf16>
    %cst = arith.constant dense<0.000000e+00> : vector<128x32xf32>
    %6 = tpu.matmul %4, %5, %cst {dimension_numbers = #tpu.dot_dimension_numbers<[1], [0], [0], [1], [0, 0, 1, 1], [], []>} : vector<128x128xbf16>, vector<128x32xbf16>, vector<128x32xf32> -> vector<128x32xf32>
    %7 = arith.addf %3, %6 : vector<128x32xf32>
    %c0_6 = arith.constant 0 : index
    %c0_7 = arith.constant 0 : index
    %8 = vector.load %arg13[%c0_6, %c0_7] : memref<128x32xf32, #tpu.memory_space<vmem>>, vector<128x32xf32>
    tpu.vector_store %arg13[%c0_6, %c0_7], %7 {strides = array<i32>} : memref<128x32xf32, #tpu.memory_space<vmem>>, vector<128x32xf32>,
    %c0_i32_8 = arith.constant 0 : i32
    %9 = arith.cmpi eq, %arg1, %c0_i32_8 : i32
    %10 = arith.extui %9 : i1 to i32
    %c0_i32_9 = arith.constant 0 : i32
    %11 = arith.cmpi ne, %10, %c0_i32_9 : i32
    scf.if %11 {
      %c0_10 = arith.constant 0 : index
      %c0_11 = arith.constant 0 : index
      %12 = vector.load %arg13[%c0_10, %c0_11] : memref<128x32xf32, #tpu.memory_space<vmem>>, vector<128x32xf32>
      %c0_12 = arith.constant 0 : index
      %c0_13 = arith.constant 0 : index
      %13 = vector.load %arg5[%c0_12, %c0_13] : memref<1x32xf32, #tpu.memory_space<vmem>>, vector<1x32xf32>
      %14 = vector.broadcast %13 : vector<1x32xf32> to vector<128x32xf32>
      %15 = arith.addf %12, %14 : vector<128x32xf32>
      %cst_14 = arith.constant 0.000000e+00 : f32
      %16 = vector.broadcast %cst_14 : f32 to vector<128x32xf32>
      %17 = arith.cmpf oge, %15, %16 : vector<128x32xf32>
      %cst_15 = arith.constant 1.000000e-01 : f32
      %18 = vector.broadcast %cst_15 : f32 to vector<128x32xf32>
      %19 = arith.mulf %18, %15 : vector<128x32xf32>
      %20 = arith.select %17, %15, %19 : vector<128x32xi1>, vector<128x32xf32>
      %c0_16 = arith.constant 0 : index
      %c0_17 = arith.constant 0 : index
      %21 = vector.load %arg4[%c0_16, %c0_17] : memref<128x64xf32, #tpu.memory_space<vmem>>, vector<128x64xf32>
      %c0_18 = arith.constant 0 : index
      %c0_19 = arith.constant 0 : index
      %22 = vector.load %arg6[%c0_18, %c0_19] : memref<32x64xf32, #tpu.memory_space<vmem>>, vector<32x64xf32>
      %cst_20 = arith.constant dense<0.000000e+00> : vector<128x64xf32>
      %23 = tpu.matmul %20, %22, %cst_20 {dimension_numbers = #tpu.dot_dimension_numbers<[1], [0], [0], [1], [0, 0, 1, 1], [], []>} : vector<128x32xf32>, vector<32x64xf32>, vector<128x64xf32> -> vector<128x64xf32>
      %24 = arith.addf %21, %23 : vector<128x64xf32>
      %c0_21 = arith.constant 0 : index
      %c0_22 = arith.constant 0 : index
      %25 = vector.load %arg7[%c0_21, %c0_22] : memref<1x64xf32, #tpu.memory_space<vmem>>, vector<1x64xf32>
      %26 = vector.broadcast %25 : vector<1x64xf32> to vector<128x64xf32>
      %27 = arith.addf %24, %26 : vector<128x64xf32>
      %cst_23 = arith.constant 0.000000e+00 : f32
      %28 = vector.broadcast %cst_23 : f32 to vector<128x64xf32>
      %29 = arith.cmpf oge, %27, %28 : vector<128x64xf32>
      %cst_24 = arith.constant 1.000000e-01 : f32
      %30 = vector.broadcast %cst_24 : f32 to vector<128x64xf32>
      %31 = arith.mulf %30, %27 : vector<128x64xf32>
      %32 = arith.select %29, %27, %31 : vector<128x64xi1>, vector<128x64xf32>
      %c0_25 = arith.constant 0 : index
      %c0_26 = arith.constant 0 : index
      %33 = vector.load %arg8[%c0_25, %c0_26] : memref<64x64xf32, #tpu.memory_space<vmem>>, vector<64x64xf32>
      %cst_27 = arith.constant dense<0.000000e+00> : vector<128x64xf32>
      %34 = tpu.matmul %32, %33, %cst_27 {dimension_numbers = #tpu.dot_dimension_numbers<[1], [0], [0], [1], [0, 0, 1, 1], [], []>} : vector<128x64xf32>, vector<64x64xf32>, vector<128x64xf32> -> vector<128x64xf32>
      %c0_28 = arith.constant 0 : index
      %c0_29 = arith.constant 0 : index
      %35 = vector.load %arg9[%c0_28, %c0_29] : memref<1x64xf32, #tpu.memory_space<vmem>>, vector<1x64xf32>
      %36 = vector.broadcast %35 : vector<1x64xf32> to vector<128x64xf32>
      %37 = arith.addf %34, %36 : vector<128x64xf32>
      %cst_30 = arith.constant 0.000000e+00 : f32
      %38 = vector.broadcast %cst_30 : f32 to vector<128x64xf32>
      %39 = arith.cmpf oge, %37, %38 : vector<128x64xf32>
      %cst_31 = arith.constant 1.000000e-01 : f32
      %40 = vector.broadcast %cst_31 : f32 to vector<128x64xf32>
      %41 = arith.mulf %40, %37 : vector<128x64xf32>
      %42 = arith.select %39, %37, %41 : vector<128x64xi1>, vector<128x64xf32>
      %c0_32 = arith.constant 0 : index
      %c0_33 = arith.constant 0 : index
      %43 = vector.load %arg10[%c0_32, %c0_33] : memref<64x4xf32, #tpu.memory_space<vmem>>, vector<64x4xf32>
      %cst_34 = arith.constant dense<0.000000e+00> : vector<128x4xf32>
      %44 = tpu.matmul %42, %43, %cst_34 {dimension_numbers = #tpu.dot_dimension_numbers<[1], [0], [0], [1], [0, 0, 1, 1], [], []>} : vector<128x64xf32>, vector<64x4xf32>, vector<128x4xf32> -> vector<128x4xf32>
      %c0_35 = arith.constant 0 : index
      %c0_36 = arith.constant 0 : index
      %45 = vector.load %arg11[%c0_35, %c0_36] : memref<1x4xf32, #tpu.memory_space<vmem>>, vector<1x4xf32>
      %46 = vector.broadcast %45 : vector<1x4xf32> to vector<128x4xf32>
      %47 = arith.addf %44, %46 : vector<128x4xf32>
      %c0_37 = arith.constant 0 : index
      %c0_38 = arith.constant 0 : index
      %48 = vector.load %arg12[%c0_37, %c0_38] : memref<128x4xf32, #tpu.memory_space<vmem>>, vector<128x4xf32>
      tpu.vector_store %arg12[%c0_37, %c0_38], %47 {strides = array<i32>} : memref<128x4xf32, #tpu.memory_space<vmem>>, vector<128x4xf32>,
    } else {
    }
    return
  }
  func.func @transform_0(%arg0: i32, %arg1: i32) -> (i32, i32) {
    %c0_i32 = arith.constant 0 : i32
    return %arg0, %arg1 : i32, i32
  }
  func.func @transform_1(%arg0: i32, %arg1: i32) -> (i32, i32) {
    %c0_i32 = arith.constant 0 : i32
    %c0_i32_0 = arith.constant 0 : i32
    return %arg1, %c0_i32 : i32, i32
  }
  func.func @transform_2(%arg0: i32, %arg1: i32) -> (i32, i32) {
    %c0_i32 = arith.constant 0 : i32
    %c0_i32_0 = arith.constant 0 : i32
    return %arg0, %c0_i32 : i32, i32
  }
  func.func @transform_3(%arg0: i32, %arg1: i32) -> (i32, i32) {
    %c0_i32 = arith.constant 0 : i32
    %c0_i32_0 = arith.constant 0 : i32
    %c0_i32_1 = arith.constant 0 : i32
    return %c0_i32, %c0_i32_0 : i32, i32
  }
  func.func @transform_4(%arg0: i32, %arg1: i32) -> (i32, i32) {
    %c0_i32 = arith.constant 0 : i32
    %c0_i32_0 = arith.constant 0 : i32
    %c0_i32_1 = arith.constant 0 : i32
    return %c0_i32, %c0_i32_0 : i32, i32
  }
  func.func @transform_5(%arg0: i32, %arg1: i32) -> (i32, i32) {
    %c0_i32 = arith.constant 0 : i32
    %c0_i32_0 = arith.constant 0 : i32
    %c0_i32_1 = arith.constant 0 : i32
    return %c0_i32, %c0_i32_0 : i32, i32
  }
  func.func @transform_6(%arg0: i32, %arg1: i32) -> (i32, i32) {
    %c0_i32 = arith.constant 0 : i32
    %c0_i32_0 = arith.constant 0 : i32
    %c0_i32_1 = arith.constant 0 : i32
    return %c0_i32, %c0_i32_0 : i32, i32
  }
  func.func @transform_7(%arg0: i32, %arg1: i32) -> (i32, i32) {
    %c0_i32 = arith.constant 0 : i32
    %c0_i32_0 = arith.constant 0 : i32
    %c0_i32_1 = arith.constant 0 : i32
    return %c0_i32, %c0_i32_0 : i32, i32
  }
  func.func @transform_8(%arg0: i32, %arg1: i32) -> (i32, i32) {
    %c0_i32 = arith.constant 0 : i32
    %c0_i32_0 = arith.constant 0 : i32
    %c0_i32_1 = arith.constant 0 : i32
    return %c0_i32, %c0_i32_0 : i32, i32
  }
  func.func @transform_9(%arg0: i32, %arg1: i32) -> (i32, i32) {
    %c0_i32 = arith.constant 0 : i32
    %c0_i32_0 = arith.constant 0 : i32
    %c0_i32_1 = arith.constant 0 : i32
    return %c0_i32, %c0_i32_0 : i32, i32
  }
  func.func @transform_10(%arg0: i32, %arg1: i32) -> (i32, i32) {
    %c0_i32 = arith.constant 0 : i32
    %c0_i32_0 = arith.constant 0 : i32
    return %arg0, %c0_i32 : i32, i32
  }
}

</mosaic_0001>

<bundles_post_ra>
// kernel: mpnn_forward.4
= control target key start
LH: loop header
LB: loop body
LE: loop exit
PB: predicated region body
PF: predicated region fallthrough
CT: control target
= control target key end

     0   :  { %vm30_vm0 = vcmask 261120   ;;  %v1153_v1 = vmov 0.0   ;;  %s1555_s1 = inlined_call_operand.vmem [shape: bf16[128,32], index: 1, kind: input, shape index: {}]   ;;  %s1556_s0 = inlined_call_operand.vmem [shape: bf16[128,128], index: 0, kind: input, shape index: {}]   ;;  %s1557_s4 = inlined_call_operand.vmem [shape: f32[32,64], index: 4, kind: input, shape index: {}]   ;;  %s1558_s5 = inlined_call_operand.vmem [shape: f32[32,32], index: 5, kind: input, shape index: {}]   ;;  %s1559_s3 = inlined_call_operand.vmem [shape: f32[1,32], index: 3, kind: input, shape index: {}]   ;;  %s1560_s2 = inlined_call_operand.vmem [shape: f32[128,64], index: 2, kind: input, shape index: {}]   ;;  %s1561_s6 = inlined_call_operand.vmem [shape: f32[128,64], index: 6, kind: output, shape index: {0}]   ;;  %s1562_s7 = inlined_call_operand.vmem [shape: bf16[128,32], index: 7, kind: output, shape index: {1}]  }
   0x1   :  { %v1137_v0 = vld [vmem:[%s1555_s1 + $0x38] sm:$0xff]   ;;  %33 = vst.msk [vmem:[#allocation2 + $0x10] sm:$0xff] %vm30_vm0, %v1153_v1  ;;  %31 = vst.msk [vmem:[#allocation2] sm:$0xff] %vm30_vm0, %v1153_v1  ;;  %v1138_v2 = vld [vmem:[%s1555_s1 + $0x30] sm:$0xff]  }
   0x2   :  { %32 = vst.msk [vmem:[#allocation2 + $0x8] sm:$0xff] %vm30_vm0, %v1153_v1  ;;  %34 = vst.msk [vmem:[#allocation2 + $0x18] sm:$0xff] %vm30_vm0, %v1153_v1  ;;  %1032 = vmatprep.subr.bf16.mxu0 %v1137_v0  ;;  %v1139_v3 = vld [vmem:[%s1555_s1 + $0x28] sm:$0xff]   ;;  %v1140_v4 = vld [vmem:[%s1555_s1 + $0x20] sm:$0xff]  }
   0x3   :  { %35 = vst.msk [vmem:[#allocation2 + $0x20] sm:$0xff] %vm30_vm0, %v1153_v1  ;;  %36 = vst.msk [vmem:[#allocation2 + $0x28] sm:$0xff] %vm30_vm0, %v1153_v1  ;;  %1033 = vmatpush3.bf16.msra.mxu0 %v1137_v0  ;;  %v1145_v5 = vld [vmem:[%s1556_s0] sm:$0xff]   ;;  %v1141_v6 = vld [vmem:[%s1555_s1 + $0x18] sm:$0xff]  }
   0x4   :  { %37 = vst.msk [vmem:[#allocation2 + $0x30] sm:$0xff] %vm30_vm0, %v1153_v1  ;;  %38 = vst.msk [vmem:[#allocation2 + $0x38] sm:$0xff] %vm30_vm0, %v1153_v1  ;;  %1034 = vmatprep.subr.bf16.mxu0 %v1138_v2  ;;  %1048 = vmatprep.mubr.bf16.mxu0 %v1145_v5  ;;  %v1142_v7 = vld [vmem:[%s1555_s1 + $0x10] sm:$0xff]   ;;  %v1143_v8 = vld [vmem:[%s1555_s1 + $0x8] sm:$0xff]  }
   0x5   :  { %39 = vst.msk [vmem:[#allocation2 + $0x40] sm:$0xff] %vm30_vm0, %v1153_v1  ;;  %40 = vst.msk [vmem:[#allocation2 + $0x48] sm:$0xff] %vm30_vm0, %v1153_v1  ;;  %v1144_v9 = vld [vmem:[%s1555_s1] sm:$0xff]   ;;  %v1146_v10 = vld [vmem:[%s1556_s0 + $0x8] sm:$0xff]  }
   0x6   :  { %41 = vst.msk [vmem:[#allocation2 + $0x50] sm:$0xff] %vm30_vm0, %v1153_v1  ;;  %42 = vst.msk [vmem:[#allocation2 + $0x58] sm:$0xff] %vm30_vm0, %v1153_v1  ;;  %v1147_v11 = vld [vmem:[%s1556_s0 + $0x10] sm:$0xff]   ;;  %v1148_v12 = vld [vmem:[%s1556_s0 + $0x18] sm:$0xff]  }
   0x7   :  { %43 = vst.msk [vmem:[#allocation2 + $0x60] sm:$0xff] %vm30_vm0, %v1153_v1  ;;  %44 = vst.msk [vmem:[#allocation2 + $0x68] sm:$0xff] %vm30_vm0, %v1153_v1  ;;  %1035 = vmatpush3.bf16.msra.mxu0 %v1138_v2  ;;  %v1149_v13 = vld [vmem:[%s1556_s0 + $0x20] sm:$0xff]   ;;  %v1150_v14 = vld [vmem:[%s1556_s0 + $0x28] sm:$0xff]  }
   0x8   :  { %45 = vst.msk [vmem:[#allocation2 + $0x70] sm:$0xff] %vm30_vm0, %v1153_v1  ;;  %46 = vst.msk [vmem:[#allocation2 + $0x78] sm:$0xff] %vm30_vm0, %v1153_v1  ;;  %1036 = vmatprep.subr.bf16.mxu0 %v1139_v3  ;;  %v1151_v15 = vld [vmem:[%s1556_s0 + $0x30] sm:$0xff]   ;;  %v1152_v16 = vld [vmem:[%s1556_s0 + $0x38] sm:$0xff]  }
   0x9   :  { %v430_v17 = vld [vmem:[%s1557_s4 + $0x18] sm:$0xff]  ;;  %v429_v18 = vld [vmem:[%s1557_s4 + $0x10] sm:$0xff]  ;;  %v428_v19 = vld [vmem:[%s1557_s4 + $0x8] sm:$0xff] }
   0xa   :  { %1128 = vmatprep.subr.mxu1 %v430_v17  ;;  %v427_v20 = vld [vmem:[%s1557_s4] sm:$0xff]  ;;  %v1273_v21 = vld [vmem:[%s1558_s5 + $0x18] sm:$0xff]  ;;  %v49_v22 = vld [vmem:[#allocation2 + $0x10] sm:$0xff] }
   0xb   :  { %1037 = vmatpush3.bf16.msra.mxu0 %v1139_v3  ;;  %1132 = vmatpush3.msra.mxu1 %v430_v17  ;;  %v47_v24 = vld [vmem:[#allocation2] sm:$0xff]  ;;  %v50_v27 = vld [vmem:[#allocation2 + $0x18] sm:$0xff]  ;;  %v48_v30 = vld [vmem:[#allocation2 + $0x8] sm:$0xff] }
   0xc   :  { %1038 = vmatprep.subr.bf16.mxu0 %v1140_v4  ;;  %1129 = vmatprep.subr.mxu1 %v429_v18  ;;  %v53_v33 = vld [vmem:[#allocation2 + $0x30] sm:$0xff]  ;;  %v51_v36 = vld [vmem:[#allocation2 + $0x20] sm:$0xff]  ;;  %v54_v40 = vld [vmem:[#allocation2 + $0x38] sm:$0xff] }
   0xd   :  { %1133 = vmatpush3.msra.mxu1 %v429_v18  ;;  %v1282_v37 = vld [vmem:[%s1559_s3] ss:$0 sm:$0xff]  ;;  %v52_v45 = vld [vmem:[#allocation2 + $0x28] sm:$0xff]  ;;  %v57_v51 = vld [vmem:[#allocation2 + $0x50] sm:$0xff] }
   0xe   :  { %1130 = vmatprep.subr.mxu1 %v428_v19  ;;  %v55_v57 = vld [vmem:[#allocation2 + $0x40] sm:$0xff]  ;;  %v58_v0 = vld [vmem:[#allocation2 + $0x58] sm:$0xff] }
   0xf   :  { %1039 = vmatpush3.bf16.msra.mxu0 %v1140_v4  ;;  %1134 = vmatpush3.msra.mxu1 %v428_v19 }
  0x10   :  { %1040 = vmatprep.subr.bf16.mxu0 %v1141_v6  ;;  %1131 = vmatprep.subr.mxu1 %v427_v20 }
  0x11   :  { %1135 = vmatpush3.msra.mxu1 %v427_v20 }
  0x12   :  { %1096 = vmatprep.subr.mxu1 %v1273_v21 }
  0x13   :  { %1041 = vmatpush3.bf16.msra.mxu0 %v1141_v6 }
  0x14   :  { %1042 = vmatprep.subr.bf16.mxu0 %v1142_v7 }
  0x17   :  { %1043 = vmatpush3.bf16.msra.mxu0 %v1142_v7  ;;  %v56_v7 = vld [vmem:[#allocation2 + $0x48] sm:$0xff] }
  0x18   :  { %1044 = vmatprep.subr.bf16.mxu0 %v1143_v8 }
  0x1b   :  { %1045 = vmatpush3.bf16.msra.mxu0 %v1143_v8 }
  0x1c   :  { %1046 = vmatprep.subr.bf16.mxu0 %v1144_v9 }
  0x1f   :  { %1047 = vmatpush3.bf16.msra.mxu0 %v1144_v9  ;;  %v659_v9 = vld [vmem:[%s1558_s5 + $0x10] sm:$0xff] }
  0x20   :  { %1064 = vmatprep.subr.mxu0 %v430_v17 }
  0x22   :  { %1049 = vmatmul.mubr.bf16.vlgmr.msra.gmra.mxu0 %v1146_v10 }
  0x23   :  { %1052 = vmatprep.mubr.bf16.mxu0 %v1147_v11  ;;  %1065 = vmatpush3.msra.mxu0 %v430_v17  ;;  %v658_v17 = vld [vmem:[%s1558_s5 + $0x8] sm:$0xff] }
  0x24   :  { %1066 = vmatprep.subr.mxu0 %v429_v18 }
  0x25   :  { %1067 = vmatpush3.msra.mxu0 %v429_v18 }
  0x26   :  { %1068 = vmatprep.subr.mxu0 %v428_v19 }
  0x27   :  { %1069 = vmatpush3.msra.mxu0 %v428_v19 }
  0x28   :  { %1070 = vmatprep.subr.mxu0 %v427_v20 }
  0x29   :  { %1071 = vmatpush3.msra.mxu0 %v427_v20 }
  0x2a   :  { %1053 = vmatmul.mubr.bf16.gmra.mxu0 %v1148_v12 }
  0x2b   :  { %1056 = vmatprep.mubr.bf16.mxu0 %v1149_v13 }
  0x32   :  { %1057 = vmatmul.mubr.bf16.gmra.mxu0 %v1150_v14  ;;  %v61_v14 = vld [vmem:[#allocation2 + $0x70] sm:$0xff] }
  0x33   :  { %1060 = vmatprep.mubr.bf16.mxu0 %v1151_v15 }
  0x3a   :  { %1061 = vmatmul.mubr.bf16.gmra.mxu0 %v1152_v16 }
  0xe2   :  { %v1050_v23 = vpop.f32.mrf.mxu0 }
  0xe3   :  { %v290_v25 = vadd.f32 %v1050_v23, %v49_v22  ;;  %v59_v22 = vld [vmem:[#allocation2 + $0x60] sm:$0xff] }
  0xe4   :  { %v225_v26 = vpop.f32.mrf.mxu0 }
  0xe5   :  { %307 = vst.msk [vmem:[#allocation2 + $0x10] sm:$0xff] %vm30_vm0, %v290_v25  ;;  %v288_v28 = vadd.f32 %v225_v26, %v47_v24 }
  0xe6   :  { %v1051_v29 = vpop.f32.mrf.mxu0 }
  0xe7   :  { %305 = vst.msk [vmem:[#allocation2] sm:$0xff] %vm30_vm0, %v288_v28  ;;  %v291_v31 = vadd.f32 %v1051_v29, %v50_v27  ;;  %v62_v29 = vld [vmem:[#allocation2 + $0x78] sm:$0xff] }
  0xe8   :  { %v228_v32 = vpop.f32.mrf.mxu0 }
  0xe9   :  { %308 = vst.msk [vmem:[#allocation2 + $0x18] sm:$0xff] %vm30_vm0, %v291_v31  ;;  %v289_v34 = vadd.f32 %v228_v32, %v48_v30 }
  0xea   :  { %v1054_v35 = vpop.f32.mrf.mxu0 }
  0xeb   :  { %306 = vst.msk [vmem:[#allocation2 + $0x8] sm:$0xff] %vm30_vm0, %v289_v34  ;;  %v294_v38 = vadd.f32 %v1054_v35, %v53_v33  ;;  %v60_v35 = vld [vmem:[#allocation2 + $0x68] sm:$0xff] }
  0xec   :  { %v241_v39 = vpop.f32.mrf.mxu0  ;;  %v326_v41 = vld [vmem:[#allocation2 + $0x10] sm:$0xff] }
  0xed   :  { %311 = vst.msk [vmem:[#allocation2 + $0x30] sm:$0xff] %vm30_vm0, %v294_v38  ;;  %v292_v42 = vadd.f32 %v241_v39, %v51_v36  ;;  %v349_v43 = vadd.f32 %v1282_v37, %v326_v41 }
  0xee   :  { %v1055_v44 = vpop.f32.mrf.mxu0  ;;  %v324_v46 = vld [vmem:[#allocation2] sm:$0xff] }
  0xef   :  { %309 = vst.msk [vmem:[#allocation2 + $0x20] sm:$0xff] %vm30_vm0, %v292_v42  ;;  %v295_v47 = vadd.f32 %v1055_v44, %v54_v40  ;;  %vm365_vm1 = vcmp.ge.f32.partialorder %v349_v43, 0.0  ;;  %v381_v48 = vmul.f32 0.1, %v349_v43  ;;  %v347_v49 = vadd.f32 %v1282_v37, %v324_v46 }
  0xf0   :  { %v244_v50 = vpop.f32.mrf.mxu0  ;;  %v327_v52 = vld [vmem:[#allocation2 + $0x18] sm:$0xff] }
  0xf1   :  { %312 = vst.msk [vmem:[#allocation2 + $0x38] sm:$0xff] %vm30_vm0, %v295_v47  ;;  %v293_v53 = vadd.f32 %v244_v50, %v52_v45  ;;  %v1290_v54 = vsel %vm365_vm1, %v349_v43, %v381_v48  ;;  %vm363_vm2 = vcmp.ge.f32.partialorder %v347_v49, 0.0  ;;  %v379_v55 = vmul.f32 0.1, %v347_v49 }
  0xf2   :  { %v1058_v56 = vpop.f32.mrf.mxu0  ;;  %1075 = vmatprep.mubr.msk.f32.mxu1 %vm30_vm0, %v1290_v54  ;;  %v350_v58 = vadd.f32 %v1282_v37, %v327_v52  ;;  %v325_v59 = vld [vmem:[#allocation2 + $0x8] sm:$0xff] }
  0xf3   :  { %310 = vst.msk [vmem:[#allocation2 + $0x28] sm:$0xff] %vm30_vm0, %v293_v53  ;;  %v298_v60 = vadd.f32 %v1058_v56, %v57_v51  ;;  %v1296_v61 = vsel %vm363_vm2, %v347_v49, %v379_v55  ;;  %v348_v62 = vadd.f32 %v1282_v37, %v325_v59  ;;  %vm640_vm2 = vcmask 523264  }
  0xf4   :  { %v257_v63 = vpop.f32.mrf.mxu0  ;;  %1072 = vmatprep.mubr.msk.f32.mxu0 %vm30_vm0, %v1296_v61  ;;  %vm366_vm3 = vcmp.ge.f32.partialorder %v350_v58, 0.0  ;;  %v382_v1 = vmul.f32 0.1, %v350_v58  ;;  %v330_v4 = vld [vmem:[#allocation2 + $0x30] sm:$0xff] }
  0xf5   :  { %315 = vst.msk [vmem:[#allocation2 + $0x50] sm:$0xff] %vm30_vm0, %v298_v60  ;;  %v296_v2 = vadd.f32 %v257_v63, %v55_v57  ;;  %vm364_vm4 = vcmp.ge.f32.partialorder %v348_v62, 0.0  ;;  %v380_v3 = vmul.f32 0.1, %v348_v62  ;;  %v353_v15 = vadd.f32 %v1282_v37, %v330_v4 }
  0xf6   :  { %v1059_v5 = vpop.f32.mrf.mxu0  ;;  %v1302_v6 = vsel %vm366_vm3, %v350_v58, %v382_v1  ;;  %v328_v8 = vld [vmem:[#allocation2 + $0x20] sm:$0xff] }
  0xf7   :  { %313 = vst.msk [vmem:[#allocation2 + $0x40] sm:$0xff] %vm30_vm0, %v296_v2  ;;  %v299_v10 = vadd.f32 %v1059_v5, %v58_v0  ;;  %1076 = vmatmul.mubr.msk.f32.vlgmr.msra.gmra.mxu1 %vm30_vm0, %v1302_v6  ;;  %v1310_v11 = vsel %vm364_vm4, %v348_v62, %v380_v3  ;;  %v351_v12 = vadd.f32 %v1282_v37, %v328_v8  ;;  %v385_v30 = vmul.f32 0.1, %v353_v15 }
  0xf8   :  { %v260_v13 = vpop.f32.mrf.mxu0  ;;  %1073 = vmatmul.mubr.msk.f32.vlgmr.msra.gmra.mxu0 %vm30_vm0, %v1310_v11  ;;  %1097 = vmatpush3.msra.mxu1 %v1273_v21  ;;  %v331_v16 = vld [vmem:[#allocation2 + $0x38] sm:$0xff]  ;;  %v657_v21 = vld [vmem:[%s1558_s5] sm:$0xff]  ;;  %vm369_vm7 = vcmp.ge.f32.partialorder %v353_v15, 0.0 }
  0xf9   :  { %316 = vst.msk [vmem:[#allocation2 + $0x58] sm:$0xff] %vm30_vm0, %v299_v10  ;;  %v297_v18 = vadd.f32 %v260_v13, %v56_v7  ;;  %vm367_vm5 = vcmp.ge.f32.partialorder %v351_v12, 0.0  ;;  %v383_v19 = vmul.f32 0.1, %v351_v12  ;;  %1098 = vmatprep.subr.mxu1 %v659_v9  ;;  %v354_v27 = vadd.f32 %v1282_v37, %v331_v16  ;;  %v411_v16 = vld [vmem:[%s1560_s2] sm:$0xff] }
  0xfa   :  { %v1062_v20 = vpop.f32.mrf.mxu0  ;;  %v329_v23 = vld [vmem:[#allocation2 + $0x28] sm:$0xff]  ;;  %1099 = vmatpush3.msra.mxu1 %v659_v9  ;;  %v401_v43 = vsel %vm369_vm7, %v353_v15, %v385_v30  ;;  %v417_v30 = vld [vmem:[%s1560_s2 + $0x30] sm:$0xff] }
  0xfb   :  { %314 = vst.msk [vmem:[#allocation2 + $0x48] sm:$0xff] %vm30_vm0, %v297_v18  ;;  %v302_v24 = vadd.f32 %v1062_v20, %v61_v14  ;;  %v1325_v25 = vsel %vm367_vm5, %v351_v12, %v383_v19  ;;  %v352_v26 = vadd.f32 %v1282_v37, %v329_v23  ;;  %1100 = vmatprep.subr.mxu1 %v658_v17  ;;  %v386_v40 = vmul.f32 0.1, %v354_v27  ;;  %v416_v23 = vld [vmem:[%s1560_s2 + $0x28] sm:$0xff] }
  0xfc   :  { %v273_v28 = vpop.f32.mrf.mxu0  ;;  %1078 = vmatprep.mubr.msk.f32.mxu1 %vm30_vm0, %v1325_v25  ;;  %1101 = vmatpush3.msra.mxu1 %v658_v17  ;;  %v334_v33 = vld [vmem:[#allocation2 + $0x50] sm:$0xff]  ;;  %vm370_vm8 = vcmp.ge.f32.partialorder %v354_v27, 0.0 }
  0xfd   :  { %319 = vst.msk [vmem:[#allocation2 + $0x70] sm:$0xff] %vm30_vm0, %v302_v24  ;;  %v300_v31 = vadd.f32 %v273_v28, %v59_v22  ;;  %vm368_vm6 = vcmp.ge.f32.partialorder %v352_v26, 0.0  ;;  %v384_v32 = vmul.f32 0.1, %v352_v26  ;;  %1102 = vmatprep.subr.mxu1 %v657_v21  ;;  %v357_v44 = vadd.f32 %v1282_v37, %v334_v33  ;;  %v415_v24 = vld [vmem:[%s1560_s2 + $0x20] sm:$0xff]  ;;  %v420_v33 = vld [vmem:[%s1560_s2 + $0x48] sm:$0xff] }
  0xfe   :  { %v1063_v34 = vpop.f32.mrf.mxu0  ;;  %v332_v36 = vld [vmem:[#allocation2 + $0x40] sm:$0xff]  ;;  %1103 = vmatpush3.msra.mxu1 %v657_v21  ;;  %v402_v49 = vsel %vm370_vm8, %v354_v27, %v386_v40  ;;  %v418_v27 = vld [vmem:[%s1560_s2 + $0x38] sm:$0xff] }
  0xff   :  { %317 = vst.msk [vmem:[#allocation2 + $0x60] sm:$0xff] %vm30_vm0, %v300_v31  ;;  %v303_v38 = vadd.f32 %v1063_v34, %v62_v29  ;;  %v1333_v39 = vsel %vm368_vm6, %v352_v26, %v384_v32  ;;  %v355_v41 = vadd.f32 %v1282_v37, %v332_v36  ;;  %v389_v53 = vmul.f32 0.1, %v357_v44  ;;  %v419_v36 = vld [vmem:[%s1560_s2 + $0x40] sm:$0xff]  ;;  %v422_v40 = vld [vmem:[%s1560_s2 + $0x58] sm:$0xff] }
 0x100   :  { %v276_v42 = vpop.f32.mrf.mxu0  ;;  %1079 = vmatmul.mubr.msk.f32.gmra.mxu1 %vm30_vm0, %v1333_v39  ;;  %v335_v45 = vld [vmem:[#allocation2 + $0x58] sm:$0xff]  ;;  %vm373_vm11 = vcmp.ge.f32.partialorder %v357_v44, 0.0 }
 0x101   :  { %320 = vst.msk [vmem:[#allocation2 + $0x78] sm:$0xff] %vm30_vm0, %v303_v38  ;;  %v301_v46 = vadd.f32 %v276_v42, %v60_v35  ;;  %1081 = vmatprep.mubr.msk.f32.mxu1 %vm30_vm0, %v401_v43  ;;  %vm371_vm9 = vcmp.ge.f32.partialorder %v355_v41, 0.0  ;;  %v387_v47 = vmul.f32 0.1, %v355_v41  ;;  %v358_v52 = vadd.f32 %v1282_v37, %v335_v45 }
 0x102   :  { %v333_v48 = vld [vmem:[#allocation2 + $0x48] sm:$0xff]  ;;  %v405_v62 = vsel %vm373_vm11, %v357_v44, %v389_v53 }
 0x103   :  { %318 = vst.msk [vmem:[#allocation2 + $0x68] sm:$0xff] %vm30_vm0, %v301_v46  ;;  %v403_v50 = vsel %vm371_vm9, %v355_v41, %v387_v47  ;;  %v356_v51 = vadd.f32 %v1282_v37, %v333_v48  ;;  %v390_v59 = vmul.f32 0.1, %v358_v52  ;;  %vm374_vm12 = vcmp.ge.f32.partialorder %v358_v52, 0.0  ;;  %v424_v46 = vld [vmem:[%s1560_s2 + $0x68] sm:$0xff] }
 0x104   :  { %1082 = vmatmul.mubr.msk.f32.gmra.mxu1 %vm30_vm0, %v402_v49  ;;  %v338_v56 = vld [vmem:[#allocation2 + $0x70] sm:$0xff] }
 0x105   :  { %1084 = vmatprep.mubr.msk.f32.mxu1 %vm30_vm0, %v403_v50  ;;  %vm372_vm10 = vcmp.ge.f32.partialorder %v356_v51, 0.0  ;;  %v388_v55 = vmul.f32 0.1, %v356_v51  ;;  %v361_v63 = vadd.f32 %v1282_v37, %v338_v56  ;;  %v406_v3 = vsel %vm374_vm12, %v358_v52, %v390_v59  ;;  %v426_v52 = vld [vmem:[%s1560_s2 + $0x78] sm:$0xff]  ;;  %v425_v56 = vld [vmem:[%s1560_s2 + $0x70] sm:$0xff] }
 0x106   :  { %v336_v57 = vld [vmem:[#allocation2 + $0x60] sm:$0xff] }
 0x107   :  { %v404_v58 = vsel %vm372_vm10, %v356_v51, %v388_v55  ;;  %v359_v60 = vadd.f32 %v1282_v37, %v336_v57  ;;  %v393_v8 = vmul.f32 0.1, %v361_v63  ;;  %vm377_vm15 = vcmp.ge.f32.partialorder %v361_v63, 0.0 }
 0x108   :  { %1085 = vmatmul.mubr.msk.f32.gmra.mxu1 %vm30_vm0, %v404_v58  ;;  %v339_v0 = vld [vmem:[#allocation2 + $0x78] sm:$0xff] }
 0x109   :  { %1087 = vmatprep.mubr.msk.f32.mxu1 %vm30_vm0, %v405_v62  ;;  %vm375_vm13 = vcmp.ge.f32.partialorder %v359_v60, 0.0  ;;  %v391_v1 = vmul.f32 0.1, %v359_v60  ;;  %v362_v7 = vadd.f32 %v1282_v37, %v339_v0  ;;  %v409_v13 = vsel %vm377_vm15, %v361_v63, %v393_v8 }
 0x10a   :  { %v337_v2 = vld [vmem:[#allocation2 + $0x68] sm:$0xff] }
 0x10b   :  { %v407_v4 = vsel %vm375_vm13, %v359_v60, %v391_v1  ;;  %v360_v5 = vadd.f32 %v1282_v37, %v337_v2  ;;  %v394_v12 = vmul.f32 0.1, %v362_v7  ;;  %vm378_vm1 = vcmp.ge.f32.partialorder %v362_v7, 0.0  ;;  %v414_v37 = vld [vmem:[%s1560_s2 + $0x18] sm:$0xff] }
 0x10c   :  { %1088 = vmatmul.mubr.msk.f32.gmra.mxu1 %vm30_vm0, %v406_v3 }
 0x10d   :  { %1090 = vmatprep.mubr.msk.f32.mxu1 %vm30_vm0, %v407_v4  ;;  %vm376_vm14 = vcmp.ge.f32.partialorder %v360_v5, 0.0  ;;  %v392_v9 = vmul.f32 0.1, %v360_v5  ;;  %v410_v14 = vsel %vm378_vm1, %v362_v7, %v394_v12 }
 0x10f   :  { %v408_v10 = vsel %vm376_vm14, %v360_v5, %v392_v9 }
 0x110   :  { %1091 = vmatmul.mubr.msk.f32.gmra.mxu1 %vm30_vm0, %v408_v10 }
 0x111   :  { %1093 = vmatprep.mubr.msk.f32.mxu1 %vm30_vm0, %v409_v13 }
 0x114   :  { %1094 = vmatmul.mubr.msk.f32.gmra.mxu1 %vm30_vm0, %v410_v14 }
 0x115   :  { %1104 = vmatprep.mubr.msk.f32.mxu1 %vm30_vm0, %v1296_v61 }
 0x118   :  { %1105 = vmatmul.mubr.msk.f32.vlgmr.msra.gmra.mxu1 %vm30_vm0, %v1310_v11 }
 0x119   :  { %1107 = vmatprep.mubr.msk.f32.mxu1 %vm30_vm0, %v1290_v54  ;;  %v412_v54 = vld [vmem:[%s1560_s2 + $0x8] sm:$0xff] }
 0x11c   :  { %1108 = vmatmul.mubr.msk.f32.gmra.mxu1 %vm30_vm0, %v1302_v6  ;;  %v413_v6 = vld [vmem:[%s1560_s2 + $0x10] sm:$0xff] }
 0x11d   :  { %1110 = vmatprep.mubr.msk.f32.mxu1 %vm30_vm0, %v1325_v25 }
 0x120   :  { %1111 = vmatmul.mubr.msk.f32.gmra.mxu1 %vm30_vm0, %v1333_v39 }
 0x121   :  { %1113 = vmatprep.mubr.msk.f32.mxu1 %vm30_vm0, %v401_v43  ;;  %v421_v43 = vld [vmem:[%s1560_s2 + $0x50] sm:$0xff] }
 0x124   :  { %1114 = vmatmul.mubr.msk.f32.gmra.mxu1 %vm30_vm0, %v402_v49  ;;  %v423_v49 = vld [vmem:[%s1560_s2 + $0x60] sm:$0xff] }
 0x125   :  { %1116 = vmatprep.mubr.msk.f32.mxu1 %vm30_vm0, %v403_v50 }
 0x128   :  { %1117 = vmatmul.mubr.msk.f32.gmra.mxu1 %vm30_vm0, %v404_v58 }
 0x129   :  { %1119 = vmatprep.mubr.msk.f32.mxu1 %vm30_vm0, %v405_v62 }
 0x12c   :  { %1120 = vmatmul.mubr.msk.f32.gmra.mxu1 %vm30_vm0, %v406_v3 }
 0x12d   :  { %1122 = vmatprep.mubr.msk.f32.mxu1 %vm30_vm0, %v407_v4 }
 0x130   :  { %1123 = vmatmul.mubr.msk.f32.gmra.mxu1 %vm30_vm0, %v408_v10 }
 0x131   :  { %1125 = vmatprep.mubr.msk.f32.mxu1 %vm30_vm0, %v409_v13 }
 0x134   :  { %1126 = vmatmul.mubr.msk.f32.gmra.mxu1 %vm30_vm0, %v410_v14  ;;  %vm870_vm0 = vcmask 257024  }
 0x1b7   :  { %v1077_v61 = vpop.f32.mrf.mxu1 }
 0x1b8   :  { %v627_v11 = vadd.f32 %v1077_v61, %v414_v37  ;;  %v1074_v15 = vpop.f32.mrf.mxu0 }
 0x1b9   :  { %v625_v17 = vadd.f32 %v1074_v15, %v412_v54  ;;  %v555_v18 = vpop.f32.mrf.mxu1 }
 0x1ba   :  { %644 = vst.msk [vmem:[%s1561_s6 + $0x18] sm:$0xff] %vm640_vm2, %v627_v11  ;;  %v626_v19 = vadd.f32 %v555_v18, %v413_v6  ;;  %v545_v20 = vpop.f32.mrf.mxu0 }
 0x1bb   :  { %642 = vst.msk [vmem:[%s1561_s6 + $0x8] sm:$0xff] %vm640_vm2, %v625_v17  ;;  %v624_v22 = vadd.f32 %v545_v20, %v411_v16 }
 0x1bc   :  { %643 = vst.msk [vmem:[%s1561_s6 + $0x10] sm:$0xff] %vm640_vm2, %v626_v19 }
 0x1bd   :  { %641 = vst.msk [vmem:[%s1561_s6] sm:$0xff] %vm640_vm2, %v624_v22 }
 0x1c0   :  { %v1080_v21 = vpop.f32.mrf.mxu1 }
 0x1c1   :  { %v629_v25 = vadd.f32 %v1080_v21, %v416_v23 }
 0x1c2   :  { %v565_v26 = vpop.f32.mrf.mxu1 }
 0x1c3   :  { %646 = vst.msk [vmem:[%s1561_s6 + $0x28] sm:$0xff] %vm640_vm2, %v629_v25  ;;  %v628_v28 = vadd.f32 %v565_v26, %v415_v24 }
 0x1c4   :  { %v1083_v29 = vpop.f32.mrf.mxu1 }
 0x1c5   :  { %645 = vst.msk [vmem:[%s1561_s6 + $0x20] sm:$0xff] %vm640_vm2, %v628_v28  ;;  %v631_v31 = vadd.f32 %v1083_v29, %v418_v27 }
 0x1c6   :  { %v575_v32 = vpop.f32.mrf.mxu1 }
 0x1c7   :  { %648 = vst.msk [vmem:[%s1561_s6 + $0x38] sm:$0xff] %vm640_vm2, %v631_v31  ;;  %v630_v34 = vadd.f32 %v575_v32, %v417_v30 }
 0x1c8   :  { %v1086_v35 = vpop.f32.mrf.mxu1 }
 0x1c9   :  { %647 = vst.msk [vmem:[%s1561_s6 + $0x30] sm:$0xff] %vm640_vm2, %v630_v34  ;;  %v633_v38 = vadd.f32 %v1086_v35, %v420_v33 }
 0x1ca   :  { %v585_v39 = vpop.f32.mrf.mxu1 }
 0x1cb   :  { %650 = vst.msk [vmem:[%s1561_s6 + $0x48] sm:$0xff] %vm640_vm2, %v633_v38  ;;  %v632_v41 = vadd.f32 %v585_v39, %v419_v36 }
 0x1cc   :  { %v1089_v42 = vpop.f32.mrf.mxu1 }
 0x1cd   :  { %649 = vst.msk [vmem:[%s1561_s6 + $0x40] sm:$0xff] %vm640_vm2, %v632_v41  ;;  %v635_v44 = vadd.f32 %v1089_v42, %v422_v40 }
 0x1ce   :  { %v595_v45 = vpop.f32.mrf.mxu1 }
 0x1cf   :  { %652 = vst.msk [vmem:[%s1561_s6 + $0x58] sm:$0xff] %vm640_vm2, %v635_v44  ;;  %v634_v47 = vadd.f32 %v595_v45, %v421_v43 }
 0x1d0   :  { %v1092_v48 = vpop.f32.mrf.mxu1 }
 0x1d1   :  { %651 = vst.msk [vmem:[%s1561_s6 + $0x50] sm:$0xff] %vm640_vm2, %v634_v47  ;;  %v637_v50 = vadd.f32 %v1092_v48, %v424_v46 }
 0x1d2   :  { %v605_v51 = vpop.f32.mrf.mxu1 }
 0x1d3   :  { %654 = vst.msk [vmem:[%s1561_s6 + $0x68] sm:$0xff] %vm640_vm2, %v637_v50  ;;  %v636_v53 = vadd.f32 %v605_v51, %v423_v49 }
 0x1d4   :  { %v1095_v55 = vpop.f32.mrf.mxu1 }
 0x1d5   :  { %653 = vst.msk [vmem:[%s1561_s6 + $0x60] sm:$0xff] %vm640_vm2, %v636_v53  ;;  %v639_v57 = vadd.f32 %v1095_v55, %v426_v52 }
 0x1d6   :  { %v615_v58 = vpop.f32.mrf.mxu1 }
 0x1d7   :  { %656 = vst.msk [vmem:[%s1561_s6 + $0x78] sm:$0xff] %vm640_vm2, %v639_v57  ;;  %v638_v59 = vadd.f32 %v615_v58, %v425_v56 }
 0x1d8   :  { %v1106_v60 = vpop.f32.mrf.mxu1 }
 0x1d9   :  { %655 = vst.msk [vmem:[%s1561_s6 + $0x70] sm:$0xff] %vm640_vm2, %v638_v59  ;;  %v961_v62 = vpack.c.bf16 %v1106_v60, %v1106_v60 }
 0x1da   :  { %v727_v63 = vpop.f32.mrf.mxu1 }
 0x1db   :  { %872 = vst.msk [vmem:[%s1562_s7 + $0x4] sm:$0xf] %vm870_vm0, %v961_v62  ;;  %v960_v0 = vpack.c.bf16 %v727_v63, %v727_v63 }
 0x1dc   :  { %v1109_v1 = vpop.f32.mrf.mxu1 }
 0x1dd   :  { %871 = vst.msk [vmem:[%s1562_s7] sm:$0xf] %vm870_vm0, %v960_v0  ;;  %v963_v2 = vpack.c.bf16 %v1109_v1, %v1109_v1 }
 0x1de   :  { %v737_v3 = vpop.f32.mrf.mxu1 }
 0x1df   :  { %874 = vst.msk [vmem:[%s1562_s7 + $0xc] sm:$0xf] %vm870_vm0, %v963_v2  ;;  %v962_v4 = vpack.c.bf16 %v737_v3, %v737_v3 }
 0x1e0   :  { %v1112_v5 = vpop.f32.mrf.mxu1 }
 0x1e1   :  { %873 = vst.msk [vmem:[%s1562_s7 + $0x8] sm:$0xf] %vm870_vm0, %v962_v4  ;;  %v965_v7 = vpack.c.bf16 %v1112_v5, %v1112_v5 }
 0x1e2   :  { %v747_v8 = vpop.f32.mrf.mxu1 }
 0x1e3   :  { %876 = vst.msk [vmem:[%s1562_s7 + $0x14] sm:$0xf] %vm870_vm0, %v965_v7  ;;  %v964_v9 = vpack.c.bf16 %v747_v8, %v747_v8 }
 0x1e4   :  { %v1115_v10 = vpop.f32.mrf.mxu1 }
 0x1e5   :  { %875 = vst.msk [vmem:[%s1562_s7 + $0x10] sm:$0xf] %vm870_vm0, %v964_v9  ;;  %v967_v12 = vpack.c.bf16 %v1115_v10, %v1115_v10 }
 0x1e6   :  { %v757_v13 = vpop.f32.mrf.mxu1 }
 0x1e7   :  { %878 = vst.msk [vmem:[%s1562_s7 + $0x1c] sm:$0xf] %vm870_vm0, %v967_v12  ;;  %v966_v14 = vpack.c.bf16 %v757_v13, %v757_v13 }
 0x1e8   :  { %v1118_v37 = vpop.f32.mrf.mxu1 }
 0x1e9   :  { %877 = vst.msk [vmem:[%s1562_s7 + $0x18] sm:$0xf] %vm870_vm0, %v966_v14  ;;  %v969_v54 = vpack.c.bf16 %v1118_v37, %v1118_v37 }
 0x1ea   :  { %v767_v61 = vpop.f32.mrf.mxu1 }
 0x1eb   :  { %880 = vst.msk [vmem:[%s1562_s7 + $0x24] sm:$0xf] %vm870_vm0, %v969_v54  ;;  %v968_v6 = vpack.c.bf16 %v767_v61, %v767_v61 }
 0x1ec   :  { %v1121_v11 = vpop.f32.mrf.mxu1 }
 0x1ed   :  { %879 = vst.msk [vmem:[%s1562_s7 + $0x20] sm:$0xf] %vm870_vm0, %v968_v6  ;;  %v971_v15 = vpack.c.bf16 %v1121_v11, %v1121_v11 }
 0x1ee   :  { %v777_v16 = vpop.f32.mrf.mxu1 }
 0x1ef   :  { %882 = vst.msk [vmem:[%s1562_s7 + $0x2c] sm:$0xf] %vm870_vm0, %v971_v15  ;;  %v970_v17 = vpack.c.bf16 %v777_v16, %v777_v16 }
 0x1f0   :  { %v1124_v18 = vpop.f32.mrf.mxu1 }
 0x1f1   :  { %881 = vst.msk [vmem:[%s1562_s7 + $0x28] sm:$0xf] %vm870_vm0, %v970_v17  ;;  %v973_v19 = vpack.c.bf16 %v1124_v18, %v1124_v18 }
 0x1f2   :  { %v787_v20 = vpop.f32.mrf.mxu1 }
 0x1f3   :  { %884 = vst.msk [vmem:[%s1562_s7 + $0x34] sm:$0xf] %vm870_vm0, %v973_v19  ;;  %v972_v22 = vpack.c.bf16 %v787_v20, %v787_v20 }
 0x1f4   :  { %v1127_v23 = vpop.f32.mrf.mxu1 }
 0x1f5   :  { %883 = vst.msk [vmem:[%s1562_s7 + $0x30] sm:$0xf] %vm870_vm0, %v972_v22  ;;  %v975_v21 = vpack.c.bf16 %v1127_v23, %v1127_v23 }
 0x1f6   :  { %v797_v24 = vpop.f32.mrf.mxu1 }
 0x1f7   :  { %886 = vst.msk [vmem:[%s1562_s7 + $0x3c] sm:$0xf] %vm870_vm0, %v975_v21  ;;  %v974_v25 = vpack.c.bf16 %v797_v24, %v797_v24 }
 0x1f9   :  { %885 = vst.msk [vmem:[%s1562_s7 + $0x38] sm:$0xf] %vm870_vm0, %v974_v25 }

// kernel: mpnn_forward.5
= control target key start
LH: loop header
LB: loop body
LE: loop exit
PB: predicated region body
PF: predicated region fallthrough
CT: control target
= control target key end

     0   :  { %vm40_vm0 = vcmask 261120   ;;  %v1536_v1 = vmov 0.0   ;;  %s1984_s1 = inlined_call_operand.vmem [shape: bf16[128,32], index: 1, kind: input, shape index: {}]   ;;  %s1985_s0 = inlined_call_operand.vmem [shape: bf16[128,128], index: 0, kind: input, shape index: {}]   ;;  %s1986_s4 = inlined_call_operand.vmem [shape: f32[32,64], index: 4, kind: input, shape index: {}]   ;;  %s1987_s6 = inlined_call_operand.vmem [shape: f32[64,64], index: 6, kind: input, shape index: {}]   ;;  %s1988_s3 = inlined_call_operand.vmem [shape: f32[1,32], index: 3, kind: input, shape index: {}]   ;;  %s1989_s8 = inlined_call_operand.vmem [shape: f32[64,4], index: 8, kind: input, shape index: {}]   ;;  %s1990_s2 = inlined_call_operand.vmem [shape: f32[128,64], index: 2, kind: input, shape index: {}]   ;;  %s1991_s5 = inlined_call_operand.vmem [shape: f32[1,64], index: 5, kind: input, shape index: {}]   ;;  %s1992_s7 = inlined_call_operand.vmem [shape: f32[1,64], index: 7, kind: input, shape index: {}]   ;;  %s1993_s9 = inlined_call_operand.vmem [shape: f32[1,4], index: 9, kind: input, shape index: {}]   ;;  %s1994_s10 = inlined_call_operand.vmem [shape: f32[128,4], index: 10, kind: output, shape index: {}]  }
   0x1   :  { %v1520_v0 = vld [vmem:[%s1984_s1 + $0x38] sm:$0xff]   ;;  %43 = vst.msk [vmem:[#allocation2 + $0x10] sm:$0xff] %vm40_vm0, %v1536_v1  ;;  %41 = vst.msk [vmem:[#allocation2] sm:$0xff] %vm40_vm0, %v1536_v1  ;;  %v1521_v2 = vld [vmem:[%s1984_s1 + $0x30] sm:$0xff]  }
   0x2   :  { %42 = vst.msk [vmem:[#allocation2 + $0x8] sm:$0xff] %vm40_vm0, %v1536_v1  ;;  %44 = vst.msk [vmem:[#allocation2 + $0x18] sm:$0xff] %vm40_vm0, %v1536_v1  ;;  %1359 = vmatprep.subr.bf16.mxu0 %v1520_v0  ;;  %v1522_v3 = vld [vmem:[%s1984_s1 + $0x28] sm:$0xff]   ;;  %v1523_v4 = vld [vmem:[%s1984_s1 + $0x20] sm:$0xff]  }
   0x3   :  { %45 = vst.msk [vmem:[#allocation2 + $0x20] sm:$0xff] %vm40_vm0, %v1536_v1  ;;  %46 = vst.msk [vmem:[#allocation2 + $0x28] sm:$0xff] %vm40_vm0, %v1536_v1  ;;  %1360 = vmatpush3.bf16.msra.mxu0 %v1520_v0  ;;  %v1528_v5 = vld [vmem:[%s1985_s0] sm:$0xff]   ;;  %v1524_v6 = vld [vmem:[%s1984_s1 + $0x18] sm:$0xff]  }
   0x4   :  { %47 = vst.msk [vmem:[#allocation2 + $0x30] sm:$0xff] %vm40_vm0, %v1536_v1  ;;  %48 = vst.msk [vmem:[#allocation2 + $0x38] sm:$0xff] %vm40_vm0, %v1536_v1  ;;  %1361 = vmatprep.subr.bf16.mxu0 %v1521_v2  ;;  %1375 = vmatprep.mubr.bf16.mxu0 %v1528_v5  ;;  %v1525_v7 = vld [vmem:[%s1984_s1 + $0x10] sm:$0xff]   ;;  %v1526_v8 = vld [vmem:[%s1984_s1 + $0x8] sm:$0xff]  }
   0x5   :  { %49 = vst.msk [vmem:[#allocation2 + $0x40] sm:$0xff] %vm40_vm0, %v1536_v1  ;;  %50 = vst.msk [vmem:[#allocation2 + $0x48] sm:$0xff] %vm40_vm0, %v1536_v1  ;;  %v1527_v9 = vld [vmem:[%s1984_s1] sm:$0xff]   ;;  %v1529_v10 = vld [vmem:[%s1985_s0 + $0x8] sm:$0xff]  }
   0x6   :  { %51 = vst.msk [vmem:[#allocation2 + $0x50] sm:$0xff] %vm40_vm0, %v1536_v1  ;;  %52 = vst.msk [vmem:[#allocation2 + $0x58] sm:$0xff] %vm40_vm0, %v1536_v1  ;;  %v1530_v11 = vld [vmem:[%s1985_s0 + $0x10] sm:$0xff]   ;;  %v1531_v12 = vld [vmem:[%s1985_s0 + $0x18] sm:$0xff]  }
   0x7   :  { %53 = vst.msk [vmem:[#allocation2 + $0x60] sm:$0xff] %vm40_vm0, %v1536_v1  ;;  %54 = vst.msk [vmem:[#allocation2 + $0x68] sm:$0xff] %vm40_vm0, %v1536_v1  ;;  %1362 = vmatpush3.bf16.msra.mxu0 %v1521_v2  ;;  %v1532_v13 = vld [vmem:[%s1985_s0 + $0x20] sm:$0xff]   ;;  %v1533_v14 = vld [vmem:[%s1985_s0 + $0x28] sm:$0xff]  }
   0x8   :  { %55 = vst.msk [vmem:[#allocation2 + $0x70] sm:$0xff] %vm40_vm0, %v1536_v1  ;;  %56 = vst.msk [vmem:[#allocation2 + $0x78] sm:$0xff] %vm40_vm0, %v1536_v1  ;;  %1363 = vmatprep.subr.bf16.mxu0 %v1522_v3  ;;  %v1534_v15 = vld [vmem:[%s1985_s0 + $0x30] sm:$0xff]   ;;  %v1535_v16 = vld [vmem:[%s1985_s0 + $0x38] sm:$0xff]  }
   0x9   :  { %v440_v17 = vld [vmem:[%s1986_s4 + $0x18] sm:$0xff]  ;;  %v439_v18 = vld [vmem:[%s1986_s4 + $0x10] sm:$0xff]  ;;  %v438_v19 = vld [vmem:[%s1986_s4 + $0x8] sm:$0xff] }
   0xa   :  { %1391 = vmatprep.subr.mxu1 %v440_v17  ;;  %v437_v20 = vld [vmem:[%s1986_s4] sm:$0xff]  ;;  %v1671_v21 = vld [vmem:[%s1987_s6 + $0x38] sm:$0xff]  ;;  %v59_v22 = vld [vmem:[#allocation2 + $0x10] sm:$0xff] }
   0xb   :  { %1364 = vmatpush3.bf16.msra.mxu0 %v1522_v3  ;;  %1392 = vmatpush3.msra.mxu1 %v440_v17  ;;  %v57_v24 = vld [vmem:[#allocation2] sm:$0xff]  ;;  %v60_v27 = vld [vmem:[#allocation2 + $0x18] sm:$0xff]  ;;  %v58_v30 = vld [vmem:[#allocation2 + $0x8] sm:$0xff] }
   0xc   :  { %1365 = vmatprep.subr.bf16.mxu0 %v1523_v4  ;;  %1393 = vmatprep.subr.mxu1 %v439_v18  ;;  %v63_v33 = vld [vmem:[#allocation2 + $0x30] sm:$0xff]  ;;  %v61_v36 = vld [vmem:[#allocation2 + $0x20] sm:$0xff]  ;;  %v64_v39 = vld [vmem:[#allocation2 + $0x38] sm:$0xff] }
   0xd   :  { %1394 = vmatpush3.msra.mxu1 %v439_v18  ;;  %v1682_v41 = vld [vmem:[%s1988_s3] ss:$0 sm:$0xff]  ;;  %v62_v44 = vld [vmem:[#allocation2 + $0x28] sm:$0xff]  ;;  %v67_v49 = vld [vmem:[#allocation2 + $0x50] sm:$0xff] }
   0xe   :  { %1395 = vmatprep.subr.mxu1 %v438_v19  ;;  %v65_v55 = vld [vmem:[#allocation2 + $0x40] sm:$0xff]  ;;  %v68_v62 = vld [vmem:[#allocation2 + $0x58] sm:$0xff]  ;;  %v726_v18 = vld [vmem:[%s1987_s6 + $0x28] sm:$0xff] }
   0xf   :  { %1366 = vmatpush3.bf16.msra.mxu0 %v1523_v4  ;;  %1396 = vmatpush3.msra.mxu1 %v438_v19  ;;  %v66_v4 = vld [vmem:[#allocation2 + $0x48] sm:$0xff] }
  0x10   :  { %1367 = vmatprep.subr.bf16.mxu0 %v1524_v6  ;;  %1397 = vmatprep.subr.mxu1 %v437_v20 }
  0x11   :  { %1398 = vmatpush3.msra.mxu1 %v437_v20  ;;  %v69_v20 = vld [vmem:[#allocation2 + $0x60] sm:$0xff] }
  0x12   :  { %1423 = vmatprep.subr.mxu1 %v1671_v21 }
  0x13   :  { %1368 = vmatpush3.bf16.msra.mxu0 %v1524_v6 }
  0x14   :  { %1369 = vmatprep.subr.bf16.mxu0 %v1525_v7 }
  0x17   :  { %1370 = vmatpush3.bf16.msra.mxu0 %v1525_v7 }
  0x18   :  { %1371 = vmatprep.subr.bf16.mxu0 %v1526_v8 }
  0x1b   :  { %1372 = vmatpush3.bf16.msra.mxu0 %v1526_v8 }
  0x1c   :  { %1373 = vmatprep.subr.bf16.mxu0 %v1527_v9 }
  0x1f   :  { %1374 = vmatpush3.bf16.msra.mxu0 %v1527_v9 }
  0x22   :  { %1376 = vmatmul.mubr.bf16.vlgmr.msra.gmra.mxu0 %v1529_v10  ;;  %v727_v10 = vld [vmem:[%s1987_s6 + $0x30] sm:$0xff] }
  0x23   :  { %1379 = vmatprep.mubr.bf16.mxu0 %v1530_v11 }
  0x2a   :  { %1380 = vmatmul.mubr.bf16.gmra.mxu0 %v1531_v12 }
  0x2b   :  { %1383 = vmatprep.mubr.bf16.mxu0 %v1532_v13  ;;  %v71_v13 = vld [vmem:[#allocation2 + $0x70] sm:$0xff] }
  0x32   :  { %1384 = vmatmul.mubr.bf16.gmra.mxu0 %v1533_v14 }
  0x33   :  { %1387 = vmatprep.mubr.bf16.mxu0 %v1534_v15 }
  0x3a   :  { %1388 = vmatmul.mubr.bf16.gmra.mxu0 %v1535_v16 }
  0xe2   :  { %v1377_v23 = vpop.f32.mrf.mxu0 }
  0xe3   :  { %v300_v25 = vadd.f32 %v1377_v23, %v59_v22 }
  0xe4   :  { %v235_v26 = vpop.f32.mrf.mxu0 }
  0xe5   :  { %317 = vst.msk [vmem:[#allocation2 + $0x10] sm:$0xff] %vm40_vm0, %v300_v25  ;;  %v298_v28 = vadd.f32 %v235_v26, %v57_v24 }
  0xe6   :  { %v1378_v29 = vpop.f32.mrf.mxu0 }
  0xe7   :  { %315 = vst.msk [vmem:[#allocation2] sm:$0xff] %vm40_vm0, %v298_v28  ;;  %v301_v31 = vadd.f32 %v1378_v29, %v60_v27  ;;  %v72_v29 = vld [vmem:[#allocation2 + $0x78] sm:$0xff] }
  0xe8   :  { %v238_v32 = vpop.f32.mrf.mxu0 }
  0xe9   :  { %318 = vst.msk [vmem:[#allocation2 + $0x18] sm:$0xff] %vm40_vm0, %v301_v31  ;;  %v299_v34 = vadd.f32 %v238_v32, %v58_v30 }
  0xea   :  { %v1381_v35 = vpop.f32.mrf.mxu0 }
  0xeb   :  { %316 = vst.msk [vmem:[#allocation2 + $0x8] sm:$0xff] %vm40_vm0, %v299_v34  ;;  %v304_v37 = vadd.f32 %v1381_v35, %v63_v33  ;;  %v724_v34 = vld [vmem:[%s1987_s6 + $0x18] sm:$0xff] }
  0xec   :  { %v251_v38 = vpop.f32.mrf.mxu0  ;;  %v336_v42 = vld [vmem:[#allocation2 + $0x10] sm:$0xff] }
  0xed   :  { %321 = vst.msk [vmem:[#allocation2 + $0x30] sm:$0xff] %vm40_vm0, %v304_v37  ;;  %v302_v40 = vadd.f32 %v251_v38, %v61_v36  ;;  %v359_v50 = vadd.f32 %v1682_v41, %v336_v42  ;;  %v70_v36 = vld [vmem:[#allocation2 + $0x68] sm:$0xff] }
  0xee   :  { %v1382_v43 = vpop.f32.mrf.mxu0  ;;  %v334_v45 = vld [vmem:[#allocation2] sm:$0xff] }
  0xef   :  { %319 = vst.msk [vmem:[#allocation2 + $0x20] sm:$0xff] %vm40_vm0, %v302_v40  ;;  %v305_v46 = vadd.f32 %v1382_v43, %v64_v39  ;;  %v357_v47 = vadd.f32 %v1682_v41, %v334_v45  ;;  %v391_v63 = vmul.f32 0.1, %v359_v50  ;;  %vm375_vm3 = vcmp.ge.f32.partialorder %v359_v50, 0.0  ;;  %v723_v43 = vld [vmem:[%s1987_s6 + $0x10] sm:$0xff] }
  0xf0   :  { %v254_v48 = vpop.f32.mrf.mxu0  ;;  %v337_v51 = vld [vmem:[#allocation2 + $0x18] sm:$0xff] }
  0xf1   :  { %322 = vst.msk [vmem:[#allocation2 + $0x38] sm:$0xff] %vm40_vm0, %v305_v46  ;;  %v303_v52 = vadd.f32 %v254_v48, %v62_v44  ;;  %vm373_vm1 = vcmp.ge.f32.partialorder %v357_v47, 0.0  ;;  %v389_v53 = vmul.f32 0.1, %v357_v47  ;;  %v360_v57 = vadd.f32 %v1682_v41, %v337_v51 }
  0xf2   :  { %v1385_v54 = vpop.f32.mrf.mxu0  ;;  %v335_v56 = vld [vmem:[#allocation2 + $0x8] sm:$0xff]  ;;  %v407_v12 = vsel %vm375_vm3, %v359_v50, %v391_v63 }
  0xf3   :  { %320 = vst.msk [vmem:[#allocation2 + $0x28] sm:$0xff] %vm40_vm0, %v303_v52  ;;  %v308_v58 = vadd.f32 %v1385_v54, %v67_v49  ;;  %v405_v59 = vsel %vm373_vm1, %v357_v47, %v389_v53  ;;  %v358_v60 = vadd.f32 %v1682_v41, %v335_v56  ;;  %v392_v5 = vmul.f32 0.1, %v360_v57 }
  0xf4   :  { %v267_v61 = vpop.f32.mrf.mxu0  ;;  %1399 = vmatprep.mubr.msk.f32.mxu1 %vm40_vm0, %v405_v59  ;;  %v340_v2 = vld [vmem:[#allocation2 + $0x30] sm:$0xff]  ;;  %vm376_vm4 = vcmp.ge.f32.partialorder %v360_v57, 0.0 }
  0xf5   :  { %325 = vst.msk [vmem:[#allocation2 + $0x50] sm:$0xff] %vm40_vm0, %v308_v58  ;;  %v306_v0 = vadd.f32 %v267_v61, %v65_v55  ;;  %vm374_vm2 = vcmp.ge.f32.partialorder %v358_v60, 0.0  ;;  %v390_v1 = vmul.f32 0.1, %v358_v60  ;;  %v363_v14 = vadd.f32 %v1682_v41, %v340_v2 }
  0xf6   :  { %v1386_v3 = vpop.f32.mrf.mxu0  ;;  %v338_v6 = vld [vmem:[#allocation2 + $0x20] sm:$0xff]  ;;  %v408_v22 = vsel %vm376_vm4, %v360_v57, %v392_v5 }
  0xf7   :  { %323 = vst.msk [vmem:[#allocation2 + $0x40] sm:$0xff] %vm40_vm0, %v306_v0  ;;  %v309_v7 = vadd.f32 %v1386_v3, %v68_v62  ;;  %v406_v8 = vsel %vm374_vm2, %v358_v60, %v390_v1  ;;  %v361_v9 = vadd.f32 %v1682_v41, %v338_v6  ;;  %v395_v30 = vmul.f32 0.1, %v363_v14 }
  0xf8   :  { %v270_v11 = vpop.f32.mrf.mxu0  ;;  %1400 = vmatmul.mubr.msk.f32.vlgmr.msra.gmra.mxu1 %vm40_vm0, %v406_v8  ;;  %v341_v15 = vld [vmem:[#allocation2 + $0x38] sm:$0xff]  ;;  %vm379_vm7 = vcmp.ge.f32.partialorder %v363_v14, 0.0 }
  0xf9   :  { %326 = vst.msk [vmem:[#allocation2 + $0x58] sm:$0xff] %vm40_vm0, %v309_v7  ;;  %v307_v16 = vadd.f32 %v270_v11, %v66_v4  ;;  %1402 = vmatprep.mubr.msk.f32.mxu1 %vm40_vm0, %v407_v12  ;;  %vm377_vm5 = vcmp.ge.f32.partialorder %v361_v9, 0.0  ;;  %v393_v17 = vmul.f32 0.1, %v361_v9  ;;  %1424 = vmatpush3.msra.mxu1 %v1671_v21  ;;  %v364_v27 = vadd.f32 %v1682_v41, %v341_v15  ;;  %v725_v21 = vld [vmem:[%s1987_s6 + $0x20] sm:$0xff]  ;;  %v1757_v15 = vld [vmem:[%s1989_s8 + $0x30] sm:$0xff] }
  0xfa   :  { %v1389_v19 = vpop.f32.mrf.mxu0  ;;  %v339_v23 = vld [vmem:[#allocation2 + $0x28] sm:$0xff]  ;;  %1425 = vmatprep.subr.mxu1 %v727_v10  ;;  %v411_v45 = vsel %vm379_vm7, %v363_v14, %v395_v30  ;;  %v985_v14 = vld [vmem:[%s1989_s8 + $0x38] sm:$0xff] }
  0xfb   :  { %324 = vst.msk [vmem:[#allocation2 + $0x48] sm:$0xff] %vm40_vm0, %v307_v16  ;;  %v312_v24 = vadd.f32 %v1389_v19, %v71_v13  ;;  %v409_v25 = vsel %vm377_vm5, %v361_v9, %v393_v17  ;;  %v362_v26 = vadd.f32 %v1682_v41, %v339_v23  ;;  %1426 = vmatpush3.msra.mxu1 %v727_v10  ;;  %v396_v40 = vmul.f32 0.1, %v364_v27  ;;  %v721_v13 = vld [vmem:[%s1987_s6] sm:$0xff]  ;;  %v1762_v16 = vld [vmem:[%s1989_s8 + $0x28] sm:$0xff] }
  0xfc   :  { %v283_v28 = vpop.f32.mrf.mxu0  ;;  %1403 = vmatmul.mubr.msk.f32.gmra.mxu1 %vm40_vm0, %v408_v22  ;;  %1427 = vmatprep.subr.mxu1 %v726_v18  ;;  %v344_v33 = vld [vmem:[#allocation2 + $0x50] sm:$0xff]  ;;  %vm380_vm8 = vcmp.ge.f32.partialorder %v364_v27, 0.0  ;;  %v1769_v17 = vld [vmem:[%s1989_s8 + $0x20] sm:$0xff] }
  0xfd   :  { %329 = vst.msk [vmem:[#allocation2 + $0x70] sm:$0xff] %vm40_vm0, %v312_v24  ;;  %v310_v31 = vadd.f32 %v283_v28, %v69_v20  ;;  %1405 = vmatprep.mubr.msk.f32.mxu1 %vm40_vm0, %v409_v25  ;;  %vm378_vm6 = vcmp.ge.f32.partialorder %v362_v26, 0.0  ;;  %v394_v32 = vmul.f32 0.1, %v362_v26  ;;  %1428 = vmatpush3.msra.mxu1 %v726_v18  ;;  %v367_v46 = vadd.f32 %v1682_v41, %v344_v33  ;;  %v422_v18 = vld [vmem:[%s1990_s2 + $0x8] sm:$0xff]  ;;  %v421_v22 = vld [vmem:[%s1990_s2] sm:$0xff] }
  0xfe   :  { %v1390_v35 = vpop.f32.mrf.mxu0  ;;  %v342_v37 = vld [vmem:[#allocation2 + $0x40] sm:$0xff]  ;;  %1429 = vmatprep.subr.mxu1 %v725_v21  ;;  %v412_v51 = vsel %vm380_vm8, %v364_v27, %v396_v40  ;;  %1463 = vmatprep.subr.mxu0 %v985_v14  ;;  %v424_v25 = vld [vmem:[%s1990_s2 + $0x18] sm:$0xff]  ;;  %v423_v28 = vld [vmem:[%s1990_s2 + $0x10] sm:$0xff] }
  0xff   :  { %327 = vst.msk [vmem:[#allocation2 + $0x60] sm:$0xff] %vm40_vm0, %v310_v31  ;;  %v313_v38 = vadd.f32 %v1390_v35, %v72_v29  ;;  %v410_v39 = vsel %vm378_vm6, %v362_v26, %v394_v32  ;;  %v365_v42 = vadd.f32 %v1682_v41, %v342_v37  ;;  %1430 = vmatpush3.msra.mxu1 %v725_v21  ;;  %v399_v55 = vmul.f32 0.1, %v367_v46  ;;  %v1781_v20 = vld [vmem:[%s1991_s5] ss:$0 sm:$0xff]  ;;  %v426_v33 = vld [vmem:[%s1990_s2 + $0x28] sm:$0xff] }
 0x100   :  { %v286_v44 = vpop.f32.mrf.mxu0  ;;  %1406 = vmatmul.mubr.msk.f32.gmra.mxu1 %vm40_vm0, %v410_v39  ;;  %v345_v47 = vld [vmem:[#allocation2 + $0x58] sm:$0xff]  ;;  %1431 = vmatprep.subr.mxu1 %v724_v34  ;;  %vm383_vm11 = vcmp.ge.f32.partialorder %v367_v46, 0.0 }
 0x101   :  { %330 = vst.msk [vmem:[#allocation2 + $0x78] sm:$0xff] %vm40_vm0, %v313_v38  ;;  %v311_v48 = vadd.f32 %v286_v44, %v70_v36  ;;  %1408 = vmatprep.mubr.msk.f32.mxu1 %vm40_vm0, %v411_v45  ;;  %vm381_vm9 = vcmp.ge.f32.partialorder %v365_v42, 0.0  ;;  %v397_v49 = vmul.f32 0.1, %v365_v42  ;;  %1432 = vmatpush3.msra.mxu1 %v724_v34  ;;  %v368_v54 = vadd.f32 %v1682_v41, %v345_v47  ;;  %v425_v38 = vld [vmem:[%s1990_s2 + $0x20] sm:$0xff] }
 0x102   :  { %v343_v50 = vld [vmem:[#allocation2 + $0x48] sm:$0xff]  ;;  %1433 = vmatprep.subr.mxu1 %v723_v43  ;;  %v415_v62 = vsel %vm383_vm11, %v367_v46, %v399_v55  ;;  %1464 = vmatpush3.msra.mxu0 %v985_v14  ;;  %v428_v46 = vld [vmem:[%s1990_s2 + $0x38] sm:$0xff] }
 0x103   :  { %328 = vst.msk [vmem:[#allocation2 + $0x68] sm:$0xff] %vm40_vm0, %v311_v48  ;;  %v413_v52 = vsel %vm381_vm9, %v365_v42, %v397_v49  ;;  %v366_v53 = vadd.f32 %v1682_v41, %v343_v50  ;;  %1434 = vmatpush3.msra.mxu1 %v723_v43  ;;  %v400_v60 = vmul.f32 0.1, %v368_v54  ;;  %vm384_vm12 = vcmp.ge.f32.partialorder %v368_v54, 0.0  ;;  %1465 = vmatprep.subr.mxu0 %v1757_v15 }
 0x104   :  { %1409 = vmatmul.mubr.msk.f32.gmra.mxu1 %vm40_vm0, %v412_v51  ;;  %v348_v57 = vld [vmem:[#allocation2 + $0x70] sm:$0xff]  ;;  %1466 = vmatpush3.msra.mxu0 %v1757_v15 }
 0x105   :  { %1411 = vmatprep.mubr.msk.f32.mxu1 %vm40_vm0, %v413_v52  ;;  %vm382_vm10 = vcmp.ge.f32.partialorder %v366_v53, 0.0  ;;  %v398_v56 = vmul.f32 0.1, %v366_v53  ;;  %v371_v63 = vadd.f32 %v1682_v41, %v348_v57  ;;  %v416_v3 = vsel %vm384_vm12, %v368_v54, %v400_v60  ;;  %1467 = vmatprep.subr.mxu0 %v1762_v16  ;;  %v427_v51 = vld [vmem:[%s1990_s2 + $0x30] sm:$0xff] }
 0x106   :  { %v346_v58 = vld [vmem:[#allocation2 + $0x60] sm:$0xff]  ;;  %1468 = vmatpush3.msra.mxu0 %v1762_v16 }
 0x107   :  { %v414_v59 = vsel %vm382_vm10, %v366_v53, %v398_v56  ;;  %v369_v61 = vadd.f32 %v1682_v41, %v346_v58  ;;  %v403_v7 = vmul.f32 0.1, %v371_v63  ;;  %vm387_vm15 = vcmp.ge.f32.partialorder %v371_v63, 0.0  ;;  %1469 = vmatprep.subr.mxu0 %v1769_v17  ;;  %v430_v58 = vld [vmem:[%s1990_s2 + $0x48] sm:$0xff] }
 0x108   :  { %1412 = vmatmul.mubr.msk.f32.gmra.mxu1 %vm40_vm0, %v414_v59  ;;  %v349_v0 = vld [vmem:[#allocation2 + $0x78] sm:$0xff]  ;;  %1470 = vmatpush3.msra.mxu0 %v1769_v17 }
 0x109   :  { %1414 = vmatprep.mubr.msk.f32.mxu1 %vm40_vm0, %v415_v62  ;;  %vm385_vm13 = vcmp.ge.f32.partialorder %v369_v61, 0.0  ;;  %v401_v1 = vmul.f32 0.1, %v369_v61  ;;  %v372_v6 = vadd.f32 %v1682_v41, %v349_v0  ;;  %v419_v11 = vsel %vm387_vm15, %v371_v63, %v403_v7  ;;  %v429_v63 = vld [vmem:[%s1990_s2 + $0x40] sm:$0xff] }
 0x10a   :  { %v347_v2 = vld [vmem:[#allocation2 + $0x68] sm:$0xff] }
 0x10b   :  { %v417_v4 = vsel %vm385_vm13, %v369_v61, %v401_v1  ;;  %v370_v5 = vadd.f32 %v1682_v41, %v347_v2  ;;  %v404_v10 = vmul.f32 0.1, %v372_v6  ;;  %vm388_vm1 = vcmp.ge.f32.partialorder %v372_v6, 0.0  ;;  %v722_v41 = vld [vmem:[%s1987_s6 + $0x8] sm:$0xff] }
 0x10c   :  { %1415 = vmatmul.mubr.msk.f32.gmra.mxu1 %vm40_vm0, %v416_v3  ;;  %1435 = vmatprep.subr.mxu1 %v722_v41 }
 0x10d   :  { %1417 = vmatprep.mubr.msk.f32.mxu1 %vm40_vm0, %v417_v4  ;;  %vm386_vm14 = vcmp.ge.f32.partialorder %v370_v5, 0.0  ;;  %v402_v8 = vmul.f32 0.1, %v370_v5  ;;  %v420_v12 = vsel %vm388_vm1, %v372_v6, %v404_v10  ;;  %1436 = vmatpush3.msra.mxu1 %v722_v41  ;;  %v432_v6 = vld [vmem:[%s1990_s2 + $0x58] sm:$0xff] }
 0x10e   :  { %1437 = vmatprep.subr.mxu1 %v721_v13 }
 0x10f   :  { %v418_v9 = vsel %vm386_vm14, %v370_v5, %v402_v8  ;;  %1438 = vmatpush3.msra.mxu1 %v721_v13 }
 0x110   :  { %1418 = vmatmul.mubr.msk.f32.gmra.mxu1 %vm40_vm0, %v418_v9  ;;  %1503 = vmatprep.subr.mxu1 %v985_v14 }
 0x111   :  { %1420 = vmatprep.mubr.msk.f32.mxu1 %vm40_vm0, %v419_v11  ;;  %v431_v11 = vld [vmem:[%s1990_s2 + $0x50] sm:$0xff] }
 0x114   :  { %1421 = vmatmul.mubr.msk.f32.gmra.mxu1 %vm40_vm0, %v420_v12  ;;  %vm736_vm0 = vcmask 523264  }
 0x1b8   :  { %v1401_v19 = vpop.f32.mrf.mxu1 }
 0x1b9   :  { %v635_v23 = vadd.f32 %v1401_v19, %v422_v18 }
 0x1ba   :  { %v555_v24 = vpop.f32.mrf.mxu1 }
 0x1bb   :  { %v658_v26 = vadd.f32 %v1781_v20, %v635_v23  ;;  %v634_v27 = vadd.f32 %v555_v24, %v421_v22  ;;  %v433_v24 = vld [vmem:[%s1990_s2 + $0x60] sm:$0xff] }
 0x1bc   :  { %v1404_v21 = vpop.f32.mrf.mxu1 }
 0x1bd   :  { %v657_v29 = vadd.f32 %v1781_v20, %v634_v27  ;;  %v637_v30 = vadd.f32 %v1404_v21, %v424_v25  ;;  %v690_v31 = vmul.f32 0.1, %v658_v26  ;;  %vm674_vm2 = vcmp.ge.f32.partialorder %v658_v26, 0.0 }
 0x1be   :  { %v565_v32 = vpop.f32.mrf.mxu1 }
 0x1bf   :  { %v689_v34 = vmul.f32 0.1, %v657_v29  ;;  %v660_v35 = vadd.f32 %v1781_v20, %v637_v30  ;;  %v636_v36 = vadd.f32 %v565_v32, %v423_v28  ;;  %vm673_vm3 = vcmp.ge.f32.partialorder %v657_v29, 0.0  ;;  %v436_v30 = vld [vmem:[%s1990_s2 + $0x78] sm:$0xff] }
 0x1c0   :  { %v1407_v37 = vpop.f32.mrf.mxu1  ;;  %v706_v43 = vsel %vm674_vm2, %v658_v26, %v690_v31 }
 0x1c1   :  { %v659_v39 = vadd.f32 %v1781_v20, %v636_v36  ;;  %v639_v40 = vadd.f32 %v1407_v37, %v426_v33  ;;  %v705_v42 = vsel %vm673_vm3, %v657_v29, %v689_v34  ;;  %v692_v44 = vmul.f32 0.1, %v660_v35 }
 0x1c2   :  { %v575_v45 = vpop.f32.mrf.mxu1  ;;  %1439 = vmatprep.mubr.msk.f32.mxu1 %vm736_vm0, %v705_v42  ;;  %vm676_vm4 = vcmp.ge.f32.partialorder %v660_v35, 0.0 }
 0x1c3   :  { %v691_v47 = vmul.f32 0.1, %v659_v39  ;;  %v662_v48 = vadd.f32 %v1781_v20, %v639_v40  ;;  %v638_v49 = vadd.f32 %v575_v45, %v425_v38  ;;  %1440 = vmatmul.mubr.msk.f32.vlgmr.msra.gmra.mxu1 %vm736_vm0, %v706_v43  ;;  %vm675_vm5 = vcmp.ge.f32.partialorder %v659_v39, 0.0 }
 0x1c4   :  { %v1410_v50 = vpop.f32.mrf.mxu1  ;;  %1511 = vmatpush3.msra.mxu1 %v985_v14  ;;  %v708_v57 = vsel %vm676_vm4, %v660_v35, %v692_v44  ;;  %v435_v35 = vld [vmem:[%s1990_s2 + $0x70] sm:$0xff] }
 0x1c5   :  { %v661_v52 = vadd.f32 %v1781_v20, %v638_v49  ;;  %v641_v53 = vadd.f32 %v1410_v50, %v428_v46  ;;  %v707_v54 = vsel %vm675_vm5, %v659_v39, %v691_v47  ;;  %1504 = vmatprep.subr.mxu1 %v1757_v15  ;;  %v694_v55 = vmul.f32 0.1, %v662_v48 }
 0x1c6   :  { %v585_v56 = vpop.f32.mrf.mxu1  ;;  %1442 = vmatprep.mubr.msk.f32.mxu1 %vm736_vm0, %v707_v54  ;;  %vm678_vm6 = vcmp.ge.f32.partialorder %v662_v48, 0.0  ;;  %1512 = vmatpush3.msra.mxu1 %v1757_v15  ;;  %v979_v54 = vld [vmem:[%s1989_s8 + $0x8] sm:$0xff] }
 0x1c7   :  { %v693_v59 = vmul.f32 0.1, %v661_v52  ;;  %v664_v60 = vadd.f32 %v1781_v20, %v641_v53  ;;  %v640_v61 = vadd.f32 %v585_v56, %v427_v51  ;;  %1443 = vmatmul.mubr.msk.f32.gmra.mxu1 %vm736_vm0, %v708_v57  ;;  %vm677_vm7 = vcmp.ge.f32.partialorder %v661_v52, 0.0  ;;  %1505 = vmatprep.subr.mxu1 %v1762_v16  ;;  %v980_v53 = vld [vmem:[%s1989_s8 + $0x10] sm:$0xff]  ;;  %v1883_v56 = vld [vmem:[%s1992_s7] ss:$0 sm:$0xff] }
 0x1c8   :  { %v1413_v62 = vpop.f32.mrf.mxu1  ;;  %1513 = vmatpush3.msra.mxu1 %v1762_v16  ;;  %v710_v5 = vsel %vm678_vm6, %v662_v48, %v694_v55  ;;  %v978_v55 = vld [vmem:[%s1989_s8] sm:$0xff] }
 0x1c9   :  { %v663_v0 = vadd.f32 %v1781_v20, %v640_v61  ;;  %v643_v1 = vadd.f32 %v1413_v62, %v430_v58  ;;  %v709_v2 = vsel %vm677_vm7, %v661_v52, %v693_v59  ;;  %1506 = vmatprep.subr.mxu1 %v1769_v17  ;;  %v696_v3 = vmul.f32 0.1, %v664_v60 }
 0x1ca   :  { %v595_v4 = vpop.f32.mrf.mxu1  ;;  %1445 = vmatprep.mubr.msk.f32.mxu1 %vm736_vm0, %v709_v2  ;;  %vm680_vm8 = vcmp.ge.f32.partialorder %v664_v60, 0.0  ;;  %1514 = vmatpush3.msra.mxu1 %v1769_v17  ;;  %v434_v17 = vld [vmem:[%s1990_s2 + $0x68] sm:$0xff] }
 0x1cb   :  { %v695_v7 = vmul.f32 0.1, %v663_v0  ;;  %v666_v8 = vadd.f32 %v1781_v20, %v643_v1  ;;  %v642_v9 = vadd.f32 %v595_v4, %v429_v63  ;;  %1446 = vmatmul.mubr.msk.f32.gmra.mxu1 %vm736_vm0, %v710_v5  ;;  %vm679_vm9 = vcmp.ge.f32.partialorder %v663_v0, 0.0 }
 0x1cc   :  { %v1416_v10 = vpop.f32.mrf.mxu1  ;;  %v712_v16 = vsel %vm680_vm8, %v664_v60, %v696_v3 }
 0x1cd   :  { %v665_v12 = vadd.f32 %v1781_v20, %v642_v9  ;;  %v645_v41 = vadd.f32 %v1416_v10, %v432_v6  ;;  %v711_v13 = vsel %vm679_vm9, %v663_v0, %v695_v7  ;;  %v698_v14 = vmul.f32 0.1, %v666_v8 }
 0x1ce   :  { %v605_v15 = vpop.f32.mrf.mxu1  ;;  %1448 = vmatprep.mubr.msk.f32.mxu1 %vm736_vm0, %v711_v13  ;;  %vm682_vm10 = vcmp.ge.f32.partialorder %v666_v8, 0.0 }
 0x1cf   :  { %v697_v18 = vmul.f32 0.1, %v665_v12  ;;  %v668_v19 = vadd.f32 %v1781_v20, %v645_v41  ;;  %v644_v22 = vadd.f32 %v605_v15, %v431_v11  ;;  %1449 = vmatmul.mubr.msk.f32.gmra.mxu1 %vm736_vm0, %v712_v16  ;;  %vm681_vm11 = vcmp.ge.f32.partialorder %v665_v12, 0.0 }
 0x1d0   :  { %v1419_v23 = vpop.f32.mrf.mxu1  ;;  %v714_v29 = vsel %vm682_vm10, %v666_v8, %v698_v14 }
 0x1d1   :  { %v667_v25 = vadd.f32 %v1781_v20, %v644_v22  ;;  %v647_v26 = vadd.f32 %v1419_v23, %v434_v17  ;;  %v713_v27 = vsel %vm681_vm11, %v665_v12, %v697_v18  ;;  %v700_v21 = vmul.f32 0.1, %v668_v19 }
 0x1d2   :  { %v615_v28 = vpop.f32.mrf.mxu1  ;;  %1451 = vmatprep.mubr.msk.f32.mxu1 %vm736_vm0, %v713_v27  ;;  %vm684_vm12 = vcmp.ge.f32.partialorder %v668_v19, 0.0 }
 0x1d3   :  { %v699_v31 = vmul.f32 0.1, %v667_v25  ;;  %v670_v32 = vadd.f32 %v1781_v20, %v647_v26  ;;  %v646_v33 = vadd.f32 %v615_v28, %v433_v24  ;;  %1452 = vmatmul.mubr.msk.f32.gmra.mxu1 %vm736_vm0, %v714_v29  ;;  %vm683_vm13 = vcmp.ge.f32.partialorder %v667_v25, 0.0 }
 0x1d4   :  { %v1422_v34 = vpop.f32.mrf.mxu1  ;;  %v716_v42 = vsel %vm684_vm12, %v668_v19, %v700_v21 }
 0x1d5   :  { %v669_v36 = vadd.f32 %v1781_v20, %v646_v33  ;;  %v649_v37 = vadd.f32 %v1422_v34, %v436_v30  ;;  %v715_v38 = vsel %vm683_vm13, %v667_v25, %v699_v31  ;;  %v702_v39 = vmul.f32 0.1, %v670_v32 }
 0x1d6   :  { %v625_v40 = vpop.f32.mrf.mxu1  ;;  %1454 = vmatprep.mubr.msk.f32.mxu1 %vm736_vm0, %v715_v38  ;;  %vm686_vm14 = vcmp.ge.f32.partialorder %v670_v32, 0.0 }
 0x1d7   :  { %v701_v43 = vmul.f32 0.1, %v669_v36  ;;  %v672_v44 = vadd.f32 %v1781_v20, %v649_v37  ;;  %v648_v45 = vadd.f32 %v625_v40, %v435_v35  ;;  %1455 = vmatmul.mubr.msk.f32.gmra.mxu1 %vm736_vm0, %v716_v42  ;;  %vm685_vm15 = vcmp.ge.f32.partialorder %v669_v36, 0.0 }
 0x1d8   :  { %v718_v49 = vsel %vm686_vm14, %v670_v32, %v702_v39 }
 0x1d9   :  { %v671_v46 = vadd.f32 %v1781_v20, %v648_v45  ;;  %v717_v47 = vsel %vm685_vm15, %v669_v36, %v701_v43  ;;  %v704_v48 = vmul.f32 0.1, %v672_v44  ;;  %vm688_vm2 = vcmp.ge.f32.partialorder %v672_v44, 0.0  ;;  %v981_v20 = vld [vmem:[%s1989_s8 + $0x18] sm:$0xff] }
 0x1da   :  { %1457 = vmatprep.mubr.msk.f32.mxu1 %vm736_vm0, %v717_v47  ;;  %1471 = vmatprep.subr.mxu0 %v981_v20 }
 0x1db   :  { %v703_v50 = vmul.f32 0.1, %v671_v46  ;;  %1458 = vmatmul.mubr.msk.f32.gmra.mxu1 %vm736_vm0, %v718_v49  ;;  %vm687_vm1 = vcmp.ge.f32.partialorder %v671_v46, 0.0  ;;  %v720_v52 = vsel %vm688_vm2, %v672_v44, %v704_v48  ;;  %1507 = vmatprep.subr.mxu1 %v981_v20 }
 0x1dc   :  { %1472 = vmatpush3.msra.mxu0 %v981_v20  ;;  %1515 = vmatpush3.msra.mxu1 %v981_v20 }
 0x1dd   :  { %v719_v51 = vsel %vm687_vm1, %v671_v46, %v703_v50  ;;  %1473 = vmatprep.subr.mxu0 %v980_v53  ;;  %1508 = vmatprep.subr.mxu1 %v980_v53 }
 0x1de   :  { %1460 = vmatprep.mubr.msk.f32.mxu1 %vm736_vm0, %v719_v51  ;;  %1474 = vmatpush3.msra.mxu0 %v980_v53 }
 0x1df   :  { %1461 = vmatmul.mubr.msk.f32.gmra.mxu1 %vm736_vm0, %v720_v52  ;;  %1475 = vmatprep.subr.mxu0 %v979_v54 }
 0x1e0   :  { %1516 = vmatpush3.msra.mxu1 %v980_v53  ;;  %1476 = vmatpush3.msra.mxu0 %v979_v54 }
 0x1e1   :  { %1509 = vmatprep.subr.mxu1 %v979_v54  ;;  %1477 = vmatprep.subr.mxu0 %v978_v55 }
 0x1e2   :  { %1517 = vmatpush3.msra.mxu1 %v979_v54  ;;  %1478 = vmatpush3.msra.mxu0 %v978_v55 }
 0x1e3   :  { %1510 = vmatprep.subr.mxu1 %v978_v55 }
 0x1e4   :  { %1518 = vmatpush3.msra.mxu1 %v978_v55 }
 0x283   :  { %v1441_v57 = vpop.f32.mrf.mxu1 }
 0x284   :  { %v857_v58 = vadd.f32 %v1441_v57, %v1883_v56 }
 0x285   :  { %v851_v59 = vpop.f32.mrf.mxu1 }
 0x286   :  { %v852_v60 = vadd.f32 %v1883_v56, %v851_v59  ;;  %v947_v61 = vmul.f32 0.1, %v857_v58  ;;  %vm931_vm3 = vcmp.ge.f32.partialorder %v857_v58, 0.0 }
 0x287   :  { %v1444_v62 = vpop.f32.mrf.mxu1 }
 0x288   :  { %vm930_vm4 = vcmp.ge.f32.partialorder %v852_v60, 0.0  ;;  %v946_v63 = vmul.f32 0.1, %v852_v60  ;;  %v867_v0 = vadd.f32 %v1444_v62, %v1883_v56  ;;  %v963_v4 = vsel %vm931_vm3, %v857_v58, %v947_v61 }
 0x289   :  { %v861_v1 = vpop.f32.mrf.mxu1 }
 0x28a   :  { %v862_v2 = vadd.f32 %v1883_v56, %v861_v1  ;;  %v962_v3 = vsel %vm930_vm4, %v852_v60, %v946_v63  ;;  %v949_v5 = vmul.f32 0.1, %v867_v0  ;;  %vm933_vm5 = vcmp.ge.f32.partialorder %v867_v0, 0.0 }
 0x28b   :  { %v1447_v6 = vpop.f32.mrf.mxu1  ;;  %1479 = vmatprep.mubr.msk.f32.mxu0 %vm736_vm0, %v962_v3  ;;  %vm1186_vm4 = vcmask 31744  }
 0x28c   :  { %vm932_vm6 = vcmp.ge.f32.partialorder %v862_v2, 0.0  ;;  %v948_v7 = vmul.f32 0.1, %v862_v2  ;;  %v877_v8 = vadd.f32 %v1447_v6, %v1883_v56  ;;  %1480 = vmatmul.mubr.msk.f32.vlgmr.msra.gmra.mxu0 %vm736_vm0, %v963_v4  ;;  %v965_v13 = vsel %vm933_vm5, %v867_v0, %v949_v5 }
 0x28d   :  { %v871_v9 = vpop.f32.mrf.mxu1 }
 0x28e   :  { %v872_v10 = vadd.f32 %v1883_v56, %v871_v9  ;;  %v964_v11 = vsel %vm932_vm6, %v862_v2, %v948_v7  ;;  %v951_v12 = vmul.f32 0.1, %v877_v8  ;;  %vm935_vm7 = vcmp.ge.f32.partialorder %v877_v8, 0.0 }
 0x28f   :  { %v1450_v41 = vpop.f32.mrf.mxu1  ;;  %1482 = vmatprep.mubr.msk.f32.mxu0 %vm736_vm0, %v964_v11 }
 0x290   :  { %vm934_vm8 = vcmp.ge.f32.partialorder %v872_v10, 0.0  ;;  %v950_v14 = vmul.f32 0.1, %v872_v10  ;;  %v887_v15 = vadd.f32 %v1450_v41, %v1883_v56  ;;  %1483 = vmatmul.mubr.msk.f32.gmra.mxu0 %vm736_vm0, %v965_v13  ;;  %v967_v23 = vsel %vm935_vm7, %v877_v8, %v951_v12 }
 0x291   :  { %v881_v16 = vpop.f32.mrf.mxu1 }
 0x292   :  { %v882_v17 = vadd.f32 %v1883_v56, %v881_v16  ;;  %v966_v18 = vsel %vm934_vm8, %v872_v10, %v950_v14  ;;  %v953_v19 = vmul.f32 0.1, %v887_v15  ;;  %vm937_vm9 = vcmp.ge.f32.partialorder %v887_v15, 0.0 }
 0x293   :  { %v1453_v22 = vpop.f32.mrf.mxu1  ;;  %1485 = vmatprep.mubr.msk.f32.mxu0 %vm736_vm0, %v966_v18 }
 0x294   :  { %vm936_vm10 = vcmp.ge.f32.partialorder %v882_v17, 0.0  ;;  %v952_v24 = vmul.f32 0.1, %v882_v17  ;;  %v897_v25 = vadd.f32 %v1453_v22, %v1883_v56  ;;  %1486 = vmatmul.mubr.msk.f32.gmra.mxu0 %vm736_vm0, %v967_v23  ;;  %v969_v30 = vsel %vm937_vm9, %v887_v15, %v953_v19 }
 0x295   :  { %v891_v26 = vpop.f32.mrf.mxu1 }
 0x296   :  { %v892_v27 = vadd.f32 %v1883_v56, %v891_v26  ;;  %v968_v21 = vsel %vm936_vm10, %v882_v17, %v952_v24  ;;  %v955_v28 = vmul.f32 0.1, %v897_v25  ;;  %vm939_vm11 = vcmp.ge.f32.partialorder %v897_v25, 0.0 }
 0x297   :  { %v1456_v29 = vpop.f32.mrf.mxu1  ;;  %1488 = vmatprep.mubr.msk.f32.mxu0 %vm736_vm0, %v968_v21 }
 0x298   :  { %vm938_vm12 = vcmp.ge.f32.partialorder %v892_v27, 0.0  ;;  %v954_v31 = vmul.f32 0.1, %v892_v27  ;;  %v907_v32 = vadd.f32 %v1456_v29, %v1883_v56  ;;  %1489 = vmatmul.mubr.msk.f32.gmra.mxu0 %vm736_vm0, %v969_v30  ;;  %v971_v38 = vsel %vm939_vm11, %v897_v25, %v955_v28 }
 0x299   :  { %v901_v33 = vpop.f32.mrf.mxu1 }
 0x29a   :  { %v902_v34 = vadd.f32 %v1883_v56, %v901_v33  ;;  %v970_v35 = vsel %vm938_vm12, %v892_v27, %v954_v31  ;;  %v957_v36 = vmul.f32 0.1, %v907_v32  ;;  %vm941_vm13 = vcmp.ge.f32.partialorder %v907_v32, 0.0 }
 0x29b   :  { %v1459_v37 = vpop.f32.mrf.mxu1  ;;  %1491 = vmatprep.mubr.msk.f32.mxu0 %vm736_vm0, %v970_v35 }
 0x29c   :  { %vm940_vm14 = vcmp.ge.f32.partialorder %v902_v34, 0.0  ;;  %v956_v39 = vmul.f32 0.1, %v902_v34  ;;  %v917_v40 = vadd.f32 %v1459_v37, %v1883_v56  ;;  %1492 = vmatmul.mubr.msk.f32.gmra.mxu0 %vm736_vm0, %v971_v38  ;;  %v973_v45 = vsel %vm941_vm13, %v907_v32, %v957_v36 }
 0x29d   :  { %v911_v42 = vpop.f32.mrf.mxu1 }
 0x29e   :  { %v912_v43 = vadd.f32 %v1883_v56, %v911_v42  ;;  %v972_v44 = vsel %vm940_vm14, %v902_v34, %v956_v39  ;;  %v959_v46 = vmul.f32 0.1, %v917_v40  ;;  %vm943_vm15 = vcmp.ge.f32.partialorder %v917_v40, 0.0 }
 0x29f   :  { %v1462_v47 = vpop.f32.mrf.mxu1  ;;  %1494 = vmatprep.mubr.msk.f32.mxu1 %vm736_vm0, %v972_v44 }
 0x2a0   :  { %vm942_vm1 = vcmp.ge.f32.partialorder %v912_v43, 0.0  ;;  %v958_v48 = vmul.f32 0.1, %v912_v43  ;;  %v927_v49 = vadd.f32 %v1462_v47, %v1883_v56  ;;  %1495 = vmatmul.mubr.msk.f32.vlgmr.msra.gmra.mxu1 %vm736_vm0, %v973_v45  ;;  %v975_v53 = vsel %vm943_vm15, %v917_v40, %v959_v46 }
 0x2a1   :  { %v921_v50 = vpop.f32.mrf.mxu1 }
 0x2a2   :  { %v922_v51 = vadd.f32 %v1883_v56, %v921_v50  ;;  %v974_v52 = vsel %vm942_vm1, %v912_v43, %v958_v48  ;;  %v961_v20 = vmul.f32 0.1, %v927_v49  ;;  %vm945_vm2 = vcmp.ge.f32.partialorder %v927_v49, 0.0  ;;  %v1258_v56 = vld [vmem:[%s1993_s9] ss:$0 sm:$0xff] }
 0x2a3   :  { %1497 = vmatprep.mubr.msk.f32.mxu1 %vm736_vm0, %v974_v52 }
 0x2a4   :  { %vm944_vm3 = vcmp.ge.f32.partialorder %v922_v51, 0.0  ;;  %v960_v54 = vmul.f32 0.1, %v922_v51  ;;  %1498 = vmatmul.mubr.msk.f32.gmra.mxu1 %vm736_vm0, %v975_v53  ;;  %v977_v57 = vsel %vm945_vm2, %v927_v49, %v961_v20 }
 0x2a6   :  { %v976_v55 = vsel %vm944_vm3, %v922_v51, %v960_v54 }
 0x2a7   :  { %1500 = vmatprep.mubr.msk.f32.mxu1 %vm736_vm0, %v976_v55 }
 0x2a8   :  { %1501 = vmatmul.mubr.msk.f32.gmra.mxu1 %vm736_vm0, %v977_v57 }
 0x34c   :  { %v1481_v58 = vpop.f32.mrf.mxu0 }
 0x34d   :  { %v1113_v59 = vadd.f32 %v1481_v58, %v1258_v56 }
 0x34e   :  { %v1107_v60 = vpop.f32.mrf.mxu0 }
 0x34f   :  { %1188 = vst.msk [vmem:[%s1994_s10 + $0x8] sm:$0xff] %vm1186_vm4, %v1113_v59  ;;  %v1108_v61 = vadd.f32 %v1258_v56, %v1107_v60 }
 0x350   :  { %v1484_v62 = vpop.f32.mrf.mxu0 }
 0x351   :  { %1187 = vst.msk [vmem:[%s1994_s10] sm:$0xff] %vm1186_vm4, %v1108_v61  ;;  %v1123_v63 = vadd.f32 %v1484_v62, %v1258_v56 }
 0x352   :  { %v1117_v0 = vpop.f32.mrf.mxu0 }
 0x353   :  { %1190 = vst.msk [vmem:[%s1994_s10 + $0x18] sm:$0xff] %vm1186_vm4, %v1123_v63  ;;  %v1118_v1 = vadd.f32 %v1258_v56, %v1117_v0 }
 0x354   :  { %v1487_v2 = vpop.f32.mrf.mxu0 }
 0x355   :  { %1189 = vst.msk [vmem:[%s1994_s10 + $0x10] sm:$0xff] %vm1186_vm4, %v1118_v1  ;;  %v1133_v3 = vadd.f32 %v1487_v2, %v1258_v56 }
 0x356   :  { %v1127_v4 = vpop.f32.mrf.mxu0 }
 0x357   :  { %1192 = vst.msk [vmem:[%s1994_s10 + $0x28] sm:$0xff] %vm1186_vm4, %v1133_v3  ;;  %v1128_v5 = vadd.f32 %v1258_v56, %v1127_v4 }
 0x358   :  { %v1490_v6 = vpop.f32.mrf.mxu0 }
 0x359   :  { %1191 = vst.msk [vmem:[%s1994_s10 + $0x20] sm:$0xff] %vm1186_vm4, %v1128_v5  ;;  %v1143_v7 = vadd.f32 %v1490_v6, %v1258_v56 }
 0x35a   :  { %v1137_v8 = vpop.f32.mrf.mxu0 }
 0x35b   :  { %1194 = vst.msk [vmem:[%s1994_s10 + $0x38] sm:$0xff] %vm1186_vm4, %v1143_v7  ;;  %v1138_v9 = vadd.f32 %v1258_v56, %v1137_v8 }
 0x35c   :  { %v1493_v10 = vpop.f32.mrf.mxu0 }
 0x35d   :  { %1193 = vst.msk [vmem:[%s1994_s10 + $0x30] sm:$0xff] %vm1186_vm4, %v1138_v9  ;;  %v1153_v11 = vadd.f32 %v1493_v10, %v1258_v56 }
 0x35e   :  { %v1147_v12 = vpop.f32.mrf.mxu0 }
 0x35f   :  { %1196 = vst.msk [vmem:[%s1994_s10 + $0x48] sm:$0xff] %vm1186_vm4, %v1153_v11  ;;  %v1148_v41 = vadd.f32 %v1258_v56, %v1147_v12 }
 0x360   :  { %v1496_v13 = vpop.f32.mrf.mxu1 }
 0x361   :  { %1195 = vst.msk [vmem:[%s1994_s10 + $0x40] sm:$0xff] %vm1186_vm4, %v1148_v41  ;;  %v1163_v14 = vadd.f32 %v1496_v13, %v1258_v56 }
 0x362   :  { %v1157_v15 = vpop.f32.mrf.mxu1 }
 0x363   :  { %1198 = vst.msk [vmem:[%s1994_s10 + $0x58] sm:$0xff] %vm1186_vm4, %v1163_v14  ;;  %v1158_v16 = vadd.f32 %v1258_v56, %v1157_v15 }
 0x364   :  { %v1499_v17 = vpop.f32.mrf.mxu1 }
 0x365   :  { %1197 = vst.msk [vmem:[%s1994_s10 + $0x50] sm:$0xff] %vm1186_vm4, %v1158_v16  ;;  %v1173_v18 = vadd.f32 %v1499_v17, %v1258_v56 }
 0x366   :  { %v1167_v19 = vpop.f32.mrf.mxu1 }
 0x367   :  { %1200 = vst.msk [vmem:[%s1994_s10 + $0x68] sm:$0xff] %vm1186_vm4, %v1173_v18  ;;  %v1168_v22 = vadd.f32 %v1258_v56, %v1167_v19 }
 0x368   :  { %v1502_v23 = vpop.f32.mrf.mxu1 }
 0x369   :  { %1199 = vst.msk [vmem:[%s1994_s10 + $0x60] sm:$0xff] %vm1186_vm4, %v1168_v22  ;;  %v1183_v24 = vadd.f32 %v1502_v23, %v1258_v56 }
 0x36a   :  { %v1177_v25 = vpop.f32.mrf.mxu1 }
 0x36b   :  { %1202 = vst.msk [vmem:[%s1994_s10 + $0x78] sm:$0xff] %vm1186_vm4, %v1183_v24  ;;  %v1178_v26 = vadd.f32 %v1258_v56, %v1177_v25 }
 0x36d   :  { %1201 = vst.msk [vmem:[%s1994_s10 + $0x70] sm:$0xff] %vm1186_vm4, %v1178_v26 }

// kernel: mpnn_forward.3
= control target key start
LH: loop header
LB: loop body
LE: loop exit
PB: predicated region body
PF: predicated region fallthrough
CT: control target
= control target key end

     0   :  { %vm601_vm0 = vcmask 785408   ;;  %s2617_s1 = inlined_call_operand.vmem [shape: f32[256,128], index: 1, kind: input, shape index: {}]   ;;  %s2618_s0 = inlined_call_operand.vmem [shape: f32[128,736], index: 0, kind: input, shape index: {}]   ;;  %s2619_s5 = inlined_call_operand.vmem [shape: f32[128,64], index: 5, kind: input, shape index: {}]   ;;  %s2620_s3 = inlined_call_operand.vmem [shape: f32[480,64], index: 3, kind: input, shape index: {}]   ;;  %s2621_s2 = inlined_call_operand.vmem [shape: f32[1,128], index: 2, kind: input, shape index: {}]   ;;  %s2622_s6 = inlined_call_operand.vmem [shape: f32[64,32], index: 6, kind: input, shape index: {}]   ;;  %s2623_s7 = inlined_call_operand.vmem [shape: f32[128,64], index: 7, kind: output, shape index: {0}]   ;;  %s2624_s4 = inlined_call_operand.vmem [shape: f32[1,64], index: 4, kind: input, shape index: {}]   ;;  %s2625_s8 = inlined_call_operand.vmem [shape: bf16[128,32], index: 8, kind: output, shape index: {1}]  }
   0x1   :  { %v91_v0 = vld [vmem:[%s2617_s1 + $0xf8] sm:$0xff]  ;;  %v90_v2 = vld [vmem:[%s2617_s1 + $0xf0] sm:$0xff]  ;;  %v89_v4 = vld [vmem:[%s2617_s1 + $0xe8] sm:$0xff] }
   0x2   :  { %v75_v1 = vld [vmem:[%s2617_s1 + $0x78] sm:$0xff]  ;;  %1344 = vmatprep.subr.mxu0 %v91_v0  ;;  %v74_v3 = vld [vmem:[%s2617_s1 + $0x70] sm:$0xff]  ;;  %v73_v5 = vld [vmem:[%s2617_s1 + $0x68] sm:$0xff] }
   0x3   :  { %1345 = vmatpush3.msra.mxu0 %v75_v1  ;;  %v88_v6 = vld [vmem:[%s2617_s1 + $0xe0] sm:$0xff]  ;;  %v87_v8 = vld [vmem:[%s2617_s1 + $0xd8] sm:$0xff]  ;;  %v86_v10 = vld [vmem:[%s2617_s1 + $0xd0] sm:$0xff] }
   0x4   :  { %1346 = vmatprep.subr.mxu0 %v90_v2  ;;  %v72_v7 = vld [vmem:[%s2617_s1 + $0x60] sm:$0xff]  ;;  %v71_v9 = vld [vmem:[%s2617_s1 + $0x58] sm:$0xff]  ;;  %v70_v11 = vld [vmem:[%s2617_s1 + $0x50] sm:$0xff] }
   0x5   :  { %1347 = vmatpush3.msra.mxu0 %v74_v3  ;;  %v85_v12 = vld [vmem:[%s2617_s1 + $0xc8] sm:$0xff]  ;;  %v84_v15 = vld [vmem:[%s2617_s1 + $0xc0] sm:$0xff]  ;;  %v83_v17 = vld [vmem:[%s2617_s1 + $0xb8] sm:$0xff] }
   0x6   :  { %1348 = vmatprep.subr.mxu0 %v89_v4  ;;  %v29_v13 = vld [vmem:[%s2618_s0 + $0x8] sm:$0xff]  ;;  %v68_v16 = vld [vmem:[%s2617_s1 + $0x40] sm:$0xff]  ;;  %v67_v18 = vld [vmem:[%s2617_s1 + $0x38] sm:$0xff] }
   0x7   :  { %1349 = vmatpush3.msra.mxu0 %v73_v5  ;;  %v69_v14 = vld [vmem:[%s2617_s1 + $0x48] sm:$0xff]  ;;  %163 = vmatprep.mubr.f32.mxu0 %v29_v13  ;;  %v82_v19 = vld [vmem:[%s2617_s1 + $0xb0] sm:$0xff]  ;;  %v80_v23 = vld [vmem:[%s2617_s1 + $0xa0] sm:$0xff] }
   0x8   :  { %1350 = vmatprep.subr.mxu0 %v88_v6  ;;  %v66_v20 = vld [vmem:[%s2617_s1 + $0x30] sm:$0xff]  ;;  %v81_v21 = vld [vmem:[%s2617_s1 + $0xa8] sm:$0xff]  ;;  %v64_v24 = vld [vmem:[%s2617_s1 + $0x20] sm:$0xff] }
   0x9   :  { %1351 = vmatpush3.msra.mxu0 %v72_v7  ;;  %v65_v22 = vld [vmem:[%s2617_s1 + $0x28] sm:$0xff]  ;;  %v307_v25 = vld [vmem:[%s2619_s5 + $0x78] sm:$0xff]  ;;  %v306_v26 = vld [vmem:[%s2619_s5 + $0x70] sm:$0xff] }
   0xa   :  { %1352 = vmatprep.subr.mxu0 %v87_v8  ;;  %v79_v27 = vld [vmem:[%s2617_s1 + $0x98] sm:$0xff]  ;;  %1560 = vmatprep.subr.mxu1 %v307_v25  ;;  %v305_v29 = vld [vmem:[%s2619_s5 + $0x68] sm:$0xff]  ;;  %v78_v30 = vld [vmem:[%s2617_s1 + $0x90] sm:$0xff] }
   0xb   :  { %1353 = vmatpush3.msra.mxu0 %v71_v9  ;;  %v63_v28 = vld [vmem:[%s2617_s1 + $0x18] sm:$0xff]  ;;  %1561 = vmatpush3.msra.mxu1 %v307_v25  ;;  %v62_v31 = vld [vmem:[%s2617_s1 + $0x10] sm:$0xff]  ;;  %v304_v32 = vld [vmem:[%s2619_s5 + $0x60] sm:$0xff] }
   0xc   :  { %1354 = vmatprep.subr.mxu0 %v86_v10  ;;  %1562 = vmatprep.subr.mxu1 %v306_v26  ;;  %v77_v33 = vld [vmem:[%s2617_s1 + $0x88] sm:$0xff]  ;;  %v303_v35 = vld [vmem:[%s2619_s5 + $0x58] sm:$0xff]  ;;  %v76_v36 = vld [vmem:[%s2617_s1 + $0x80] sm:$0xff] }
   0xd   :  { %1355 = vmatpush3.msra.mxu0 %v70_v11  ;;  %1563 = vmatpush3.msra.mxu1 %v306_v26  ;;  %v61_v34 = vld [vmem:[%s2617_s1 + $0x8] sm:$0xff]  ;;  %v60_v37 = vld [vmem:[%s2617_s1] sm:$0xff]  ;;  %v302_v38 = vld [vmem:[%s2619_s5 + $0x50] sm:$0xff] }
   0xe   :  { %1356 = vmatprep.subr.mxu0 %v85_v12  ;;  %1564 = vmatprep.subr.mxu1 %v305_v29  ;;  %v28_v39 = vld [vmem:[%s2618_s0] sm:$0xff]  ;;  %v31_v40 = vld [vmem:[%s2618_s0 + $0x38] sm:$0xff]  ;;  %v301_v41 = vld [vmem:[%s2619_s5 + $0x48] sm:$0xff] }
   0xf   :  { %1357 = vmatpush3.msra.mxu0 %v69_v14  ;;  %1565 = vmatpush3.msra.mxu1 %v305_v29  ;;  %v300_v42 = vld [vmem:[%s2619_s5 + $0x40] sm:$0xff]  ;;  %v30_v43 = vld [vmem:[%s2618_s0 + $0x30] sm:$0xff]  ;;  %v33_v44 = vld [vmem:[%s2618_s0 + $0x68] sm:$0xff] }
  0x10   :  { %1358 = vmatprep.subr.mxu0 %v84_v15  ;;  %1566 = vmatprep.subr.mxu1 %v304_v32  ;;  %v299_v45 = vld [vmem:[%s2619_s5 + $0x38] sm:$0xff]  ;;  %v32_v46 = vld [vmem:[%s2618_s0 + $0x60] sm:$0xff]  ;;  %v34_v48 = vld [vmem:[%s2618_s0 + $0x90] sm:$0xff] }
  0x11   :  { %1359 = vmatpush3.msra.mxu0 %v68_v16  ;;  %1567 = vmatpush3.msra.mxu1 %v304_v32  ;;  %v35_v47 = vld [vmem:[%s2618_s0 + $0x98] sm:$0xff]  ;;  %v37_v49 = vld [vmem:[%s2618_s0 + $0xc8] sm:$0xff]  ;;  %v36_v50 = vld [vmem:[%s2618_s0 + $0xc0] sm:$0xff]  ;;  %v1657_v16 = vmov 0.0  }
  0x12   :  { %1360 = vmatprep.subr.mxu0 %v83_v17  ;;  %1568 = vmatprep.subr.mxu1 %v303_v35  ;;  %v39_v51 = vld [vmem:[%s2618_s0 + $0xf8] sm:$0xff]  ;;  %v38_v52 = vld [vmem:[%s2618_s0 + $0xf0] sm:$0xff]  ;;  %v41_v53 = vld [vmem:[%s2618_s0 + $0x128] sm:$0xff] }
  0x13   :  { %1361 = vmatpush3.msra.mxu0 %v67_v18  ;;  %1569 = vmatpush3.msra.mxu1 %v303_v35  ;;  %v40_v54 = vld [vmem:[%s2618_s0 + $0x120] sm:$0xff]  ;;  %v43_v55 = vld [vmem:[%s2618_s0 + $0x158] sm:$0xff]  ;;  %v42_v56 = vld [vmem:[%s2618_s0 + $0x150] sm:$0xff] }
  0x14   :  { %1362 = vmatprep.subr.mxu0 %v82_v19  ;;  %1570 = vmatprep.subr.mxu1 %v302_v38  ;;  %v45_v57 = vld [vmem:[%s2618_s0 + $0x188] sm:$0xff]  ;;  %v44_v58 = vld [vmem:[%s2618_s0 + $0x180] sm:$0xff]  ;;  %v47_v59 = vld [vmem:[%s2618_s0 + $0x1b8] sm:$0xff] }
  0x15   :  { %1363 = vmatpush3.msra.mxu0 %v66_v20  ;;  %1571 = vmatpush3.msra.mxu1 %v302_v38  ;;  %v46_v60 = vld [vmem:[%s2618_s0 + $0x1b0] sm:$0xff]  ;;  %v49_v61 = vld [vmem:[%s2618_s0 + $0x1e8] sm:$0xff]  ;;  %v48_v62 = vld [vmem:[%s2618_s0 + $0x1e0] sm:$0xff] }
  0x16   :  { %1364 = vmatprep.subr.mxu0 %v81_v21  ;;  %1572 = vmatprep.subr.mxu1 %v301_v41  ;;  %v51_v63 = vld [vmem:[%s2618_s0 + $0x218] sm:$0xff]  ;;  %v50_v0 = vld [vmem:[%s2618_s0 + $0x210] sm:$0xff]  ;;  %v53_v1 = vld [vmem:[%s2618_s0 + $0x248] sm:$0xff] }
  0x17   :  { %1365 = vmatpush3.msra.mxu0 %v65_v22  ;;  %1573 = vmatpush3.msra.mxu1 %v301_v41  ;;  %v52_v2 = vld [vmem:[%s2618_s0 + $0x240] sm:$0xff]  ;;  %v55_v3 = vld [vmem:[%s2618_s0 + $0x278] sm:$0xff]  ;;  %v54_v4 = vld [vmem:[%s2618_s0 + $0x270] sm:$0xff] }
  0x18   :  { %1366 = vmatprep.subr.mxu0 %v80_v23  ;;  %1574 = vmatprep.subr.mxu1 %v300_v42  ;;  %v57_v5 = vld [vmem:[%s2618_s0 + $0x2a8] sm:$0xff]  ;;  %v56_v6 = vld [vmem:[%s2618_s0 + $0x2a0] sm:$0xff]  ;;  %v59_v7 = vld [vmem:[%s2618_s0 + $0x2d8] sm:$0xff] }
  0x19   :  { %1367 = vmatpush3.msra.mxu0 %v64_v24  ;;  %1575 = vmatpush3.msra.mxu1 %v300_v42  ;;  %v58_v8 = vld [vmem:[%s2618_s0 + $0x2d0] sm:$0xff]  ;;  %v297_v10 = vld [vmem:[%s2619_s5 + $0x28] sm:$0xff]  ;;  %v296_v11 = vld [vmem:[%s2619_s5 + $0x20] sm:$0xff] }
  0x1a   :  { %1368 = vmatprep.subr.mxu0 %v79_v27  ;;  %1576 = vmatprep.subr.mxu1 %v299_v45  ;;  %v298_v9 = vld [vmem:[%s2619_s5 + $0x30] sm:$0xff]  ;;  %v295_v12 = vld [vmem:[%s2619_s5 + $0x18] sm:$0xff]  ;;  %v293_v14 = vld [vmem:[%s2619_s5 + $0x8] sm:$0xff] }
  0x1b   :  { %1369 = vmatpush3.msra.mxu0 %v63_v28  ;;  %1577 = vmatpush3.msra.mxu1 %v299_v45  ;;  %v294_v13 = vld [vmem:[%s2619_s5 + $0x10] sm:$0xff]  ;;  %v292_v15 = vld [vmem:[%s2619_s5] sm:$0xff]  ;;  %v581_v17 = vld [vmem:[%s2620_s3 + $0x178] sm:$0xff] }
  0x1c   :  { %1370 = vmatprep.subr.mxu0 %v78_v30  ;;  %1578 = vmatprep.subr.mxu1 %v298_v9  ;;  %v580_v18 = vld [vmem:[%s2620_s3 + $0x170] sm:$0xff]  ;;  %v579_v19 = vld [vmem:[%s2620_s3 + $0x168] sm:$0xff]  ;;  %v578_v20 = vld [vmem:[%s2620_s3 + $0x160] sm:$0xff] }
  0x1d   :  { %1371 = vmatpush3.msra.mxu0 %v62_v31  ;;  %1579 = vmatpush3.msra.mxu1 %v298_v9  ;;  %v577_v21 = vld [vmem:[%s2620_s3 + $0x158] sm:$0xff]  ;;  %v576_v22 = vld [vmem:[%s2620_s3 + $0x150] sm:$0xff]  ;;  %v575_v23 = vld [vmem:[%s2620_s3 + $0x148] sm:$0xff] }
  0x1e   :  { %1372 = vmatprep.subr.mxu0 %v77_v33  ;;  %1580 = vmatprep.subr.mxu1 %v297_v10  ;;  %v574_v24 = vld [vmem:[%s2620_s3 + $0x140] sm:$0xff]  ;;  %v573_v25 = vld [vmem:[%s2620_s3 + $0x138] sm:$0xff]  ;;  %v572_v26 = vld [vmem:[%s2620_s3 + $0x130] sm:$0xff] }
  0x1f   :  { %1373 = vmatpush3.msra.mxu0 %v61_v34  ;;  %1581 = vmatpush3.msra.mxu1 %v297_v10  ;;  %v571_v27 = vld [vmem:[%s2620_s3 + $0x128] sm:$0xff]  ;;  %v565_v28 = vld [vmem:[%s2620_s3 + $0xf8] sm:$0xff]  ;;  %v570_v29 = vld [vmem:[%s2620_s3 + $0x120] sm:$0xff] }
  0x20   :  { %1374 = vmatprep.subr.mxu0 %v76_v36  ;;  %1582 = vmatprep.subr.mxu1 %v296_v11  ;;  %v569_v30 = vld [vmem:[%s2620_s3 + $0x118] sm:$0xff]  ;;  %v568_v31 = vld [vmem:[%s2620_s3 + $0x110] sm:$0xff]  ;;  %v567_v32 = vld [vmem:[%s2620_s3 + $0x108] sm:$0xff] }
  0x21   :  { %1375 = vmatpush3.msra.mxu0 %v60_v37  ;;  %1583 = vmatpush3.msra.mxu1 %v296_v11  ;;  %v566_v33 = vld [vmem:[%s2620_s3 + $0x100] sm:$0xff]  ;;  %v593_v34 = vld [vmem:[%s2620_s3 + $0x1d8] sm:$0xff]  ;;  %v592_v35 = vld [vmem:[%s2620_s3 + $0x1d0] sm:$0xff] }
  0x22   :  { %164 = vmatmul.mubr.f32.vlgmr.msra.gmra.mxu0 %v28_v39  ;;  %1584 = vmatprep.subr.mxu1 %v295_v12  ;;  %v591_v36 = vld [vmem:[%s2620_s3 + $0x1c8] sm:$0xff]  ;;  %v590_v37 = vld [vmem:[%s2620_s3 + $0x1c0] sm:$0xff]  ;;  %v589_v38 = vld [vmem:[%s2620_s3 + $0x1b8] sm:$0xff] }
  0x23   :  { %168 = vmatprep.mubr.f32.mxu0 %v31_v40  ;;  %1585 = vmatpush3.msra.mxu1 %v295_v12  ;;  %v588_v39 = vld [vmem:[%s2620_s3 + $0x1b0] sm:$0xff]  ;;  %v587_v40 = vld [vmem:[%s2620_s3 + $0x1a8] sm:$0xff]  ;;  %v586_v41 = vld [vmem:[%s2620_s3 + $0x1a0] sm:$0xff] }
  0x24   :  { %1586 = vmatprep.subr.mxu1 %v294_v13  ;;  %795 = vmatprep.subr.mxu0 %v1657_v16  ;;  %v585_v42 = vld [vmem:[%s2620_s3 + $0x198] sm:$0xff]  ;;  %v582_v45 = vld [vmem:[%s2620_s3 + $0x180] sm:$0xff]  ;;  %v524_v10 = vld [vmem:[%s2618_s0 + $0x290] sm:$0xff] }
  0x25   :  { %1587 = vmatpush3.msra.mxu1 %v294_v13  ;;  %796 = vmatpush1.msra.mxu0 %v581_v17  ;;  %v2159_v11 = vld [vmem:[%s2621_s2] ss:$0 sm:$0xff] }
  0x26   :  { %169 = vmatmul.mubr.f32.gmra.mxu0 %v30_v43  ;;  %1588 = vmatprep.subr.mxu1 %v293_v14  ;;  %v584_v43 = vld [vmem:[%s2620_s3 + $0x190] sm:$0xff]  ;;  %v528_v17 = vld [vmem:[%s2618_s0 + $0x2c0] sm:$0xff] }
  0x27   :  { %173 = vmatprep.mubr.f32.mxu0 %v33_v44  ;;  %1589 = vmatpush3.msra.mxu1 %v293_v14  ;;  %v583_v44 = vld [vmem:[%s2620_s3 + $0x188] sm:$0xff] }
  0x28   :  { %1590 = vmatprep.subr.mxu1 %v292_v15  ;;  %797 = vmatprep.subr.mxu0 %v1657_v16  ;;  %v529_v14 = vld [vmem:[%s2618_s0 + $0x2c8] sm:$0xff] }
  0x29   :  { %1591 = vmatpush3.msra.mxu1 %v292_v15  ;;  %798 = vmatpush1.msra.mxu0 %v580_v18 }
  0x2a   :  { %174 = vmatmul.mubr.f32.gmra.mxu0 %v32_v46  ;;  %799 = vmatprep.subr.mxu0 %v1657_v16  ;;  %v473_v46 = vld [vmem:[%s2618_s0 + $0x28] sm:$0xff] }
  0x2b   :  { %178 = vmatprep.mubr.f32.mxu0 %v35_v47  ;;  %800 = vmatpush1.msra.mxu0 %v579_v19  ;;  %v472_v47 = vld [vmem:[%s2618_s0 + $0x20] sm:$0xff]  ;;  %v533_v19 = vld [vmem:[%s2618_s0 + $0x2f8] sm:$0xff] }
  0x2c   :  { %801 = vmatprep.subr.mxu0 %v1657_v16  ;;  %1456 = vmatprep.subr.mxu1 %v565_v28 }
  0x2d   :  { %802 = vmatpush1.msra.mxu0 %v578_v20 }
  0x2e   :  { %179 = vmatmul.mubr.f32.gmra.mxu0 %v34_v48  ;;  %803 = vmatprep.subr.mxu0 %v1657_v16  ;;  %v477_v48 = vld [vmem:[%s2618_s0 + $0x58] sm:$0xff] }
  0x2f   :  { %183 = vmatprep.mubr.f32.mxu0 %v37_v49  ;;  %804 = vmatpush1.msra.mxu0 %v577_v21  ;;  %v476_v49 = vld [vmem:[%s2618_s0 + $0x50] sm:$0xff] }
  0x30   :  { %805 = vmatprep.subr.mxu0 %v1657_v16 }
  0x31   :  { %806 = vmatpush1.msra.mxu0 %v576_v22  ;;  %v532_v22 = vld [vmem:[%s2618_s0 + $0x2f0] sm:$0xff] }
  0x32   :  { %184 = vmatmul.mubr.f32.gmra.mxu0 %v36_v50  ;;  %807 = vmatprep.subr.mxu0 %v1657_v16  ;;  %v481_v50 = vld [vmem:[%s2618_s0 + $0x88] sm:$0xff] }
  0x33   :  { %188 = vmatprep.mubr.f32.mxu0 %v39_v51  ;;  %808 = vmatpush1.msra.mxu0 %v575_v23  ;;  %v480_v51 = vld [vmem:[%s2618_s0 + $0x80] sm:$0xff] }
  0x34   :  { %809 = vmatprep.subr.mxu0 %v1657_v16 }
  0x35   :  { %810 = vmatpush1.msra.mxu0 %v574_v24 }
  0x36   :  { %189 = vmatmul.mubr.f32.gmra.mxu0 %v38_v52  ;;  %811 = vmatprep.subr.mxu0 %v1657_v16  ;;  %v485_v52 = vld [vmem:[%s2618_s0 + $0xb8] sm:$0xff] }
  0x37   :  { %193 = vmatprep.mubr.f32.mxu0 %v41_v53  ;;  %812 = vmatpush1.msra.mxu0 %v573_v25  ;;  %v484_v53 = vld [vmem:[%s2618_s0 + $0xb0] sm:$0xff] }
  0x38   :  { %813 = vmatprep.subr.mxu0 %v1657_v16 }
  0x39   :  { %814 = vmatpush1.msra.mxu0 %v572_v26 }
  0x3a   :  { %194 = vmatmul.mubr.f32.gmra.mxu0 %v40_v54  ;;  %815 = vmatprep.subr.mxu0 %v1657_v16  ;;  %v489_v54 = vld [vmem:[%s2618_s0 + $0xe8] sm:$0xff] }
  0x3b   :  { %198 = vmatprep.mubr.f32.mxu0 %v43_v55  ;;  %816 = vmatpush1.msra.mxu0 %v571_v27  ;;  %v488_v55 = vld [vmem:[%s2618_s0 + $0xe0] sm:$0xff] }
  0x3c   :  { %817 = vmatprep.subr.mxu0 %v1657_v16 }
  0x3d   :  { %818 = vmatpush1.msra.mxu0 %v570_v29 }
  0x3e   :  { %199 = vmatmul.mubr.f32.gmra.mxu0 %v42_v56  ;;  %819 = vmatprep.subr.mxu0 %v1657_v16  ;;  %v493_v56 = vld [vmem:[%s2618_s0 + $0x118] sm:$0xff] }
  0x3f   :  { %203 = vmatprep.mubr.f32.mxu0 %v45_v57  ;;  %820 = vmatpush1.msra.mxu0 %v569_v30  ;;  %v492_v57 = vld [vmem:[%s2618_s0 + $0x110] sm:$0xff]  ;;  %v549_v30 = vld [vmem:[%s2620_s3 + $0x78] sm:$0xff] }
  0x40   :  { %821 = vmatprep.subr.mxu0 %v1657_v16 }
  0x41   :  { %822 = vmatpush1.msra.mxu0 %v568_v31 }
  0x42   :  { %204 = vmatmul.mubr.f32.gmra.mxu0 %v44_v58  ;;  %823 = vmatprep.subr.mxu0 %v1657_v16  ;;  %v497_v58 = vld [vmem:[%s2618_s0 + $0x148] sm:$0xff] }
  0x43   :  { %208 = vmatprep.mubr.f32.mxu0 %v47_v59  ;;  %824 = vmatpush1.msra.mxu0 %v567_v32  ;;  %v496_v59 = vld [vmem:[%s2618_s0 + $0x140] sm:$0xff] }
  0x44   :  { %825 = vmatprep.subr.mxu0 %v1657_v16 }
  0x45   :  { %826 = vmatpush1.msra.mxu0 %v566_v33  ;;  %v564_v33 = vld [vmem:[%s2620_s3 + $0xf0] sm:$0xff] }
  0x46   :  { %209 = vmatmul.mubr.f32.gmra.mxu0 %v46_v60  ;;  %835 = vmatprep.subr.mxu0 %v1657_v16  ;;  %v501_v60 = vld [vmem:[%s2618_s0 + $0x178] sm:$0xff] }
  0x47   :  { %213 = vmatprep.mubr.f32.mxu0 %v49_v61  ;;  %836 = vmatpush2.msra.mxu0 %v593_v34  ;;  %v500_v61 = vld [vmem:[%s2618_s0 + $0x170] sm:$0xff] }
  0x48   :  { %837 = vmatprep.subr.mxu0 %v1657_v16 }
  0x49   :  { %838 = vmatpush2.msra.mxu0 %v592_v35  ;;  %v548_v35 = vld [vmem:[%s2620_s3 + $0x70] sm:$0xff] }
  0x4a   :  { %214 = vmatmul.mubr.f32.gmra.mxu0 %v48_v62  ;;  %839 = vmatprep.subr.mxu0 %v1657_v16  ;;  %v505_v62 = vld [vmem:[%s2618_s0 + $0x1a8] sm:$0xff] }
  0x4b   :  { %218 = vmatprep.mubr.f32.mxu0 %v51_v63  ;;  %840 = vmatpush2.msra.mxu0 %v591_v36  ;;  %v504_v63 = vld [vmem:[%s2618_s0 + $0x1a0] sm:$0xff] }
  0x4c   :  { %841 = vmatprep.subr.mxu0 %v1657_v16 }
  0x4d   :  { %842 = vmatpush2.msra.mxu0 %v590_v37 }
  0x4e   :  { %219 = vmatmul.mubr.f32.gmra.mxu0 %v50_v0  ;;  %843 = vmatprep.subr.mxu0 %v1657_v16  ;;  %v509_v0 = vld [vmem:[%s2618_s0 + $0x1d8] sm:$0xff] }
  0x4f   :  { %223 = vmatprep.mubr.f32.mxu0 %v53_v1  ;;  %844 = vmatpush2.msra.mxu0 %v589_v38  ;;  %v508_v1 = vld [vmem:[%s2618_s0 + $0x1d0] sm:$0xff]  ;;  %v563_v38 = vld [vmem:[%s2620_s3 + $0xe8] sm:$0xff] }
  0x50   :  { %845 = vmatprep.subr.mxu0 %v1657_v16 }
  0x51   :  { %846 = vmatpush2.msra.mxu0 %v588_v39 }
  0x52   :  { %224 = vmatmul.mubr.f32.gmra.mxu0 %v52_v2  ;;  %847 = vmatprep.subr.mxu0 %v1657_v16  ;;  %v513_v2 = vld [vmem:[%s2618_s0 + $0x208] sm:$0xff] }
  0x53   :  { %228 = vmatprep.mubr.f32.mxu0 %v55_v3  ;;  %848 = vmatpush2.msra.mxu0 %v587_v40  ;;  %v512_v3 = vld [vmem:[%s2618_s0 + $0x200] sm:$0xff]  ;;  %v547_v40 = vld [vmem:[%s2620_s3 + $0x68] sm:$0xff] }
  0x54   :  { %849 = vmatprep.subr.mxu0 %v1657_v16 }
  0x55   :  { %850 = vmatpush2.msra.mxu0 %v586_v41 }
  0x56   :  { %229 = vmatmul.mubr.f32.gmra.mxu0 %v54_v4  ;;  %851 = vmatprep.subr.mxu0 %v1657_v16  ;;  %v517_v4 = vld [vmem:[%s2618_s0 + $0x238] sm:$0xff] }
  0x57   :  { %233 = vmatprep.mubr.f32.mxu0 %v57_v5  ;;  %852 = vmatpush2.msra.mxu0 %v585_v42  ;;  %v516_v5 = vld [vmem:[%s2618_s0 + $0x230] sm:$0xff] }
  0x58   :  { %853 = vmatprep.subr.mxu0 %v1657_v16 }
  0x59   :  { %854 = vmatpush2.msra.mxu0 %v584_v43  ;;  %v562_v43 = vld [vmem:[%s2620_s3 + $0xe0] sm:$0xff] }
  0x5a   :  { %234 = vmatmul.mubr.f32.gmra.mxu0 %v56_v6  ;;  %855 = vmatprep.subr.mxu0 %v1657_v16  ;;  %v521_v6 = vld [vmem:[%s2618_s0 + $0x268] sm:$0xff] }
  0x5b   :  { %238 = vmatprep.mubr.f32.mxu0 %v59_v7  ;;  %856 = vmatpush2.msra.mxu0 %v583_v44  ;;  %v520_v7 = vld [vmem:[%s2618_s0 + $0x260] sm:$0xff] }
  0x5c   :  { %857 = vmatprep.subr.mxu0 %v1657_v16 }
  0x5d   :  { %858 = vmatpush2.msra.mxu0 %v582_v45  ;;  %v546_v45 = vld [vmem:[%s2620_s3 + $0x60] sm:$0xff] }
  0x5e   :  { %239 = vmatmul.mubr.f32.gmra.mxu0 %v58_v8  ;;  %v525_v8 = vld [vmem:[%s2618_s0 + $0x298] sm:$0xff] }
  0x5f   :  { %1280 = vmatprep.mubr.msk.f32.mxu0 %vm601_vm0, %v473_v46 }
  0x62   :  { %860 = vmatmul.mubr.f32.vlgmr.msra.gmra.mxu0 %v472_v47 }
  0x63   :  { %1281 = vmatprep.mubr.msk.f32.mxu0 %vm601_vm0, %v477_v48  ;;  %v561_v48 = vld [vmem:[%s2620_s3 + $0xd8] sm:$0xff] }
  0x66   :  { %865 = vmatmul.mubr.f32.gmra.mxu0 %v476_v49 }
  0x67   :  { %1282 = vmatprep.mubr.msk.f32.mxu0 %vm601_vm0, %v481_v50  ;;  %v545_v50 = vld [vmem:[%s2620_s3 + $0x58] sm:$0xff] }
  0x6a   :  { %870 = vmatmul.mubr.f32.gmra.mxu0 %v480_v51 }
  0x6b   :  { %1283 = vmatprep.mubr.msk.f32.mxu0 %vm601_vm0, %v485_v52 }
  0x6e   :  { %875 = vmatmul.mubr.f32.gmra.mxu0 %v484_v53  ;;  %v560_v53 = vld [vmem:[%s2620_s3 + $0xd0] sm:$0xff] }
  0x6f   :  { %1284 = vmatprep.mubr.msk.f32.mxu0 %vm601_vm0, %v489_v54 }
  0x72   :  { %880 = vmatmul.mubr.f32.gmra.mxu0 %v488_v55  ;;  %v544_v55 = vld [vmem:[%s2620_s3 + $0x50] sm:$0xff] }
  0x73   :  { %1285 = vmatprep.mubr.msk.f32.mxu0 %vm601_vm0, %v493_v56 }
  0x76   :  { %885 = vmatmul.mubr.f32.gmra.mxu0 %v492_v57 }
  0x77   :  { %1286 = vmatprep.mubr.msk.f32.mxu0 %vm601_vm0, %v497_v58  ;;  %v559_v58 = vld [vmem:[%s2620_s3 + $0xc8] sm:$0xff] }
  0x7a   :  { %890 = vmatmul.mubr.f32.gmra.mxu0 %v496_v59 }
  0x7b   :  { %1287 = vmatprep.mubr.msk.f32.mxu0 %vm601_vm0, %v501_v60  ;;  %v543_v60 = vld [vmem:[%s2620_s3 + $0x48] sm:$0xff] }
  0x7e   :  { %895 = vmatmul.mubr.f32.gmra.mxu0 %v500_v61 }
  0x7f   :  { %1288 = vmatprep.mubr.msk.f32.mxu0 %vm601_vm0, %v505_v62 }
  0x82   :  { %900 = vmatmul.mubr.f32.gmra.mxu0 %v504_v63  ;;  %v558_v63 = vld [vmem:[%s2620_s3 + $0xc0] sm:$0xff] }
  0x83   :  { %1289 = vmatprep.mubr.msk.f32.mxu0 %vm601_vm0, %v509_v0 }
  0x86   :  { %905 = vmatmul.mubr.f32.gmra.mxu0 %v508_v1  ;;  %v542_v1 = vld [vmem:[%s2620_s3 + $0x40] sm:$0xff] }
  0x87   :  { %1290 = vmatprep.mubr.msk.f32.mxu0 %vm601_vm0, %v513_v2 }
  0x8a   :  { %910 = vmatmul.mubr.f32.gmra.mxu0 %v512_v3 }
  0x8b   :  { %1291 = vmatprep.mubr.msk.f32.mxu0 %vm601_vm0, %v517_v4  ;;  %v557_v4 = vld [vmem:[%s2620_s3 + $0xb8] sm:$0xff] }
  0x8e   :  { %915 = vmatmul.mubr.f32.gmra.mxu0 %v516_v5 }
  0x8f   :  { %1292 = vmatprep.mubr.msk.f32.mxu0 %vm601_vm0, %v521_v6  ;;  %v541_v6 = vld [vmem:[%s2620_s3 + $0x38] sm:$0xff] }
  0x92   :  { %920 = vmatmul.mubr.f32.gmra.mxu0 %v520_v7 }
  0x93   :  { %1293 = vmatprep.mubr.msk.f32.mxu0 %vm601_vm0, %v525_v8 }
  0x96   :  { %925 = vmatmul.mubr.f32.gmra.mxu0 %v524_v10 }
  0x97   :  { %1294 = vmatprep.mubr.msk.f32.mxu0 %vm601_vm0, %v529_v14 }
  0x9a   :  { %930 = vmatmul.mubr.f32.gmra.mxu0 %v528_v17  ;;  %v539_v17 = vld [vmem:[%s2620_s3 + $0x28] sm:$0xff] }
  0x9b   :  { %1295 = vmatprep.mubr.msk.f32.mxu0 %vm601_vm0, %v533_v19 }
  0x9e   :  { %935 = vmatmul.mubr.f32.gmra.mxu0 %v532_v22  ;;  %v538_v22 = vld [vmem:[%s2620_s3 + $0x20] sm:$0xff] }
  0xe2   :  { %v1376_v9 = vpop.f32.mrf.mxu0 }
  0xe4   :  { %v1377_v12 = vpop.f32.mrf.mxu0 }
  0xe5   :  { %v1378_v13 = vadd.f32 %v1377_v12, %v1376_v9  ;;  %v556_v9 = vld [vmem:[%s2620_s3 + $0xb0] sm:$0xff] }
  0xe6   :  { %v1379_v15 = vpop.f32.mrf.mxu0  ;;  %v540_v12 = vld [vmem:[%s2620_s3 + $0x30] sm:$0xff] }
  0xe7   :  { %v166_v16 = vadd.f32 %v1378_v13, %v2159_v11 }
  0xe8   :  { %v1380_v18 = vpop.f32.mrf.mxu0 }
  0xe9   :  { %v1381_v20 = vadd.f32 %v1380_v18, %v1379_v15  ;;  %vm244_vm1 = vcmp.ge.f32.partialorder %v166_v16, 0.0  ;;  %v260_v21 = vmul.f32 0.1, %v166_v16  ;;  %v555_v15 = vld [vmem:[%s2620_s3 + $0xa8] sm:$0xff] }
  0xea   :  { %v1382_v23 = vpop.f32.mrf.mxu0 }
  0xeb   :  { %v171_v24 = vadd.f32 %v1381_v20, %v2159_v11  ;;  %v276_v25 = vsel %vm244_vm1, %v166_v16, %v260_v21  ;;  %v554_v20 = vld [vmem:[%s2620_s3 + $0xa0] sm:$0xff]  ;;  %vm453_vm1 = vcmask 523264  }
  0xec   :  { %v1383_v26 = vpop.f32.mrf.mxu0  ;;  %1592 = vmatprep.mubr.f32.mxu1 %v276_v25  ;;  %v553_v25 = vld [vmem:[%s2620_s3 + $0x98] sm:$0xff] }
  0xed   :  { %v1384_v27 = vadd.f32 %v1383_v26, %v1382_v23  ;;  %vm245_vm2 = vcmp.ge.f32.partialorder %v171_v24, 0.0  ;;  %v261_v28 = vmul.f32 0.1, %v171_v24 }
  0xee   :  { %v1385_v29 = vpop.f32.mrf.mxu0 }
  0xef   :  { %v176_v31 = vadd.f32 %v1384_v27, %v2159_v11  ;;  %v277_v32 = vsel %vm245_vm2, %v171_v24, %v261_v28  ;;  %v537_v27 = vld [vmem:[%s2620_s3 + $0x18] sm:$0xff] }
  0xf0   :  { %v1386_v34 = vpop.f32.mrf.mxu0  ;;  %1593 = vmatmul.mubr.f32.vlgmr.msra.gmra.mxu1 %v277_v32  ;;  %v536_v32 = vld [vmem:[%s2620_s3 + $0x10] sm:$0xff] }
  0xf1   :  { %v1387_v36 = vadd.f32 %v1386_v34, %v1385_v29  ;;  %vm246_vm3 = vcmp.ge.f32.partialorder %v176_v31, 0.0  ;;  %v262_v37 = vmul.f32 0.1, %v176_v31  ;;  %1457 = vmatpush3.msra.mxu1 %v549_v30  ;;  %v552_v30 = vld [vmem:[%s2620_s3 + $0x90] sm:$0xff] }
  0xf2   :  { %v1388_v39 = vpop.f32.mrf.mxu0  ;;  %1458 = vmatprep.subr.mxu1 %v564_v33 }
  0xf3   :  { %v181_v41 = vadd.f32 %v1387_v36, %v2159_v11  ;;  %v278_v42 = vsel %vm246_vm3, %v176_v31, %v262_v37  ;;  %1459 = vmatpush3.msra.mxu1 %v548_v35  ;;  %v551_v35 = vld [vmem:[%s2620_s3 + $0x88] sm:$0xff] }
  0xf4   :  { %v1389_v44 = vpop.f32.mrf.mxu0  ;;  %1595 = vmatprep.mubr.f32.mxu1 %v278_v42  ;;  %1460 = vmatprep.subr.mxu1 %v563_v38  ;;  %v535_v37 = vld [vmem:[%s2620_s3 + $0x8] sm:$0xff]  ;;  %v534_v42 = vld [vmem:[%s2620_s3] sm:$0xff] }
  0xf5   :  { %v1390_v46 = vadd.f32 %v1389_v44, %v1388_v39  ;;  %vm247_vm4 = vcmp.ge.f32.partialorder %v181_v41, 0.0  ;;  %v263_v47 = vmul.f32 0.1, %v181_v41  ;;  %1461 = vmatpush3.msra.mxu1 %v547_v40  ;;  %v550_v40 = vld [vmem:[%s2620_s3 + $0x80] sm:$0xff] }
  0xf6   :  { %v1391_v49 = vpop.f32.mrf.mxu0  ;;  %1462 = vmatprep.subr.mxu1 %v562_v43 }
  0xf7   :  { %v186_v51 = vadd.f32 %v1390_v46, %v2159_v11  ;;  %v279_v52 = vsel %vm247_vm4, %v181_v41, %v263_v47  ;;  %1463 = vmatpush3.msra.mxu1 %v546_v45 }
  0xf8   :  { %v1392_v54 = vpop.f32.mrf.mxu0  ;;  %1596 = vmatmul.mubr.f32.gmra.mxu1 %v279_v52  ;;  %1464 = vmatprep.subr.mxu1 %v561_v48 }
  0xf9   :  { %v1393_v56 = vadd.f32 %v1392_v54, %v1391_v49  ;;  %vm248_vm5 = vcmp.ge.f32.partialorder %v186_v51, 0.0  ;;  %v264_v57 = vmul.f32 0.1, %v186_v51  ;;  %1465 = vmatpush3.msra.mxu1 %v545_v50 }
  0xfa   :  { %v1394_v59 = vpop.f32.mrf.mxu0  ;;  %1466 = vmatprep.subr.mxu1 %v560_v53 }
  0xfb   :  { %v191_v61 = vadd.f32 %v1393_v56, %v2159_v11  ;;  %v280_v62 = vsel %vm248_vm5, %v186_v51, %v264_v57  ;;  %1467 = vmatpush3.msra.mxu1 %v544_v55 }
  0xfc   :  { %v1395_v0 = vpop.f32.mrf.mxu0  ;;  %1598 = vmatprep.mubr.f32.mxu1 %v280_v62  ;;  %1468 = vmatprep.subr.mxu1 %v559_v58 }
  0xfd   :  { %v1396_v2 = vadd.f32 %v1395_v0, %v1394_v59  ;;  %vm249_vm6 = vcmp.ge.f32.partialorder %v191_v61, 0.0  ;;  %v265_v3 = vmul.f32 0.1, %v191_v61  ;;  %1469 = vmatpush3.msra.mxu1 %v543_v60 }
  0xfe   :  { %v1397_v5 = vpop.f32.mrf.mxu0  ;;  %1470 = vmatprep.subr.mxu1 %v558_v63 }
  0xff   :  { %v196_v7 = vadd.f32 %v1396_v2, %v2159_v11  ;;  %v281_v8 = vsel %vm249_vm6, %v191_v61, %v265_v3  ;;  %1471 = vmatpush3.msra.mxu1 %v542_v1 }
 0x100   :  { %v1398_v10 = vpop.f32.mrf.mxu0  ;;  %1599 = vmatmul.mubr.f32.gmra.mxu1 %v281_v8  ;;  %1472 = vmatprep.subr.mxu1 %v557_v4 }
 0x101   :  { %v1399_v13 = vadd.f32 %v1398_v10, %v1397_v5  ;;  %vm250_vm7 = vcmp.ge.f32.partialorder %v196_v7, 0.0  ;;  %v266_v14 = vmul.f32 0.1, %v196_v7  ;;  %1473 = vmatpush3.msra.mxu1 %v541_v6 }
 0x102   :  { %v1400_v16 = vpop.f32.mrf.mxu0  ;;  %1474 = vmatprep.subr.mxu1 %v556_v9 }
 0x103   :  { %v201_v18 = vadd.f32 %v1399_v13, %v2159_v11  ;;  %v282_v19 = vsel %vm250_vm7, %v196_v7, %v266_v14  ;;  %1475 = vmatpush3.msra.mxu1 %v540_v12 }
 0x104   :  { %v1401_v21 = vpop.f32.mrf.mxu0  ;;  %1601 = vmatprep.mubr.f32.mxu1 %v282_v19  ;;  %1476 = vmatprep.subr.mxu1 %v555_v15  ;;  %v471_v15 = vld [vmem:[%s2618_s0 + $0x18] sm:$0xff] }
 0x105   :  { %v1402_v23 = vadd.f32 %v1401_v21, %v1400_v16  ;;  %vm251_vm8 = vcmp.ge.f32.partialorder %v201_v18, 0.0  ;;  %v267_v24 = vmul.f32 0.1, %v201_v18  ;;  %1477 = vmatpush3.msra.mxu1 %v539_v17  ;;  %v470_v17 = vld [vmem:[%s2618_s0 + $0x10] sm:$0xff]  ;;  %v479_v19 = vld [vmem:[%s2618_s0 + $0x78] sm:$0xff]  ;;  %v483_v21 = vld [vmem:[%s2618_s0 + $0xa8] sm:$0xff] }
 0x106   :  { %v1403_v26 = vpop.f32.mrf.mxu0  ;;  %1478 = vmatprep.subr.mxu1 %v554_v20  ;;  %v478_v20 = vld [vmem:[%s2618_s0 + $0x70] sm:$0xff] }
 0x107   :  { %v206_v28 = vadd.f32 %v1402_v23, %v2159_v11  ;;  %v283_v29 = vsel %vm251_vm8, %v201_v18, %v267_v24  ;;  %1479 = vmatpush3.msra.mxu1 %v538_v22  ;;  %v475_v18 = vld [vmem:[%s2618_s0 + $0x48] sm:$0xff]  ;;  %v482_v22 = vld [vmem:[%s2618_s0 + $0xa0] sm:$0xff]  ;;  %v487_v23 = vld [vmem:[%s2618_s0 + $0xd8] sm:$0xff] }
 0x108   :  { %v1404_v31 = vpop.f32.mrf.mxu0  ;;  %1602 = vmatmul.mubr.f32.gmra.mxu1 %v283_v29  ;;  %1480 = vmatprep.subr.mxu1 %v553_v25  ;;  %v486_v24 = vld [vmem:[%s2618_s0 + $0xd0] sm:$0xff]  ;;  %v491_v25 = vld [vmem:[%s2618_s0 + $0x108] sm:$0xff] }
 0x109   :  { %v1405_v33 = vadd.f32 %v1404_v31, %v1403_v26  ;;  %vm252_vm9 = vcmp.ge.f32.partialorder %v206_v28, 0.0  ;;  %v268_v34 = vmul.f32 0.1, %v206_v28  ;;  %1481 = vmatpush3.msra.mxu1 %v537_v27  ;;  %v490_v26 = vld [vmem:[%s2618_s0 + $0x100] sm:$0xff]  ;;  %v495_v27 = vld [vmem:[%s2618_s0 + $0x138] sm:$0xff]  ;;  %v499_v29 = vld [vmem:[%s2618_s0 + $0x168] sm:$0xff] }
 0x10a   :  { %v1406_v36 = vpop.f32.mrf.mxu0  ;;  %1482 = vmatprep.subr.mxu1 %v552_v30  ;;  %v498_v30 = vld [vmem:[%s2618_s0 + $0x160] sm:$0xff]  ;;  %v503_v31 = vld [vmem:[%s2618_s0 + $0x198] sm:$0xff] }
 0x10b   :  { %v211_v38 = vadd.f32 %v1405_v33, %v2159_v11  ;;  %v284_v39 = vsel %vm252_vm9, %v206_v28, %v268_v34  ;;  %1483 = vmatpush3.msra.mxu1 %v536_v32  ;;  %v494_v28 = vld [vmem:[%s2618_s0 + $0x130] sm:$0xff]  ;;  %v507_v33 = vld [vmem:[%s2618_s0 + $0x1c8] sm:$0xff]  ;;  %v506_v34 = vld [vmem:[%s2618_s0 + $0x1c0] sm:$0xff] }
 0x10c   :  { %v1407_v41 = vpop.f32.mrf.mxu0  ;;  %1604 = vmatprep.mubr.f32.mxu1 %v284_v39  ;;  %1484 = vmatprep.subr.mxu1 %v551_v35  ;;  %v502_v32 = vld [vmem:[%s2618_s0 + $0x190] sm:$0xff]  ;;  %v511_v35 = vld [vmem:[%s2618_s0 + $0x1f8] sm:$0xff]  ;;  %v514_v39 = vld [vmem:[%s2618_s0 + $0x220] sm:$0xff] }
 0x10d   :  { %v1408_v43 = vadd.f32 %v1407_v41, %v1406_v36  ;;  %vm253_vm10 = vcmp.ge.f32.partialorder %v211_v38, 0.0  ;;  %v269_v44 = vmul.f32 0.1, %v211_v38  ;;  %1485 = vmatpush3.msra.mxu1 %v535_v37  ;;  %v510_v36 = vld [vmem:[%s2618_s0 + $0x1f0] sm:$0xff]  ;;  %v515_v37 = vld [vmem:[%s2618_s0 + $0x228] sm:$0xff] }
 0x10e   :  { %v1409_v45 = vpop.f32.mrf.mxu0  ;;  %1486 = vmatprep.subr.mxu1 %v550_v40  ;;  %v519_v40 = vld [vmem:[%s2618_s0 + $0x258] sm:$0xff]  ;;  %v518_v41 = vld [vmem:[%s2618_s0 + $0x250] sm:$0xff] }
 0x10f   :  { %v216_v46 = vadd.f32 %v1408_v43, %v2159_v11  ;;  %v285_v47 = vsel %vm253_vm10, %v211_v38, %v269_v44  ;;  %1487 = vmatpush3.msra.mxu1 %v534_v42  ;;  %v995_v38 = vld [vmem:[%s2622_s6 + $0x38] sm:$0xff]  ;;  %v523_v42 = vld [vmem:[%s2618_s0 + $0x288] sm:$0xff]  ;;  %v994_v43 = vld [vmem:[%s2622_s6 + $0x30] sm:$0xff] }
 0x110   :  { %v1410_v48 = vpop.f32.mrf.mxu0  ;;  %1605 = vmatmul.mubr.f32.gmra.mxu1 %v285_v47  ;;  %1616 = vmatprep.subr.mxu1 %v995_v38  ;;  %v522_v44 = vld [vmem:[%s2618_s0 + $0x280] sm:$0xff]  ;;  %v531_v47 = vld [vmem:[%s2618_s0 + $0x2e8] sm:$0xff] }
 0x111   :  { %v1411_v49 = vadd.f32 %v1410_v48, %v1409_v45  ;;  %vm254_vm11 = vcmp.ge.f32.partialorder %v216_v46, 0.0  ;;  %v270_v50 = vmul.f32 0.1, %v216_v46  ;;  %v527_v45 = vld [vmem:[%s2618_s0 + $0x2b8] sm:$0xff]  ;;  %v993_v48 = vld [vmem:[%s2622_s6 + $0x28] sm:$0xff] }
 0x112   :  { %v1412_v51 = vpop.f32.mrf.mxu0 }
 0x113   :  { %v221_v52 = vadd.f32 %v1411_v49, %v2159_v11  ;;  %v286_v53 = vsel %vm254_vm11, %v216_v46, %v270_v50  ;;  %v526_v46 = vld [vmem:[%s2618_s0 + $0x2b0] sm:$0xff]  ;;  %v530_v49 = vld [vmem:[%s2618_s0 + $0x2e0] sm:$0xff] }
 0x114   :  { %v1413_v54 = vpop.f32.mrf.mxu0  ;;  %1607 = vmatprep.mubr.f32.mxu1 %v286_v53  ;;  %v992_v50 = vld [vmem:[%s2622_s6 + $0x20] sm:$0xff]  ;;  %v991_v53 = vld [vmem:[%s2622_s6 + $0x18] sm:$0xff] }
 0x115   :  { %v1414_v55 = vadd.f32 %v1413_v54, %v1412_v51  ;;  %vm255_vm12 = vcmp.ge.f32.partialorder %v221_v52, 0.0  ;;  %v271_v56 = vmul.f32 0.1, %v221_v52 }
 0x116   :  { %v1415_v57 = vpop.f32.mrf.mxu0 }
 0x117   :  { %v226_v58 = vadd.f32 %v1414_v55, %v2159_v11  ;;  %v287_v59 = vsel %vm255_vm12, %v221_v52, %v271_v56  ;;  %v990_v55 = vld [vmem:[%s2622_s6 + $0x10] sm:$0xff] }
 0x118   :  { %v1416_v60 = vpop.f32.mrf.mxu0  ;;  %1608 = vmatmul.mubr.f32.gmra.mxu1 %v287_v59  ;;  %v988_v59 = vld [vmem:[%s2622_s6] sm:$0xff] }
 0x119   :  { %v1417_v61 = vadd.f32 %v1416_v60, %v1415_v57  ;;  %vm256_vm13 = vcmp.ge.f32.partialorder %v226_v58, 0.0  ;;  %v272_v62 = vmul.f32 0.1, %v226_v58  ;;  %v989_v57 = vld [vmem:[%s2622_s6 + $0x8] sm:$0xff] }
 0x11a   :  { %v1418_v63 = vpop.f32.mrf.mxu0 }
 0x11b   :  { %v231_v0 = vadd.f32 %v1417_v61, %v2159_v11  ;;  %v288_v1 = vsel %vm256_vm13, %v226_v58, %v272_v62 }
 0x11c   :  { %v1419_v2 = vpop.f32.mrf.mxu0  ;;  %1610 = vmatprep.mubr.f32.mxu1 %v288_v1 }
 0x11d   :  { %v1420_v3 = vadd.f32 %v1419_v2, %v1418_v63  ;;  %vm257_vm14 = vcmp.ge.f32.partialorder %v231_v0, 0.0  ;;  %v273_v4 = vmul.f32 0.1, %v231_v0 }
 0x11e   :  { %v1421_v5 = vpop.f32.mrf.mxu0 }
 0x11f   :  { %v236_v6 = vadd.f32 %v1420_v3, %v2159_v11  ;;  %v289_v7 = vsel %vm257_vm14, %v231_v0, %v273_v4 }
 0x120   :  { %v1422_v8 = vpop.f32.mrf.mxu0  ;;  %1611 = vmatmul.mubr.f32.gmra.mxu1 %v289_v7 }
 0x121   :  { %v1423_v9 = vadd.f32 %v1422_v8, %v1421_v5  ;;  %vm258_vm15 = vcmp.ge.f32.partialorder %v236_v6, 0.0  ;;  %v274_v10 = vmul.f32 0.1, %v236_v6 }
 0x122   :  { %v2392_v51 = vpop.f32.mrf.mxu0 }
 0x123   :  { %v241_v12 = vadd.f32 %v1423_v9, %v2159_v11  ;;  %v290_v13 = vsel %vm258_vm15, %v236_v6, %v274_v10  ;;  %v474_v11 = vld [vmem:[%s2618_s0 + $0x40] sm:$0xff] }
 0x124   :  { %1613 = vmatprep.mubr.f32.mxu1 %v290_v13  ;;  %v863_v52 = vpop.f32.mrf.mxu0 }
 0x125   :  { %vm259_vm0 = vcmp.ge.f32.partialorder %v241_v12, 0.0  ;;  %v275_v14 = vmul.f32 0.1, %v241_v12 }
 0x126   :  { %v2397_v54 = vpop.f32.mrf.mxu0 }
 0x127   :  { %v291_v16 = vsel %vm259_vm0, %v241_v12, %v275_v14 }
 0x128   :  { %1614 = vmatmul.mubr.f32.gmra.mxu1 %v291_v16  ;;  %v868_v56 = vpop.f32.mrf.mxu0 }
 0x129   :  { %714 = vmatprep.mubr.f32.mxu1 %v471_v15 }
 0x12a   :  { %v2405_v58 = vpop.f32.mrf.mxu0 }
 0x12c   :  { %715 = vmatmul.mubr.f32.vlgmr.msra.gmra.mxu1 %v470_v17  ;;  %v873_v60 = vpop.f32.mrf.mxu0 }
 0x12d   :  { %719 = vmatprep.mubr.f32.mxu1 %v475_v18  ;;  %1617 = vmatpush3.msra.mxu1 %v995_v38 }
 0x12e   :  { %1618 = vmatprep.subr.mxu1 %v994_v43  ;;  %v2410_v61 = vpop.f32.mrf.mxu0 }
 0x12f   :  { %1619 = vmatpush3.msra.mxu1 %v994_v43 }
 0x130   :  { %720 = vmatmul.mubr.f32.gmra.mxu1 %v474_v11  ;;  %1620 = vmatprep.subr.mxu1 %v993_v48  ;;  %v878_v62 = vpop.f32.mrf.mxu0 }
 0x131   :  { %724 = vmatprep.mubr.f32.mxu1 %v479_v19  ;;  %1621 = vmatpush3.msra.mxu1 %v993_v48 }
 0x132   :  { %1622 = vmatprep.subr.mxu1 %v992_v50  ;;  %v2412_v63 = vpop.f32.mrf.mxu0 }
 0x133   :  { %1623 = vmatpush3.msra.mxu1 %v992_v50 }
 0x134   :  { %725 = vmatmul.mubr.f32.gmra.mxu1 %v478_v20  ;;  %1624 = vmatprep.subr.mxu1 %v991_v53  ;;  %v883_v0 = vpop.f32.mrf.mxu0 }
 0x135   :  { %729 = vmatprep.mubr.f32.mxu1 %v483_v21  ;;  %1625 = vmatpush3.msra.mxu1 %v991_v53 }
 0x136   :  { %1626 = vmatprep.subr.mxu1 %v990_v55  ;;  %v2414_v1 = vpop.f32.mrf.mxu0 }
 0x137   :  { %1627 = vmatpush3.msra.mxu1 %v990_v55 }
 0x138   :  { %730 = vmatmul.mubr.f32.gmra.mxu1 %v482_v22  ;;  %1628 = vmatprep.subr.mxu1 %v989_v57  ;;  %v888_v2 = vpop.f32.mrf.mxu0 }
 0x139   :  { %734 = vmatprep.mubr.f32.mxu1 %v487_v23  ;;  %1629 = vmatpush3.msra.mxu1 %v989_v57 }
 0x13a   :  { %1630 = vmatprep.subr.mxu1 %v988_v59  ;;  %v2416_v3 = vpop.f32.mrf.mxu0 }
 0x13b   :  { %1631 = vmatpush3.msra.mxu1 %v988_v59 }
 0x13c   :  { %735 = vmatmul.mubr.f32.gmra.mxu1 %v486_v24  ;;  %v893_v4 = vpop.f32.mrf.mxu0 }
 0x13d   :  { %739 = vmatprep.mubr.f32.mxu1 %v491_v25 }
 0x13e   :  { %v2418_v5 = vpop.f32.mrf.mxu0 }
 0x140   :  { %740 = vmatmul.mubr.f32.gmra.mxu1 %v490_v26  ;;  %v898_v6 = vpop.f32.mrf.mxu0 }
 0x141   :  { %744 = vmatprep.mubr.f32.mxu1 %v495_v27 }
 0x142   :  { %v2420_v7 = vpop.f32.mrf.mxu0 }
 0x144   :  { %745 = vmatmul.mubr.f32.gmra.mxu1 %v494_v28  ;;  %v903_v8 = vpop.f32.mrf.mxu0 }
 0x145   :  { %749 = vmatprep.mubr.f32.mxu1 %v499_v29 }
 0x146   :  { %v2422_v9 = vpop.f32.mrf.mxu0 }
 0x148   :  { %750 = vmatmul.mubr.f32.gmra.mxu1 %v498_v30  ;;  %v908_v10 = vpop.f32.mrf.mxu0 }
 0x149   :  { %754 = vmatprep.mubr.f32.mxu1 %v503_v31 }
 0x14a   :  { %v2424_v12 = vpop.f32.mrf.mxu0 }
 0x14c   :  { %755 = vmatmul.mubr.f32.gmra.mxu1 %v502_v32  ;;  %v913_v13 = vpop.f32.mrf.mxu0 }
 0x14d   :  { %759 = vmatprep.mubr.f32.mxu1 %v507_v33 }
 0x14e   :  { %v2426_v14 = vpop.f32.mrf.mxu0 }
 0x150   :  { %760 = vmatmul.mubr.f32.gmra.mxu1 %v506_v34  ;;  %v918_v15 = vpop.f32.mrf.mxu0 }
 0x151   :  { %764 = vmatprep.mubr.f32.mxu1 %v511_v35 }
 0x152   :  { %v2428_v16 = vpop.f32.mrf.mxu0 }
 0x154   :  { %765 = vmatmul.mubr.f32.gmra.mxu1 %v510_v36  ;;  %v923_v17 = vpop.f32.mrf.mxu0 }
 0x155   :  { %769 = vmatprep.mubr.f32.mxu1 %v515_v37 }
 0x156   :  { %v2430_v18 = vpop.f32.mrf.mxu0 }
 0x158   :  { %770 = vmatmul.mubr.f32.gmra.mxu1 %v514_v39  ;;  %v928_v11 = vpop.f32.mrf.mxu0 }
 0x159   :  { %774 = vmatprep.mubr.f32.mxu1 %v519_v40 }
 0x15a   :  { %v2432_v19 = vpop.f32.mrf.mxu0 }
 0x15c   :  { %775 = vmatmul.mubr.f32.gmra.mxu1 %v518_v41  ;;  %v933_v20 = vpop.f32.mrf.mxu0  ;;  %v2503_v41 = vld [vmem:[%s2624_s4] ss:$0 sm:$0xff] }
 0x15d   :  { %779 = vmatprep.mubr.f32.mxu1 %v523_v42 }
 0x15e   :  { %v2434_v21 = vpop.f32.mrf.mxu0 }
 0x160   :  { %780 = vmatmul.mubr.f32.gmra.mxu1 %v522_v44  ;;  %v938_v22 = vpop.f32.mrf.mxu0 }
 0x161   :  { %784 = vmatprep.mubr.f32.mxu1 %v527_v45 }
 0x164   :  { %785 = vmatmul.mubr.f32.gmra.mxu1 %v526_v46 }
 0x165   :  { %789 = vmatprep.mubr.f32.mxu1 %v531_v47 }
 0x168   :  { %790 = vmatmul.mubr.f32.gmra.mxu1 %v530_v49 }
 0x1b0   :  { %v1594_v23 = vpop.f32.mrf.mxu1 }
 0x1b1   :  { %455 = vst.msk [vmem:[%s2623_s7 + $0x8] sm:$0xff] %vm453_vm1, %v1594_v23 }
 0x1b2   :  { %v374_v24 = vpop.f32.mrf.mxu1 }
 0x1b3   :  { %454 = vst.msk [vmem:[%s2623_s7] sm:$0xff] %vm453_vm1, %v374_v24 }
 0x1b8   :  { %v1597_v25 = vpop.f32.mrf.mxu1 }
 0x1b9   :  { %457 = vst.msk [vmem:[%s2623_s7 + $0x18] sm:$0xff] %vm453_vm1, %v1597_v25 }
 0x1ba   :  { %v384_v26 = vpop.f32.mrf.mxu1 }
 0x1bb   :  { %456 = vst.msk [vmem:[%s2623_s7 + $0x10] sm:$0xff] %vm453_vm1, %v384_v26 }
 0x1c0   :  { %v1600_v27 = vpop.f32.mrf.mxu1 }
 0x1c1   :  { %459 = vst.msk [vmem:[%s2623_s7 + $0x28] sm:$0xff] %vm453_vm1, %v1600_v27 }
 0x1c2   :  { %v394_v28 = vpop.f32.mrf.mxu1 }
 0x1c3   :  { %458 = vst.msk [vmem:[%s2623_s7 + $0x20] sm:$0xff] %vm453_vm1, %v394_v28 }
 0x1c8   :  { %v1603_v29 = vpop.f32.mrf.mxu1 }
 0x1c9   :  { %461 = vst.msk [vmem:[%s2623_s7 + $0x38] sm:$0xff] %vm453_vm1, %v1603_v29 }
 0x1ca   :  { %v404_v30 = vpop.f32.mrf.mxu1 }
 0x1cb   :  { %460 = vst.msk [vmem:[%s2623_s7 + $0x30] sm:$0xff] %vm453_vm1, %v404_v30 }
 0x1d0   :  { %v1606_v31 = vpop.f32.mrf.mxu1 }
 0x1d1   :  { %463 = vst.msk [vmem:[%s2623_s7 + $0x48] sm:$0xff] %vm453_vm1, %v1606_v31 }
 0x1d2   :  { %v414_v32 = vpop.f32.mrf.mxu1 }
 0x1d3   :  { %462 = vst.msk [vmem:[%s2623_s7 + $0x40] sm:$0xff] %vm453_vm1, %v414_v32 }
 0x1d8   :  { %v1609_v33 = vpop.f32.mrf.mxu1 }
 0x1d9   :  { %465 = vst.msk [vmem:[%s2623_s7 + $0x58] sm:$0xff] %vm453_vm1, %v1609_v33 }
 0x1da   :  { %v424_v34 = vpop.f32.mrf.mxu1 }
 0x1db   :  { %464 = vst.msk [vmem:[%s2623_s7 + $0x50] sm:$0xff] %vm453_vm1, %v424_v34 }
 0x1e0   :  { %v1612_v35 = vpop.f32.mrf.mxu1 }
 0x1e1   :  { %467 = vst.msk [vmem:[%s2623_s7 + $0x68] sm:$0xff] %vm453_vm1, %v1612_v35 }
 0x1e2   :  { %v434_v36 = vpop.f32.mrf.mxu1 }
 0x1e3   :  { %466 = vst.msk [vmem:[%s2623_s7 + $0x60] sm:$0xff] %vm453_vm1, %v434_v36 }
 0x1e8   :  { %v1615_v37 = vpop.f32.mrf.mxu1 }
 0x1e9   :  { %469 = vst.msk [vmem:[%s2623_s7 + $0x78] sm:$0xff] %vm453_vm1, %v1615_v37 }
 0x1ea   :  { %v444_v38 = vpop.f32.mrf.mxu1 }
 0x1eb   :  { %468 = vst.msk [vmem:[%s2623_s7 + $0x70] sm:$0xff] %vm453_vm1, %v444_v38 }
 0x1ec   :  { %v1488_v39 = vpop.f32.mrf.mxu1 }
 0x1ee   :  { %v1489_v40 = vpop.f32.mrf.mxu1 }
 0x1ef   :  { %v1490_v42 = vadd.f32 %v1489_v40, %v1488_v39 }
 0x1f0   :  { %v1491_v43 = vpop.f32.mrf.mxu1 }
 0x1f1   :  { %v717_v44 = vadd.f32 %v1490_v42, %v2503_v41 }
 0x1f2   :  { %v1492_v45 = vpop.f32.mrf.mxu1 }
 0x1f3   :  { %v862_v46 = vadd.f32 %v2392_v51, %v717_v44  ;;  %v1493_v47 = vadd.f32 %v1492_v45, %v1491_v43 }
 0x1f4   :  { %v1494_v48 = vpop.f32.mrf.mxu1 }
 0x1f5   :  { %vm940_vm2 = vcmp.ge.f32.partialorder %v862_v46, 0.0  ;;  %v956_v49 = vmul.f32 0.1, %v862_v46  ;;  %v722_v50 = vadd.f32 %v1493_v47, %v2503_v41 }
 0x1f6   :  { %v1495_v52 = vpop.f32.mrf.mxu1 }
 0x1f7   :  { %v867_v53 = vadd.f32 %v2397_v54, %v722_v50  ;;  %v1496_v55 = vadd.f32 %v1495_v52, %v1494_v48  ;;  %v972_v56 = vsel %vm940_vm2, %v862_v46, %v956_v49 }
 0x1f8   :  { %v1497_v57 = vpop.f32.mrf.mxu1  ;;  %1632 = vmatprep.mubr.msk.f32.mxu1 %vm453_vm1, %v972_v56 }
 0x1f9   :  { %vm941_vm3 = vcmp.ge.f32.partialorder %v867_v53, 0.0  ;;  %v957_v59 = vmul.f32 0.1, %v867_v53  ;;  %v727_v60 = vadd.f32 %v1496_v55, %v2503_v41 }
 0x1fa   :  { %v1498_v62 = vpop.f32.mrf.mxu1 }
 0x1fb   :  { %v973_v51 = vsel %vm941_vm3, %v867_v53, %v957_v59  ;;  %v872_v0 = vadd.f32 %v2405_v58, %v727_v60  ;;  %v1499_v2 = vadd.f32 %v1498_v62, %v1497_v57  ;;  %vm1253_vm3 = vcmask 257024  }
 0x1fc   :  { %v1500_v4 = vpop.f32.mrf.mxu1  ;;  %1633 = vmatmul.mubr.msk.f32.vlgmr.msra.gmra.mxu1 %vm453_vm1, %v973_v51 }
 0x1fd   :  { %vm942_vm4 = vcmp.ge.f32.partialorder %v872_v0, 0.0  ;;  %v958_v6 = vmul.f32 0.1, %v872_v0  ;;  %v732_v54 = vadd.f32 %v1499_v2, %v2503_v41 }
 0x1fe   :  { %v1501_v8 = vpop.f32.mrf.mxu1 }
 0x1ff   :  { %v877_v10 = vadd.f32 %v2410_v61, %v732_v54  ;;  %v1502_v13 = vadd.f32 %v1501_v8, %v1500_v4  ;;  %v974_v15 = vsel %vm942_vm4, %v872_v0, %v958_v6 }
 0x200   :  { %v1503_v17 = vpop.f32.mrf.mxu1  ;;  %1635 = vmatprep.mubr.msk.f32.mxu1 %vm453_vm1, %v974_v15 }
 0x201   :  { %vm943_vm5 = vcmp.ge.f32.partialorder %v877_v10, 0.0  ;;  %v959_v11 = vmul.f32 0.1, %v877_v10  ;;  %v737_v58 = vadd.f32 %v1502_v13, %v2503_v41 }
 0x202   :  { %v1504_v20 = vpop.f32.mrf.mxu1 }
 0x203   :  { %v882_v22 = vadd.f32 %v2412_v63, %v737_v58  ;;  %v1505_v23 = vadd.f32 %v1504_v20, %v1503_v17  ;;  %v975_v24 = vsel %vm943_vm5, %v877_v10, %v959_v11 }
 0x204   :  { %v1506_v25 = vpop.f32.mrf.mxu1  ;;  %1636 = vmatmul.mubr.msk.f32.gmra.mxu1 %vm453_vm1, %v975_v24 }
 0x205   :  { %vm944_vm6 = vcmp.ge.f32.partialorder %v882_v22, 0.0  ;;  %v960_v26 = vmul.f32 0.1, %v882_v22  ;;  %v742_v61 = vadd.f32 %v1505_v23, %v2503_v41 }
 0x206   :  { %v1507_v27 = vpop.f32.mrf.mxu1 }
 0x207   :  { %v887_v28 = vadd.f32 %v2414_v1, %v742_v61  ;;  %v1508_v29 = vadd.f32 %v1507_v27, %v1506_v25  ;;  %v976_v30 = vsel %vm944_vm6, %v882_v22, %v960_v26 }
 0x208   :  { %v1509_v31 = vpop.f32.mrf.mxu1  ;;  %1638 = vmatprep.mubr.msk.f32.mxu1 %vm453_vm1, %v976_v30 }
 0x209   :  { %vm945_vm7 = vcmp.ge.f32.partialorder %v887_v28, 0.0  ;;  %v961_v32 = vmul.f32 0.1, %v887_v28  ;;  %v747_v63 = vadd.f32 %v1508_v29, %v2503_v41 }
 0x20a   :  { %v1510_v33 = vpop.f32.mrf.mxu1 }
 0x20b   :  { %v892_v34 = vadd.f32 %v2416_v3, %v747_v63  ;;  %v1511_v35 = vadd.f32 %v1510_v33, %v1509_v31  ;;  %v977_v36 = vsel %vm945_vm7, %v887_v28, %v961_v32 }
 0x20c   :  { %v1512_v37 = vpop.f32.mrf.mxu1  ;;  %1639 = vmatmul.mubr.msk.f32.gmra.mxu1 %vm453_vm1, %v977_v36 }
 0x20d   :  { %vm946_vm8 = vcmp.ge.f32.partialorder %v892_v34, 0.0  ;;  %v962_v38 = vmul.f32 0.1, %v892_v34  ;;  %v752_v1 = vadd.f32 %v1511_v35, %v2503_v41 }
 0x20e   :  { %v1513_v39 = vpop.f32.mrf.mxu1 }
 0x20f   :  { %v897_v40 = vadd.f32 %v2418_v5, %v752_v1  ;;  %v1514_v42 = vadd.f32 %v1513_v39, %v1512_v37  ;;  %v978_v43 = vsel %vm946_vm8, %v892_v34, %v962_v38 }
 0x210   :  { %v1515_v44 = vpop.f32.mrf.mxu1  ;;  %1641 = vmatprep.mubr.msk.f32.mxu1 %vm453_vm1, %v978_v43 }
 0x211   :  { %vm947_vm9 = vcmp.ge.f32.partialorder %v897_v40, 0.0  ;;  %v963_v45 = vmul.f32 0.1, %v897_v40  ;;  %v757_v3 = vadd.f32 %v1514_v42, %v2503_v41 }
 0x212   :  { %v1516_v46 = vpop.f32.mrf.mxu1 }
 0x213   :  { %v902_v47 = vadd.f32 %v2420_v7, %v757_v3  ;;  %v1517_v48 = vadd.f32 %v1516_v46, %v1515_v44  ;;  %v979_v49 = vsel %vm947_vm9, %v897_v40, %v963_v45 }
 0x214   :  { %v1518_v50 = vpop.f32.mrf.mxu1  ;;  %1642 = vmatmul.mubr.msk.f32.gmra.mxu1 %vm453_vm1, %v979_v49 }
 0x215   :  { %vm948_vm10 = vcmp.ge.f32.partialorder %v902_v47, 0.0  ;;  %v964_v52 = vmul.f32 0.1, %v902_v47  ;;  %v762_v5 = vadd.f32 %v1517_v48, %v2503_v41 }
 0x216   :  { %v1519_v53 = vpop.f32.mrf.mxu1 }
 0x217   :  { %v907_v55 = vadd.f32 %v2422_v9, %v762_v5  ;;  %v1520_v56 = vadd.f32 %v1519_v53, %v1518_v50  ;;  %v980_v57 = vsel %vm948_vm10, %v902_v47, %v964_v52 }
 0x218   :  { %v1521_v59 = vpop.f32.mrf.mxu1  ;;  %1644 = vmatprep.mubr.msk.f32.mxu1 %vm453_vm1, %v980_v57 }
 0x219   :  { %vm949_vm11 = vcmp.ge.f32.partialorder %v907_v55, 0.0  ;;  %v965_v60 = vmul.f32 0.1, %v907_v55  ;;  %v767_v7 = vadd.f32 %v1520_v56, %v2503_v41 }
 0x21a   :  { %v1522_v62 = vpop.f32.mrf.mxu1 }
 0x21b   :  { %v912_v51 = vadd.f32 %v2424_v12, %v767_v7  ;;  %v1523_v0 = vadd.f32 %v1522_v62, %v1521_v59  ;;  %v981_v2 = vsel %vm949_vm11, %v907_v55, %v965_v60 }
 0x21c   :  { %v1524_v4 = vpop.f32.mrf.mxu1  ;;  %1645 = vmatmul.mubr.msk.f32.gmra.mxu1 %vm453_vm1, %v981_v2 }
 0x21d   :  { %vm950_vm12 = vcmp.ge.f32.partialorder %v912_v51, 0.0  ;;  %v966_v6 = vmul.f32 0.1, %v912_v51  ;;  %v772_v9 = vadd.f32 %v1523_v0, %v2503_v41 }
 0x21e   :  { %v1525_v54 = vpop.f32.mrf.mxu1 }
 0x21f   :  { %v917_v8 = vadd.f32 %v2426_v14, %v772_v9  ;;  %v1526_v10 = vadd.f32 %v1525_v54, %v1524_v4  ;;  %v982_v13 = vsel %vm950_vm12, %v912_v51, %v966_v6 }
 0x220   :  { %v1527_v15 = vpop.f32.mrf.mxu1  ;;  %1647 = vmatprep.mubr.msk.f32.mxu1 %vm453_vm1, %v982_v13 }
 0x221   :  { %vm951_vm13 = vcmp.ge.f32.partialorder %v917_v8, 0.0  ;;  %v967_v17 = vmul.f32 0.1, %v917_v8  ;;  %v777_v12 = vadd.f32 %v1526_v10, %v2503_v41 }
 0x222   :  { %v1528_v11 = vpop.f32.mrf.mxu1 }
 0x223   :  { %v922_v58 = vadd.f32 %v2428_v16, %v777_v12  ;;  %v1529_v20 = vadd.f32 %v1528_v11, %v1527_v15  ;;  %v983_v22 = vsel %vm951_vm13, %v917_v8, %v967_v17 }
 0x224   :  { %v1530_v23 = vpop.f32.mrf.mxu1  ;;  %1648 = vmatmul.mubr.msk.f32.gmra.mxu1 %vm453_vm1, %v983_v22 }
 0x225   :  { %vm952_vm14 = vcmp.ge.f32.partialorder %v922_v58, 0.0  ;;  %v968_v24 = vmul.f32 0.1, %v922_v58  ;;  %v782_v14 = vadd.f32 %v1529_v20, %v2503_v41 }
 0x226   :  { %v1531_v25 = vpop.f32.mrf.mxu1 }
 0x227   :  { %v927_v26 = vadd.f32 %v2430_v18, %v782_v14  ;;  %v1532_v61 = vadd.f32 %v1531_v25, %v1530_v23  ;;  %v984_v27 = vsel %vm952_vm14, %v922_v58, %v968_v24 }
 0x228   :  { %v1533_v28 = vpop.f32.mrf.mxu1  ;;  %1650 = vmatprep.mubr.msk.f32.mxu1 %vm453_vm1, %v984_v27 }
 0x229   :  { %vm953_vm15 = vcmp.ge.f32.partialorder %v927_v26, 0.0  ;;  %v969_v29 = vmul.f32 0.1, %v927_v26  ;;  %v787_v16 = vadd.f32 %v1532_v61, %v2503_v41 }
 0x22a   :  { %v1534_v30 = vpop.f32.mrf.mxu1 }
 0x22b   :  { %v932_v31 = vadd.f32 %v2432_v19, %v787_v16  ;;  %v1535_v32 = vadd.f32 %v1534_v30, %v1533_v28  ;;  %v985_v63 = vsel %vm953_vm15, %v927_v26, %v969_v29 }
 0x22c   :  { %1651 = vmatmul.mubr.msk.f32.gmra.mxu1 %vm453_vm1, %v985_v63 }
 0x22d   :  { %vm954_vm0 = vcmp.ge.f32.partialorder %v932_v31, 0.0  ;;  %v970_v33 = vmul.f32 0.1, %v932_v31  ;;  %v792_v18 = vadd.f32 %v1535_v32, %v2503_v41 }
 0x22f   :  { %v937_v34 = vadd.f32 %v2434_v21, %v792_v18  ;;  %v986_v35 = vsel %vm954_vm0, %v932_v31, %v970_v33 }
 0x230   :  { %1653 = vmatprep.mubr.msk.f32.mxu1 %vm453_vm1, %v986_v35 }
 0x231   :  { %vm955_vm2 = vcmp.ge.f32.partialorder %v937_v34, 0.0  ;;  %v971_v36 = vmul.f32 0.1, %v937_v34 }
 0x233   :  { %v987_v37 = vsel %vm955_vm2, %v937_v34, %v971_v36 }
 0x234   :  { %1654 = vmatmul.mubr.msk.f32.gmra.mxu1 %vm453_vm1, %v987_v37 }
 0x2bc   :  { %v1634_v38 = vpop.f32.mrf.mxu1 }
 0x2bd   :  { %v1329_v19 = vpack.c.bf16 %v1634_v38, %v1634_v38 }
 0x2be   :  { %v1110_v1 = vpop.f32.mrf.mxu1 }
 0x2bf   :  { %1255 = vst.msk [vmem:[%s2625_s8 + $0x4] sm:$0xf] %vm1253_vm3, %v1329_v19  ;;  %v1328_v41 = vpack.c.bf16 %v1110_v1, %v1110_v1 }
 0x2c1   :  { %1254 = vst.msk [vmem:[%s2625_s8] sm:$0xf] %vm1253_vm3, %v1328_v41 }
 0x2c4   :  { %v1637_v21 = vpop.f32.mrf.mxu1 }
 0x2c5   :  { %v1331_v39 = vpack.c.bf16 %v1637_v21, %v1637_v21 }
 0x2c6   :  { %v1120_v40 = vpop.f32.mrf.mxu1 }
 0x2c7   :  { %1257 = vst.msk [vmem:[%s2625_s8 + $0xc] sm:$0xf] %vm1253_vm3, %v1331_v39  ;;  %v1330_v42 = vpack.c.bf16 %v1120_v40, %v1120_v40 }
 0x2c9   :  { %1256 = vst.msk [vmem:[%s2625_s8 + $0x8] sm:$0xf] %vm1253_vm3, %v1330_v42 }
 0x2cc   :  { %v1640_v43 = vpop.f32.mrf.mxu1 }
 0x2cd   :  { %v1333_v44 = vpack.c.bf16 %v1640_v43, %v1640_v43 }
 0x2ce   :  { %v1130_v45 = vpop.f32.mrf.mxu1 }
 0x2cf   :  { %1259 = vst.msk [vmem:[%s2625_s8 + $0x14] sm:$0xf] %vm1253_vm3, %v1333_v44  ;;  %v1332_v3 = vpack.c.bf16 %v1130_v45, %v1130_v45 }
 0x2d1   :  { %1258 = vst.msk [vmem:[%s2625_s8 + $0x10] sm:$0xf] %vm1253_vm3, %v1332_v3 }
 0x2d4   :  { %v1643_v46 = vpop.f32.mrf.mxu1 }
 0x2d5   :  { %v1335_v47 = vpack.c.bf16 %v1643_v46, %v1643_v46 }
 0x2d6   :  { %v1140_v48 = vpop.f32.mrf.mxu1 }
 0x2d7   :  { %1261 = vst.msk [vmem:[%s2625_s8 + $0x1c] sm:$0xf] %vm1253_vm3, %v1335_v47  ;;  %v1334_v49 = vpack.c.bf16 %v1140_v48, %v1140_v48 }
 0x2d9   :  { %1260 = vst.msk [vmem:[%s2625_s8 + $0x18] sm:$0xf] %vm1253_vm3, %v1334_v49 }
 0x2dc   :  { %v1646_v50 = vpop.f32.mrf.mxu1 }
 0x2dd   :  { %v1337_v52 = vpack.c.bf16 %v1646_v50, %v1646_v50 }
 0x2de   :  { %v1150_v5 = vpop.f32.mrf.mxu1 }
 0x2df   :  { %1263 = vst.msk [vmem:[%s2625_s8 + $0x24] sm:$0xf] %vm1253_vm3, %v1337_v52  ;;  %v1336_v53 = vpack.c.bf16 %v1150_v5, %v1150_v5 }
 0x2e1   :  { %1262 = vst.msk [vmem:[%s2625_s8 + $0x20] sm:$0xf] %vm1253_vm3, %v1336_v53 }
 0x2e4   :  { %v1649_v55 = vpop.f32.mrf.mxu1 }
 0x2e5   :  { %v1339_v56 = vpack.c.bf16 %v1649_v55, %v1649_v55 }
 0x2e6   :  { %v1160_v57 = vpop.f32.mrf.mxu1 }
 0x2e7   :  { %1265 = vst.msk [vmem:[%s2625_s8 + $0x2c] sm:$0xf] %vm1253_vm3, %v1339_v56  ;;  %v1338_v59 = vpack.c.bf16 %v1160_v57, %v1160_v57 }
 0x2e9   :  { %1264 = vst.msk [vmem:[%s2625_s8 + $0x28] sm:$0xf] %vm1253_vm3, %v1338_v59 }
 0x2ec   :  { %v1652_v60 = vpop.f32.mrf.mxu1 }
 0x2ed   :  { %v1341_v7 = vpack.c.bf16 %v1652_v60, %v1652_v60 }
 0x2ee   :  { %v1170_v62 = vpop.f32.mrf.mxu1 }
 0x2ef   :  { %1267 = vst.msk [vmem:[%s2625_s8 + $0x34] sm:$0xf] %vm1253_vm3, %v1341_v7  ;;  %v1340_v51 = vpack.c.bf16 %v1170_v62, %v1170_v62 }
 0x2f1   :  { %1266 = vst.msk [vmem:[%s2625_s8 + $0x30] sm:$0xf] %vm1253_vm3, %v1340_v51 }
 0x2f4   :  { %v1655_v0 = vpop.f32.mrf.mxu1 }
 0x2f5   :  { %v1343_v2 = vpack.c.bf16 %v1655_v0, %v1655_v0 }
 0x2f6   :  { %v1180_v4 = vpop.f32.mrf.mxu1 }
 0x2f7   :  { %1269 = vst.msk [vmem:[%s2625_s8 + $0x3c] sm:$0xf] %vm1253_vm3, %v1343_v2  ;;  %v1342_v6 = vpack.c.bf16 %v1180_v4, %v1180_v4 }
 0x2f9   :  { %1268 = vst.msk [vmem:[%s2625_s8 + $0x38] sm:$0xf] %vm1253_vm3, %v1342_v6 }

</bundles_post_ra>
